<compile_context>
chip_gen: v6e
topology: v6e:2x2x1
jax: 0.10.0
libtpu: 0.0.40
codegen_flags: <defaults>
</compile_context>

<pallas_src>
import functools

import jax
import jax.numpy as jnp
from jax.experimental import pallas as pl
from jax.experimental.pallas import tpu as pltpu


# ---------------------------------------------------------------------------
# small helpers
# ---------------------------------------------------------------------------

def _round_up(x, m):
    return ((x + m - 1) // m) * m


def _pick_tile(size, cap, unit=128):
    """Largest multiple of `unit` that divides `size` (itself a multiple of
    `unit`) and does not exceed `cap`."""
    n = size // unit
    best = 1
    for d in range(1, min(n, max(cap // unit, 1)) + 1):
        if n % d == 0:
            best = d
    return best * unit


def _pad2d(a, rows, cols):
    pr = rows - a.shape[0]
    pc = cols - a.shape[1]
    if pr or pc:
        a = jnp.pad(a, ((0, pr), (0, pc)))
    return a


_SQRT_HALF = 0.7071067811865476


def _gelu_exact_f32(x):
    """Exact erf-GELU, erf via Abramowitz&Stegun 7.1.26 (|err| < 1.5e-7),
    built only from elementwise primitives Mosaic is guaranteed to lower
    (abs/exp/mul/add/where). Matches torch.nn.GELU (approximate='none')."""
    z = x * _SQRT_HALF
    az = jnp.abs(z)
    t = 1.0 / (1.0 + 0.3275911 * az)
    poly = t * (0.254829592 + t * (-0.284496736 + t * (1.421413741
               + t * (-1.453152027 + t * 1.061405429))))
    erf_abs = 1.0 - poly * jnp.exp(-az * az)
    erf = jnp.where(z >= 0.0, erf_abs, -erf_abs)
    return 0.5 * x * (1.0 + erf)


# ---------------------------------------------------------------------------
# 1) tiled fused linear:
#    out = [gelu]( [LN(x)] @ w [+ b] ) [+ residual]
# ---------------------------------------------------------------------------

def _linear_kernel(*refs, has_bias, fuse_ln, has_gelu, has_residual,
                   ln_eps, k_true):
    it = iter(refs)
    x_ref = next(it)
    w_ref = next(it)
    b_ref = next(it) if has_bias else None
    g_ref = next(it) if fuse_ln else None
    beta_ref = next(it) if fuse_ln else None
    r_ref = next(it) if has_residual else None
    o_ref = next(it)
    acc_ref = next(it)

    k = pl.program_id(2)

    @pl.when(k == 0)
    def _():
        acc_ref[...] = jnp.zeros_like(acc_ref)

    x = x_ref[...]
    if fuse_ln:
        # LayerNorm fused into the matmul prologue (requires a single K-step).
        # Stats use the true feature count; padded columns are zero and the
        # padded gamma/beta are zero, so padding contributes nothing.
        xf = x.astype(jnp.float32)
        inv_k = jnp.float32(1.0 / k_true)
        mean = jnp.sum(xf, axis=-1, keepdims=True) * inv_k
        msq = jnp.sum(xf * xf, axis=-1, keepdims=True) * inv_k
        var = jnp.maximum(msq - mean * mean, 0.0)
        rstd = jax.lax.rsqrt(var + ln_eps)
        x = ((xf - mean) * rstd * g_ref[...] + beta_ref[...]).astype(x_ref.dtype)

    acc_ref[...] += jnp.dot(x, w_ref[...], preferred_element_type=jnp.float32)

    @pl.when(k == pl.num_programs(2) - 1)
    def _():
        out = acc_ref[...]
        if has_bias:
            out = out + b_ref[...].astype(jnp.float32)
        if has_gelu:
            out = _gelu_exact_f32(out)
        if has_residual:
            out = out + r_ref[...].astype(jnp.float32)
        o_ref[...] = out.astype(o_ref.dtype)


def pallas_linear(x, w, b=None, residual=None, *, ln_gamma=None, ln_beta=None,
                  ln_eps=1e-5, gelu=False, compute_dtype=None,
                  tm_cap=256, tn_cap=512, tk_cap=1024):
    """[gelu]([LN(x)](M,K) @ w(K,N) [+ b]) [+ residual(M,N)] -> (M,N)."""
    M, K = x.shape
    K2, N = w.shape
    assert K == K2
    out_dtype = x.dtype

    fuse_ln = ln_gamma is not None
    has_bias = b is not None
    has_res = residual is not None

    # Pad so every block is (8,128)-aligned and the output is lane-dense.
    Np = _round_up(N, 128)
    Kp = _round_up(K, 128)
    tm = min(tm_cap, _round_up(M, 8))
    Mp = _round_up(M, tm)
    tn = _pick_tile(Np, tn_cap)
    tk = _pick_tile(Kp, tk_cap)
    if fuse_ln:
        assert tk == Kp, "LayerNorm fusion needs a single K-step (Kp <= tk_cap)"
    # Per-step VMEM (f32, caps): 2*(tm*tk + tk*tn + tm*tn(+res)) + acc
    # ~= 8.5 MiB -- fits even the 16 MiB v5e scoped default; we still set
    # vmem_limit_bytes=32 MiB explicitly (safe on v5e/v6e/v7x physical VMEM).

    if compute_dtype is not None:
        x = x.astype(compute_dtype)        # bf16 feed -> f32 MXU accumulation
        w = w.astype(compute_dtype)

    x_p = _pad2d(x, Mp, Kp)
    w_p = _pad2d(w, Kp, Np)

    inputs = [x_p, w_p]
    in_specs = [
        pl.BlockSpec((tm, tk), lambda i, j, k: (i, k)),
        pl.BlockSpec((tk, tn), lambda i, j, k: (k, j)),
    ]
    if has_bias:
        inputs.append(jnp.pad(b, (0, Np - N)).reshape(1, Np))
        in_specs.append(pl.BlockSpec((1, tn), lambda i, j, k: (0, j)))
    if fuse_ln:
        inputs.append(jnp.pad(ln_gamma.astype(jnp.float32), (0, Kp - K)).reshape(1, Kp))
        inputs.append(jnp.pad(ln_beta.astype(jnp.float32), (0, Kp - K)).reshape(1, Kp))
        in_specs.append(pl.BlockSpec((1, tk), lambda i, j, k: (0, k)))
        in_specs.append(pl.BlockSpec((1, tk), lambda i, j, k: (0, k)))
    if has_res:
        inputs.append(_pad2d(residual, Mp, Np))
        in_specs.append(pl.BlockSpec((tm, tn), lambda i, j, k: (i, j)))

    kernel = functools.partial(
        _linear_kernel, has_bias=has_bias, fuse_ln=fuse_ln, has_gelu=gelu,
        has_residual=has_res, ln_eps=ln_eps, k_true=K)

    out = pl.pallas_call(
        kernel,
        out_shape=jax.ShapeDtypeStruct((Mp, Np), out_dtype),
        grid_spec=pltpu.PrefetchScalarGridSpec(
            num_scalar_prefetch=0,
            grid=(Mp // tm, Np // tn, Kp // tk),
            in_specs=in_specs,
            out_specs=pl.BlockSpec((tm, tn), lambda i, j, k: (i, j)),
            scratch_shapes=[pltpu.VMEM((tm, tn), jnp.float32)],
        ),
        compiler_params=pltpu.CompilerParams(
            dimension_semantics=("parallel", "parallel", "arbitrary"),
            vmem_limit_bytes=32 * 1024 * 1024),
    )(*inputs)
    return out[:M, :N]


# ---------------------------------------------------------------------------
# 2) standalone LayerNorm (fallback only: used when dim is too large to fuse
#    the norm into the consuming matmul's prologue)
# ---------------------------------------------------------------------------

def _layernorm_kernel(x_ref, g_ref, b_ref, o_ref, *, eps):
    x = x_ref[...].astype(jnp.float32)
    mean = jnp.mean(x, axis=-1, keepdims=True)
    xc = x - mean
    var = jnp.mean(xc * xc, axis=-1, keepdims=True)
    inv = jax.lax.rsqrt(var + eps)
    y = xc * inv * g_ref[...].astype(jnp.float32) + b_ref[...].astype(jnp.float32)
    o_ref[...] = y.astype(o_ref.dtype)


def pallas_layernorm(x, gamma, beta, *, eps=1e-5, tm_cap=1024):
    M, C = x.shape
    tm = min(tm_cap, _round_up(M, 8))
    Mp = _round_up(M, tm)
    x_p = _pad2d(x, Mp, C)  # feature dim stays un-padded (stats are over C)
    g = gamma.reshape(1, C)
    b = beta.reshape(1, C)
    out = pl.pallas_call(
        functools.partial(_layernorm_kernel, eps=eps),
        out_shape=jax.ShapeDtypeStruct((Mp, C), x.dtype),
        grid_spec=pltpu.PrefetchScalarGridSpec(
            num_scalar_prefetch=0,
            grid=(Mp // tm,),
            in_specs=[pl.BlockSpec((tm, C), lambda i: (i, 0)),
                      pl.BlockSpec((1, C), lambda i: (0, 0)),
                      pl.BlockSpec((1, C), lambda i: (0, 0))],
            out_specs=pl.BlockSpec((tm, C), lambda i: (i, 0)),
        ),
        compiler_params=pltpu.CompilerParams(dimension_semantics=("parallel",)),
    )(x_p, g, b)
    return out[:M]


# ---------------------------------------------------------------------------
# 3) causal-masked softmax attention.
#    One batch per grid step; ALL heads of that batch are processed from the
#    row-major (N, C) / (N, 2C) tiles (head columns sliced in-VMEM), so no
#    head split/merge transposes ever touch HBM, and per-step overhead is
#    amortized across heads.
# ---------------------------------------------------------------------------
# TODO(synk): for long sequences this materializes an (N, N) score tile per
# head in VMEM; switch to a flash-style K-tiled online softmax when N grows
# (most urgent on v7x with its 64 MiB physical VMEM).

def _attention_kernel(q_ref, kv_ref, o_ref, *, scale, num_heads):
    n, c = q_ref.shape[1], q_ref.shape[2]
    hd = c // num_heads

    q = q_ref[0].astype(jnp.float32) * jnp.float32(scale)   # pre-scale q (N*C mults)
    kv = kv_ref[0].astype(jnp.float32)                       # (N, 2C)
    k_all = kv[:, :c]
    v_all = kv[:, c:]

    row = jax.lax.broadcasted_iota(jnp.int32, (n, n), 0)
    col = jax.lax.broadcasted_iota(jnp.int32, (n, n), 1)
    causal = col > row                                        # subsequent mask

    outs = []
    for h in range(num_heads):
        qh = q[:, h * hd:(h + 1) * hd]
        kh = k_all[:, h * hd:(h + 1) * hd]
        vh = v_all[:, h * hd:(h + 1) * hd]
        # scores = (q*scale) @ k^T
        s = jax.lax.dot_general(qh, kh, (((1,), (1,)), ((), ())),
                                preferred_element_type=jnp.float32)
        # masked_fill_(subsequent_mask, -1e9), exactly as in the PyTorch module
        s = jnp.where(causal, jnp.float32(-1e9), s)
        m = jnp.max(s, axis=-1, keepdims=True)
        p = jnp.exp(s - m)
        denom = jnp.sum(p, axis=-1, keepdims=True)
        # EUP approx reciprocal + one Newton step: N^2 divides -> N^2 mults,
        # accuracy restored to ~f32 at O(N) extra VPU cost.
        inv = pl.reciprocal(denom, approx=True)
        inv = inv * (2.0 - denom * inv)
        p = p * inv
        outs.append(jnp.dot(p, vh, preferred_element_type=jnp.float32))

    o_ref[0] = jnp.concatenate(outs, axis=-1).astype(o_ref.dtype)


def pallas_masked_attention(q, kv, *, num_heads, scale):
    """q: (B, N, C), kv: (B, N, 2C) -> (B, N, C), head-interleaved like the
    PyTorch (attn @ v).transpose(1,2).reshape(B,N,C)."""
    B, N, C = q.shape
    return pl.pallas_call(
        functools.partial(_attention_kernel, scale=scale, num_heads=num_heads),
        out_shape=jax.ShapeDtypeStruct((B, N, C), q.dtype),
        grid_spec=pltpu.PrefetchScalarGridSpec(
            num_scalar_prefetch=0,
            grid=(B,),
            in_specs=[pl.BlockSpec((1, N, C), lambda b: (b, 0, 0)),
                      pl.BlockSpec((1, N, 2 * C), lambda b: (b, 0, 0))],
            out_specs=pl.BlockSpec((1, N, C), lambda b: (b, 0, 0)),
        ),
        compiler_params=pltpu.CompilerParams(dimension_semantics=("parallel",)),
    )(q, kv)


# ---------------------------------------------------------------------------
# Block3D module (JAX/Pallas)
# ---------------------------------------------------------------------------

class Block3D:
    """JAX/Pallas re-implementation of the PyTorch Block3D forward pass
    (drop=attn_drop=drop_path=0.0, norm_layer=LayerNorm, act=GELU)."""

    _tk_cap = 1024   # max single-K-step width used for LN fusion decision

    def __init__(self, dim, num_heads, patch_size=(4, 4, 4), mlp_ratio=4,
                 qkv_bias=False, qk_scale=None, key=jax.random.PRNGKey(0),
                 dtype=jnp.float32, compute_dtype=None):
        self.dim = dim
        self.num_heads = num_heads
        self.patch_size = patch_size
        self.mlp_ratio = mlp_ratio
        self.qkv_bias = qkv_bias
        # compute_dtype=jnp.bfloat16 feeds the MXU bf16 with f32 accumulation
        # (~3x MXU throughput, half the DMA).  Default f32 keeps the result
        # bit-tight against the f32 reference.
        self.compute_dtype = compute_dtype
        head_dim = dim // num_heads
        self.scale = float(qk_scale or head_dim ** (-0.5))
        hidden = int(dim * mlp_ratio)

        ks = jax.random.split(key, 6)

        def linear_init(k, fan_in, fan_out, use_bias=True):
            kw, kb = jax.random.split(k)
            bound = 1.0 / (fan_in ** 0.5)
            w = jax.random.uniform(kw, (fan_in, fan_out),
                                   minval=-bound, maxval=bound, dtype=dtype)
            if use_bias:
                b = jax.random.uniform(kb, (fan_out,),
                                       minval=-bound, maxval=bound, dtype=dtype)
            else:
                b = jnp.zeros((fan_out,), dtype)  # bias=False -> zero bias
            return w, b

        # q/k/v: qkv_bias defaults to False in Block3D
        self.wq, self.bq = linear_init(ks[0], dim, dim, use_bias=qkv_bias)
        self.wk, self.bk = linear_init(ks[1], dim, dim, use_bias=qkv_bias)
        self.wv, self.bv = linear_init(ks[2], dim, dim, use_bias=qkv_bias)
        # fused K|V projection weights (one matmul, halves reads of LN1(x))
        self.wkv = jnp.concatenate([self.wk, self.wv], axis=1)
        self.bkv = jnp.concatenate([self.bk, self.bv], axis=0)
        self.wproj, self.bproj = linear_init(ks[3], dim, dim)
        self.w1, self.b1 = linear_init(ks[4], dim, hidden)
        self.w2, self.b2 = linear_init(ks[5], hidden, dim)
        # LayerNorm params (PyTorch default init: ones / zeros), eps=1e-5
        self.ln1_g = jnp.ones((dim,), dtype)
        self.ln1_b = jnp.zeros((dim,), dtype)
        self.ln2_g = jnp.ones((dim,), dtype)
        self.ln2_b = jnp.zeros((dim,), dtype)
        self.eps = 1e-5

        self._fwd = jax.jit(self._forward)

    def _forward(self, x, transients):
        B, N, C = x.shape
        assert x.shape == transients.shape, "wrong meas and lct_vol"
        M = B * N
        cd = self.compute_dtype

        x2 = x.reshape(M, C)
        t2 = transients.reshape(M, C)

        fuse_ln = _round_up(C, 128) <= self._tk_cap
        qb = self.bq if self.qkv_bias else None        # skip zero-bias DMA/add
        kvb = self.bkv if self.qkv_bias else None

        # --- attention branch: x + proj(Attn(LN1(x), transients)) ---
        q = pallas_linear(t2, self.wq, qb, compute_dtype=cd)   # q from raw transients
        if fuse_ln:
            # LN1 fused into the K|V projection prologue
            kv = pallas_linear(x2, self.wkv, kvb, ln_gamma=self.ln1_g,
                               ln_beta=self.ln1_b, ln_eps=self.eps,
                               compute_dtype=cd)
        else:
            h = pallas_layernorm(x2, self.ln1_g, self.ln1_b, eps=self.eps)
            kv = pallas_linear(h, self.wkv, kvb, compute_dtype=cd)

        # (M,C)->(B,N,C) / (M,2C)->(B,N,2C) are free row-major reshapes; the
        # attention kernel slices head columns in VMEM, so no HBM transposes.
        attn = pallas_masked_attention(q.reshape(B, N, C),
                                       kv.reshape(B, N, 2 * C),
                                       num_heads=self.num_heads,
                                       scale=self.scale)
        # proj + residual fused into the matmul epilogue
        x2 = pallas_linear(attn.reshape(M, C), self.wproj, self.bproj,
                           residual=x2, compute_dtype=cd)

        # --- MLP branch: x + fc2(GELU(fc1(LN2(x)))) ---
        if fuse_ln:
            # LN2 fused into fc1's prologue, exact erf-GELU into its epilogue
            mid = pallas_linear(x2, self.w1, self.b1, ln_gamma=self.ln2_g,
                                ln_beta=self.ln2_b, ln_eps=self.eps,
                                gelu=True, compute_dtype=cd)
        else:
            h2 = pallas_layernorm(x2, self.ln2_g, self.ln2_b, eps=self.eps)
            mid = pallas_linear(h2, self.w1, self.b1, gelu=True, compute_dtype=cd)
        x2 = pallas_linear(mid, self.w2, self.b2, residual=x2, compute_dtype=cd)

        return x2.reshape(B, N, C)

    def __call__(self, x, transients, mask=None):
        return self._fwd(x, transients)


# ---------------------------------------------------------------------------
# plain-JAX reference for correctness checking
# ---------------------------------------------------------------------------

def _reference_block3d(mod, x, transients):
    B, N, C = x.shape
    H = mod.num_heads
    hd = C // H
    eps = mod.eps

    def ln(z, g, b):
        m = jnp.mean(z, axis=-1, keepdims=True)
        v = jnp.mean((z - m) ** 2, axis=-1, keepdims=True)
        return (z - m) / jnp.sqrt(v + eps) * g + b

    h = ln(x, mod.ln1_g, mod.ln1_b)
    q = transients @ mod.wq + mod.bq
    k = h @ mod.wk + mod.bk
    v = h @ mod.wv + mod.bv

    def heads(z):
        return z.reshape(B, N, H, hd).transpose(0, 2, 1, 3)

    qh, kh, vh = heads(q), heads(k), heads(v)
    attn = jnp.einsum("bhnd,bhmd->bhnm", qh, kh) * mod.scale
    causal = jnp.triu(jnp.ones((N, N), dtype=bool), k=1)
    attn = jnp.where(causal[None, None], -1e9, attn)
    attn = jax.nn.softmax(attn, axis=-1)
    out = jnp.einsum("bhnm,bhmd->bhnd", attn, vh)
    out = out.transpose(0, 2, 1, 3).reshape(B, N, C)
    x = x + (out @ mod.wproj + mod.bproj)

    h2 = ln(x, mod.ln2_g, mod.ln2_b)
    mid = jax.nn.gelu(h2 @ mod.w1 + mod.b1, approximate=False)
    x = x + (mid @ mod.w2 + mod.b2)
    return x


if __name__ == "__main__":
    key = jax.random.PRNGKey(0)
    kx, kt, kp = jax.random.split(key, 3)

    # Small shapes consistent with Block3D's forward: (B, N, C) tokens.
    B, N, dim, num_heads = 2, 64, 32, 4

    x = jax.random.normal(kx, (B, N, dim), dtype=jnp.float32)
    transients = jax.random.normal(kt, (B, N, dim), dtype=jnp.float32)

    block = Block3D(dim=dim, num_heads=num_heads, key=kp)

    out = block(x, transients)
    out = jax.block_until_ready(out)

    ref = _reference_block3d(block, x, transients)
    ref = jax.block_until_ready(ref)

    assert out.shape == (B, N, dim), (out.shape, (B, N, dim))
    assert bool(jnp.all(jnp.isfinite(out))), "non-finite output"
    assert jnp.allclose(out, ref, atol=2e-3, rtol=2e-3), (
        "mismatch vs reference, max abs diff = %e"
        % float(jnp.max(jnp.abs(out - ref))))

    print("KERNEL_OK")
</pallas_src>

<mosaic_0001>
module attributes {stable_mosaic.version = 11 : i64} {
  func.func @_linear_kernel(%arg0: i32, %arg1: i32, %arg2: i32, %arg3: memref<128x128xf32, #tpu.memory_space<vmem>>, %arg4: memref<128x128xf32, #tpu.memory_space<vmem>>, %arg5: memref<1x128xf32, #tpu.memory_space<vmem>>, %arg6: memref<1x128xf32, #tpu.memory_space<vmem>>, %arg7: memref<128x128xf32, #tpu.memory_space<vmem>>, %arg8: memref<128x128xf32, #tpu.memory_space<vmem>>) attributes {dimension_semantics = [#tpu.dimension_semantics<parallel>, #tpu.dimension_semantics<parallel>, #tpu.dimension_semantics<arbitrary>], iteration_bounds = array<i64: 1, 1, 1>, scalar_prefetch = 0 : i64, scratch_operands = 1 : i64, tpu.core_type = #tpu.core_type<tc>, window_params = [{transform_indices = @transform_0, window_bounds = array<i64: 128, 128>}, {transform_indices = @transform_1, window_bounds = array<i64: 128, 128>}, {transform_indices = @transform_2, window_bounds = array<i64: 1, 128>}, {transform_indices = @transform_3, window_bounds = array<i64: 1, 128>}, {transform_indices = @transform_4, window_bounds = array<i64: 128, 128>}]} {
    %c0_i32 = arith.constant 0 : i32
    %0 = arith.cmpi eq, %arg2, %c0_i32 : i32
    %1 = arith.extui %0 : i1 to i32
    %c0_i32_0 = arith.constant 0 : i32
    %2 = arith.cmpi ne, %1, %c0_i32_0 : i32
    scf.if %2 {
      %cst_20 = arith.constant 0.000000e+00 : f32
      %38 = vector.broadcast %cst_20 : f32 to vector<128x128xf32>
      %c0_21 = arith.constant 0 : index
      %c0_22 = arith.constant 0 : index
      %39 = vector.load %arg8[%c0_21, %c0_22] : memref<128x128xf32, #tpu.memory_space<vmem>>, vector<128x128xf32>
      tpu.vector_store %arg8[%c0_21, %c0_22], %38 {strides = array<i32>} : memref<128x128xf32, #tpu.memory_space<vmem>>, vector<128x128xf32>,
    } else {
    }
    %c0 = arith.constant 0 : index
    %c0_1 = arith.constant 0 : index
    %3 = vector.load %arg3[%c0, %c0_1] : memref<128x128xf32, #tpu.memory_space<vmem>>, vector<128x128xf32>
    %cst = arith.constant dense<0.000000e+00> : vector<128xf32>
    %4 = vector.multi_reduction <add>, %3, %cst [1] : vector<128x128xf32> to vector<128xf32>
    %5 = vector.shape_cast %4 : vector<128xf32> to vector<128x1xf32>
    %cst_2 = arith.constant 3.125000e-02 : f32
    %6 = vector.broadcast %cst_2 : f32 to vector<128x1xf32>
    %7 = arith.mulf %5, %6 : vector<128x1xf32>
    %8 = arith.mulf %3, %3 : vector<128x128xf32>
    %cst_3 = arith.constant dense<0.000000e+00> : vector<128xf32>
    %9 = vector.multi_reduction <add>, %8, %cst_3 [1] : vector<128x128xf32> to vector<128xf32>
    %10 = vector.shape_cast %9 : vector<128xf32> to vector<128x1xf32>
    %cst_4 = arith.constant 3.125000e-02 : f32
    %11 = vector.broadcast %cst_4 : f32 to vector<128x1xf32>
    %12 = arith.mulf %10, %11 : vector<128x1xf32>
    %13 = arith.mulf %7, %7 : vector<128x1xf32>
    %14 = arith.subf %12, %13 : vector<128x1xf32>
    %cst_5 = arith.constant 0.000000e+00 : f32
    %15 = vector.broadcast %cst_5 : f32 to vector<128x1xf32>
    %16 = arith.maximumf %14, %15 : vector<128x1xf32>
    %cst_6 = arith.constant 9.99999974E-6 : f32
    %17 = vector.broadcast %cst_6 : f32 to vector<128x1xf32>
    %18 = arith.addf %16, %17 : vector<128x1xf32>
    %19 = math.rsqrt %18 : vector<128x1xf32>
    %20 = vector.broadcast %7 : vector<128x1xf32> to vector<128x128xf32>
    %21 = arith.subf %3, %20 : vector<128x128xf32>
    %22 = vector.broadcast %19 : vector<128x1xf32> to vector<128x128xf32>
    %23 = arith.mulf %21, %22 : vector<128x128xf32>
    %c0_7 = arith.constant 0 : index
    %c0_8 = arith.constant 0 : index
    %24 = vector.load %arg5[%c0_7, %c0_8] : memref<1x128xf32, #tpu.memory_space<vmem>>, vector<1x128xf32>
    %25 = vector.broadcast %24 : vector<1x128xf32> to vector<128x128xf32>
    %26 = arith.mulf %23, %25 : vector<128x128xf32>
    %c0_9 = arith.constant 0 : index
    %c0_10 = arith.constant 0 : index
    %27 = vector.load %arg6[%c0_9, %c0_10] : memref<1x128xf32, #tpu.memory_space<vmem>>, vector<1x128xf32>
    %28 = vector.broadcast %27 : vector<1x128xf32> to vector<128x128xf32>
    %29 = arith.addf %26, %28 : vector<128x128xf32>
    %c0_11 = arith.constant 0 : index
    %c0_12 = arith.constant 0 : index
    %30 = vector.load %arg8[%c0_11, %c0_12] : memref<128x128xf32, #tpu.memory_space<vmem>>, vector<128x128xf32>
    %c0_13 = arith.constant 0 : index
    %c0_14 = arith.constant 0 : index
    %31 = vector.load %arg4[%c0_13, %c0_14] : memref<128x128xf32, #tpu.memory_space<vmem>>, vector<128x128xf32>
    %cst_15 = arith.constant dense<0.000000e+00> : vector<128x128xf32>
    %32 = tpu.matmul %29, %31, %cst_15 {dimension_numbers = #tpu.dot_dimension_numbers<[1], [0], [0], [1], [0, 0, 1, 1], [], []>} : vector<128x128xf32>, vector<128x128xf32>, vector<128x128xf32> -> vector<128x128xf32>
    %33 = arith.addf %30, %32 : vector<128x128xf32>
    %c0_16 = arith.constant 0 : index
    %c0_17 = arith.constant 0 : index
    %34 = vector.load %arg8[%c0_16, %c0_17] : memref<128x128xf32, #tpu.memory_space<vmem>>, vector<128x128xf32>
    tpu.vector_store %arg8[%c0_16, %c0_17], %33 {strides = array<i32>} : memref<128x128xf32, #tpu.memory_space<vmem>>, vector<128x128xf32>,
    %c0_i32_18 = arith.constant 0 : i32
    %35 = arith.cmpi eq, %arg2, %c0_i32_18 : i32
    %36 = arith.extui %35 : i1 to i32
    %c0_i32_19 = arith.constant 0 : i32
    %37 = arith.cmpi ne, %36, %c0_i32_19 : i32
    scf.if %37 {
      %c0_20 = arith.constant 0 : index
      %c0_21 = arith.constant 0 : index
      %38 = vector.load %arg8[%c0_20, %c0_21] : memref<128x128xf32, #tpu.memory_space<vmem>>, vector<128x128xf32>
      %c0_22 = arith.constant 0 : index
      %c0_23 = arith.constant 0 : index
      %39 = vector.load %arg7[%c0_22, %c0_23] : memref<128x128xf32, #tpu.memory_space<vmem>>, vector<128x128xf32>
      tpu.vector_store %arg7[%c0_22, %c0_23], %38 {strides = array<i32>} : memref<128x128xf32, #tpu.memory_space<vmem>>, vector<128x128xf32>,
    } else {
    }
    return
  }
  func.func @transform_0(%arg0: i32, %arg1: i32, %arg2: i32) -> (i32, i32) {
    %c0_i32 = arith.constant 0 : i32
    return %arg0, %arg2 : i32, i32
  }
  func.func @transform_1(%arg0: i32, %arg1: i32, %arg2: i32) -> (i32, i32) {
    %c0_i32 = arith.constant 0 : i32
    return %arg2, %arg1 : i32, i32
  }
  func.func @transform_2(%arg0: i32, %arg1: i32, %arg2: i32) -> (i32, i32) {
    %c0_i32 = arith.constant 0 : i32
    %c0_i32_0 = arith.constant 0 : i32
    return %c0_i32, %arg2 : i32, i32
  }
  func.func @transform_3(%arg0: i32, %arg1: i32, %arg2: i32) -> (i32, i32) {
    %c0_i32 = arith.constant 0 : i32
    %c0_i32_0 = arith.constant 0 : i32
    return %c0_i32, %arg2 : i32, i32
  }
  func.func @transform_4(%arg0: i32, %arg1: i32, %arg2: i32) -> (i32, i32) {
    %c0_i32 = arith.constant 0 : i32
    return %arg0, %arg1 : i32, i32
  }
}

module attributes {stable_mosaic.version = 11 : i64} {
  func.func @_linear_kernel(%arg0: i32, %arg1: i32, %arg2: i32, %arg3: memref<128x128xf32, #tpu.memory_space<vmem>>, %arg4: memref<128x128xf32, #tpu.memory_space<vmem>>, %arg5: memref<128x128xf32, #tpu.memory_space<vmem>>, %arg6: memref<128x128xf32, #tpu.memory_space<vmem>>) attributes {dimension_semantics = [#tpu.dimension_semantics<parallel>, #tpu.dimension_semantics<parallel>, #tpu.dimension_semantics<arbitrary>], iteration_bounds = array<i64: 1, 1, 1>, scalar_prefetch = 0 : i64, scratch_operands = 1 : i64, tpu.core_type = #tpu.core_type<tc>, window_params = [{transform_indices = @transform_0, window_bounds = array<i64: 128, 128>}, {transform_indices = @transform_1, window_bounds = array<i64: 128, 128>}, {transform_indices = @transform_2, window_bounds = array<i64: 128, 128>}]} {
    %c0_i32 = arith.constant 0 : i32
    %0 = arith.cmpi eq, %arg2, %c0_i32 : i32
    %1 = arith.extui %0 : i1 to i32
    %c0_i32_0 = arith.constant 0 : i32
    %2 = arith.cmpi ne, %1, %c0_i32_0 : i32
    scf.if %2 {
      %cst_10 = arith.constant 0.000000e+00 : f32
      %12 = vector.broadcast %cst_10 : f32 to vector<128x128xf32>
      %c0_11 = arith.constant 0 : index
      %c0_12 = arith.constant 0 : index
      %13 = vector.load %arg6[%c0_11, %c0_12] : memref<128x128xf32, #tpu.memory_space<vmem>>, vector<128x128xf32>
      tpu.vector_store %arg6[%c0_11, %c0_12], %12 {strides = array<i32>} : memref<128x128xf32, #tpu.memory_space<vmem>>, vector<128x128xf32>,
    } else {
    }
    %c0 = arith.constant 0 : index
    %c0_1 = arith.constant 0 : index
    %3 = vector.load %arg3[%c0, %c0_1] : memref<128x128xf32, #tpu.memory_space<vmem>>, vector<128x128xf32>
    %c0_2 = arith.constant 0 : index
    %c0_3 = arith.constant 0 : index
    %4 = vector.load %arg6[%c0_2, %c0_3] : memref<128x128xf32, #tpu.memory_space<vmem>>, vector<128x128xf32>
    %c0_4 = arith.constant 0 : index
    %c0_5 = arith.constant 0 : index
    %5 = vector.load %arg4[%c0_4, %c0_5] : memref<128x128xf32, #tpu.memory_space<vmem>>, vector<128x128xf32>
    %cst = arith.constant dense<0.000000e+00> : vector<128x128xf32>
    %6 = tpu.matmul %3, %5, %cst {dimension_numbers = #tpu.dot_dimension_numbers<[1], [0], [0], [1], [0, 0, 1, 1], [], []>} : vector<128x128xf32>, vector<128x128xf32>, vector<128x128xf32> -> vector<128x128xf32>
    %7 = arith.addf %4, %6 : vector<128x128xf32>
    %c0_6 = arith.constant 0 : index
    %c0_7 = arith.constant 0 : index
    %8 = vector.load %arg6[%c0_6, %c0_7] : memref<128x128xf32, #tpu.memory_space<vmem>>, vector<128x128xf32>
    tpu.vector_store %arg6[%c0_6, %c0_7], %7 {strides = array<i32>} : memref<128x128xf32, #tpu.memory_space<vmem>>, vector<128x128xf32>,
    %c0_i32_8 = arith.constant 0 : i32
    %9 = arith.cmpi eq, %arg2, %c0_i32_8 : i32
    %10 = arith.extui %9 : i1 to i32
    %c0_i32_9 = arith.constant 0 : i32
    %11 = arith.cmpi ne, %10, %c0_i32_9 : i32
    scf.if %11 {
      %c0_10 = arith.constant 0 : index
      %c0_11 = arith.constant 0 : index
      %12 = vector.load %arg6[%c0_10, %c0_11] : memref<128x128xf32, #tpu.memory_space<vmem>>, vector<128x128xf32>
      %c0_12 = arith.constant 0 : index
      %c0_13 = arith.constant 0 : index
      %13 = vector.load %arg5[%c0_12, %c0_13] : memref<128x128xf32, #tpu.memory_space<vmem>>, vector<128x128xf32>
      tpu.vector_store %arg5[%c0_12, %c0_13], %12 {strides = array<i32>} : memref<128x128xf32, #tpu.memory_space<vmem>>, vector<128x128xf32>,
    } else {
    }
    return
  }
  func.func @transform_0(%arg0: i32, %arg1: i32, %arg2: i32) -> (i32, i32) {
    %c0_i32 = arith.constant 0 : i32
    return %arg0, %arg2 : i32, i32
  }
  func.func @transform_1(%arg0: i32, %arg1: i32, %arg2: i32) -> (i32, i32) {
    %c0_i32 = arith.constant 0 : i32
    return %arg2, %arg1 : i32, i32
  }
  func.func @transform_2(%arg0: i32, %arg1: i32, %arg2: i32) -> (i32, i32) {
    %c0_i32 = arith.constant 0 : i32
    return %arg0, %arg1 : i32, i32
  }
}

module attributes {stable_mosaic.version = 11 : i64} {
  func.func @_attention_kernel(%arg0: i32, %arg1: memref<1x64x32xf32, #tpu.memory_space<vmem>>, %arg2: memref<1x64x64xf32, #tpu.memory_space<vmem>>, %arg3: memref<1x64x32xf32, #tpu.memory_space<vmem>>) attributes {dimension_semantics = [#tpu.dimension_semantics<parallel>], iteration_bounds = array<i64: 2>, scalar_prefetch = 0 : i64, scratch_operands = 0 : i64, tpu.core_type = #tpu.core_type<tc>, window_params = [{transform_indices = @transform_0, window_bounds = array<i64: 1, 64, 32>}, {transform_indices = @transform_1, window_bounds = array<i64: 1, 64, 64>}, {transform_indices = @transform_2, window_bounds = array<i64: 1, 64, 32>}]} {
    %c0 = arith.constant 0 : index
    %c0_0 = arith.constant 0 : index
    %c0_1 = arith.constant 0 : index
    %0 = vector.load %arg1[%c0, %c0_0, %c0_1] : memref<1x64x32xf32, #tpu.memory_space<vmem>>, vector<1x64x32xf32>
    %1 = vector.shape_cast %0 : vector<1x64x32xf32> to vector<64x32xf32>
    %cst = arith.constant 0.353553385 : f32
    %2 = vector.broadcast %cst : f32 to vector<64x32xf32>
    %3 = arith.mulf %1, %2 : vector<64x32xf32>
    %c0_2 = arith.constant 0 : index
    %c0_3 = arith.constant 0 : index
    %c0_4 = arith.constant 0 : index
    %4 = vector.load %arg2[%c0_2, %c0_3, %c0_4] : memref<1x64x64xf32, #tpu.memory_space<vmem>>, vector<1x64x64xf32>
    %5 = vector.shape_cast %4 : vector<1x64x64xf32> to vector<64x64xf32>
    %6 = vector.extract_strided_slice %5 {offsets = [0, 0], sizes = [64, 32], strides = [1, 1]} : vector<64x64xf32> to vector<64x32xf32>
    %7 = vector.extract_strided_slice %5 {offsets = [0, 32], sizes = [64, 32], strides = [1, 1]} : vector<64x64xf32> to vector<64x32xf32>
    %8 = tpu.iota {dimensions = array<i32: 0>} : vector<64x64xi32>
    %9 = tpu.iota {dimensions = array<i32: 1>} : vector<64x64xi32>
    %10 = arith.cmpi sgt, %9, %8 : vector<64x64xi32>
    %11 = vector.extract_strided_slice %3 {offsets = [0, 0], sizes = [64, 8], strides = [1, 1]} : vector<64x32xf32> to vector<64x8xf32>
    %12 = vector.extract_strided_slice %6 {offsets = [0, 0], sizes = [64, 8], strides = [1, 1]} : vector<64x32xf32> to vector<64x8xf32>
    %13 = vector.extract_strided_slice %7 {offsets = [0, 0], sizes = [64, 8], strides = [1, 1]} : vector<64x32xf32> to vector<64x8xf32>
    %cst_5 = arith.constant dense<0.000000e+00> : vector<64x64xf32>
    %14 = tpu.matmul %11, %12, %cst_5 {dimension_numbers = #tpu.dot_dimension_numbers<[1], [1], [0], [0], [0, 0, 1, 0], [], []>} : vector<64x8xf32>, vector<64x8xf32>, vector<64x64xf32> -> vector<64x64xf32>
    %cst_6 = arith.constant -1.000000e+09 : f32
    %15 = vector.broadcast %cst_6 : f32 to vector<64x64xf32>
    %16 = arith.select %10, %15, %14 : vector<64x64xi1>, vector<64x64xf32>
    %cst_7 = arith.constant dense<0xFF800000> : vector<64xf32>
    %17 = vector.multi_reduction <maximumf>, %16, %cst_7 [1] : vector<64x64xf32> to vector<64xf32>
    %18 = vector.shape_cast %17 : vector<64xf32> to vector<64x1xf32>
    %19 = vector.broadcast %18 : vector<64x1xf32> to vector<64x64xf32>
    %20 = arith.subf %16, %19 : vector<64x64xf32>
    %21 = math.exp %20 : vector<64x64xf32>
    %cst_8 = arith.constant dense<0.000000e+00> : vector<64xf32>
    %22 = vector.multi_reduction <add>, %21, %cst_8 [1] : vector<64x64xf32> to vector<64xf32>
    %23 = vector.shape_cast %22 : vector<64xf32> to vector<64x1xf32>
    %24 = tpu.reciprocal %23 {approx = true} : vector<64x1xf32> -> vector<64x1xf32>
    %25 = arith.mulf %23, %24 : vector<64x1xf32>
    %cst_9 = arith.constant 2.000000e+00 : f32
    %26 = vector.broadcast %cst_9 : f32 to vector<64x1xf32>
    %27 = arith.subf %26, %25 : vector<64x1xf32>
    %28 = arith.mulf %24, %27 : vector<64x1xf32>
    %29 = vector.broadcast %28 : vector<64x1xf32> to vector<64x64xf32>
    %30 = arith.mulf %21, %29 : vector<64x64xf32>
    %cst_10 = arith.constant dense<0.000000e+00> : vector<64x8xf32>
    %31 = tpu.matmul %30, %13, %cst_10 {dimension_numbers = #tpu.dot_dimension_numbers<[1], [0], [0], [1], [0, 0, 1, 1], [], []>} : vector<64x64xf32>, vector<64x8xf32>, vector<64x8xf32> -> vector<64x8xf32>
    %32 = vector.extract_strided_slice %3 {offsets = [0, 8], sizes = [64, 8], strides = [1, 1]} : vector<64x32xf32> to vector<64x8xf32>
    %33 = vector.extract_strided_slice %6 {offsets = [0, 8], sizes = [64, 8], strides = [1, 1]} : vector<64x32xf32> to vector<64x8xf32>
    %34 = vector.extract_strided_slice %7 {offsets = [0, 8], sizes = [64, 8], strides = [1, 1]} : vector<64x32xf32> to vector<64x8xf32>
    %cst_11 = arith.constant dense<0.000000e+00> : vector<64x64xf32>
    %35 = tpu.matmul %32, %33, %cst_11 {dimension_numbers = #tpu.dot_dimension_numbers<[1], [1], [0], [0], [0, 0, 1, 0], [], []>} : vector<64x8xf32>, vector<64x8xf32>, vector<64x64xf32> -> vector<64x64xf32>
    %cst_12 = arith.constant -1.000000e+09 : f32
    %36 = vector.broadcast %cst_12 : f32 to vector<64x64xf32>
    %37 = arith.select %10, %36, %35 : vector<64x64xi1>, vector<64x64xf32>
    %cst_13 = arith.constant dense<0xFF800000> : vector<64xf32>
    %38 = vector.multi_reduction <maximumf>, %37, %cst_13 [1] : vector<64x64xf32> to vector<64xf32>
    %39 = vector.shape_cast %38 : vector<64xf32> to vector<64x1xf32>
    %40 = vector.broadcast %39 : vector<64x1xf32> to vector<64x64xf32>
    %41 = arith.subf %37, %40 : vector<64x64xf32>
    %42 = math.exp %41 : vector<64x64xf32>
    %cst_14 = arith.constant dense<0.000000e+00> : vector<64xf32>
    %43 = vector.multi_reduction <add>, %42, %cst_14 [1] : vector<64x64xf32> to vector<64xf32>
    %44 = vector.shape_cast %43 : vector<64xf32> to vector<64x1xf32>
    %45 = tpu.reciprocal %44 {approx = true} : vector<64x1xf32> -> vector<64x1xf32>
    %46 = arith.mulf %44, %45 : vector<64x1xf32>
    %cst_15 = arith.constant 2.000000e+00 : f32
    %47 = vector.broadcast %cst_15 : f32 to vector<64x1xf32>
    %48 = arith.subf %47, %46 : vector<64x1xf32>
    %49 = arith.mulf %45, %48 : vector<64x1xf32>
    %50 = vector.broadcast %49 : vector<64x1xf32> to vector<64x64xf32>
    %51 = arith.mulf %42, %50 : vector<64x64xf32>
    %cst_16 = arith.constant dense<0.000000e+00> : vector<64x8xf32>
    %52 = tpu.matmul %51, %34, %cst_16 {dimension_numbers = #tpu.dot_dimension_numbers<[1], [0], [0], [1], [0, 0, 1, 1], [], []>} : vector<64x64xf32>, vector<64x8xf32>, vector<64x8xf32> -> vector<64x8xf32>
    %53 = vector.extract_strided_slice %3 {offsets = [0, 16], sizes = [64, 8], strides = [1, 1]} : vector<64x32xf32> to vector<64x8xf32>
    %54 = vector.extract_strided_slice %6 {offsets = [0, 16], sizes = [64, 8], strides = [1, 1]} : vector<64x32xf32> to vector<64x8xf32>
    %55 = vector.extract_strided_slice %7 {offsets = [0, 16], sizes = [64, 8], strides = [1, 1]} : vector<64x32xf32> to vector<64x8xf32>
    %cst_17 = arith.constant dense<0.000000e+00> : vector<64x64xf32>
    %56 = tpu.matmul %53, %54, %cst_17 {dimension_numbers = #tpu.dot_dimension_numbers<[1], [1], [0], [0], [0, 0, 1, 0], [], []>} : vector<64x8xf32>, vector<64x8xf32>, vector<64x64xf32> -> vector<64x64xf32>
    %cst_18 = arith.constant -1.000000e+09 : f32
    %57 = vector.broadcast %cst_18 : f32 to vector<64x64xf32>
    %58 = arith.select %10, %57, %56 : vector<64x64xi1>, vector<64x64xf32>
    %cst_19 = arith.constant dense<0xFF800000> : vector<64xf32>
    %59 = vector.multi_reduction <maximumf>, %58, %cst_19 [1] : vector<64x64xf32> to vector<64xf32>
    %60 = vector.shape_cast %59 : vector<64xf32> to vector<64x1xf32>
    %61 = vector.broadcast %60 : vector<64x1xf32> to vector<64x64xf32>
    %62 = arith.subf %58, %61 : vector<64x64xf32>
    %63 = math.exp %62 : vector<64x64xf32>
    %cst_20 = arith.constant dense<0.000000e+00> : vector<64xf32>
    %64 = vector.multi_reduction <add>, %63, %cst_20 [1] : vector<64x64xf32> to vector<64xf32>
    %65 = vector.shape_cast %64 : vector<64xf32> to vector<64x1xf32>
    %66 = tpu.reciprocal %65 {approx = true} : vector<64x1xf32> -> vector<64x1xf32>
    %67 = arith.mulf %65, %66 : vector<64x1xf32>
    %cst_21 = arith.constant 2.000000e+00 : f32
    %68 = vector.broadcast %cst_21 : f32 to vector<64x1xf32>
    %69 = arith.subf %68, %67 : vector<64x1xf32>
    %70 = arith.mulf %66, %69 : vector<64x1xf32>
    %71 = vector.broadcast %70 : vector<64x1xf32> to vector<64x64xf32>
    %72 = arith.mulf %63, %71 : vector<64x64xf32>
    %cst_22 = arith.constant dense<0.000000e+00> : vector<64x8xf32>
    %73 = tpu.matmul %72, %55, %cst_22 {dimension_numbers = #tpu.dot_dimension_numbers<[1], [0], [0], [1], [0, 0, 1, 1], [], []>} : vector<64x64xf32>, vector<64x8xf32>, vector<64x8xf32> -> vector<64x8xf32>
    %74 = vector.extract_strided_slice %3 {offsets = [0, 24], sizes = [64, 8], strides = [1, 1]} : vector<64x32xf32> to vector<64x8xf32>
    %75 = vector.extract_strided_slice %6 {offsets = [0, 24], sizes = [64, 8], strides = [1, 1]} : vector<64x32xf32> to vector<64x8xf32>
    %76 = vector.extract_strided_slice %7 {offsets = [0, 24], sizes = [64, 8], strides = [1, 1]} : vector<64x32xf32> to vector<64x8xf32>
    %cst_23 = arith.constant dense<0.000000e+00> : vector<64x64xf32>
    %77 = tpu.matmul %74, %75, %cst_23 {dimension_numbers = #tpu.dot_dimension_numbers<[1], [1], [0], [0], [0, 0, 1, 0], [], []>} : vector<64x8xf32>, vector<64x8xf32>, vector<64x64xf32> -> vector<64x64xf32>
    %cst_24 = arith.constant -1.000000e+09 : f32
    %78 = vector.broadcast %cst_24 : f32 to vector<64x64xf32>
    %79 = arith.select %10, %78, %77 : vector<64x64xi1>, vector<64x64xf32>
    %cst_25 = arith.constant dense<0xFF800000> : vector<64xf32>
    %80 = vector.multi_reduction <maximumf>, %79, %cst_25 [1] : vector<64x64xf32> to vector<64xf32>
    %81 = vector.shape_cast %80 : vector<64xf32> to vector<64x1xf32>
    %82 = vector.broadcast %81 : vector<64x1xf32> to vector<64x64xf32>
    %83 = arith.subf %79, %82 : vector<64x64xf32>
    %84 = math.exp %83 : vector<64x64xf32>
    %cst_26 = arith.constant dense<0.000000e+00> : vector<64xf32>
    %85 = vector.multi_reduction <add>, %84, %cst_26 [1] : vector<64x64xf32> to vector<64xf32>
    %86 = vector.shape_cast %85 : vector<64xf32> to vector<64x1xf32>
    %87 = tpu.reciprocal %86 {approx = true} : vector<64x1xf32> -> vector<64x1xf32>
    %88 = arith.mulf %86, %87 : vector<64x1xf32>
    %cst_27 = arith.constant 2.000000e+00 : f32
    %89 = vector.broadcast %cst_27 : f32 to vector<64x1xf32>
    %90 = arith.subf %89, %88 : vector<64x1xf32>
    %91 = arith.mulf %87, %90 : vector<64x1xf32>
    %92 = vector.broadcast %91 : vector<64x1xf32> to vector<64x64xf32>
    %93 = arith.mulf %84, %92 : vector<64x64xf32>
    %cst_28 = arith.constant dense<0.000000e+00> : vector<64x8xf32>
    %94 = tpu.matmul %93, %76, %cst_28 {dimension_numbers = #tpu.dot_dimension_numbers<[1], [0], [0], [1], [0, 0, 1, 1], [], []>} : vector<64x64xf32>, vector<64x8xf32>, vector<64x8xf32> -> vector<64x8xf32>
    %95 = tpu.concatenate %31, %52, %73, %94 in 1 : vector<64x8xf32>, vector<64x8xf32>, vector<64x8xf32>, vector<64x8xf32> -> vector<64x32xf32>
    %c0_29 = arith.constant 0 : index
    %c0_30 = arith.constant 0 : index
    %c0_31 = arith.constant 0 : index
    %96 = vector.load %arg3[%c0_29, %c0_30, %c0_31] : memref<1x64x32xf32, #tpu.memory_space<vmem>>, vector<1x64x32xf32>
    %97 = vector.shape_cast %96 : vector<1x64x32xf32> to vector<64x32xf32>
    %98 = vector.shape_cast %95 : vector<64x32xf32> to vector<1x64x32xf32>
    tpu.vector_store %arg3[%c0_29, %c0_30, %c0_31], %98 {strides = array<i32>} : memref<1x64x32xf32, #tpu.memory_space<vmem>>, vector<1x64x32xf32>,
    return
  }
  func.func @transform_0(%arg0: i32) -> (i32, i32, i32) {
    %c0_i32 = arith.constant 0 : i32
    %c0_i32_0 = arith.constant 0 : i32
    %c0_i32_1 = arith.constant 0 : i32
    return %arg0, %c0_i32, %c0_i32_0 : i32, i32, i32
  }
  func.func @transform_1(%arg0: i32) -> (i32, i32, i32) {
    %c0_i32 = arith.constant 0 : i32
    %c0_i32_0 = arith.constant 0 : i32
    %c0_i32_1 = arith.constant 0 : i32
    return %arg0, %c0_i32, %c0_i32_0 : i32, i32, i32
  }
  func.func @transform_2(%arg0: i32) -> (i32, i32, i32) {
    %c0_i32 = arith.constant 0 : i32
    %c0_i32_0 = arith.constant 0 : i32
    %c0_i32_1 = arith.constant 0 : i32
    return %arg0, %c0_i32, %c0_i32_0 : i32, i32, i32
  }
}

module attributes {stable_mosaic.version = 11 : i64} {
  func.func @_linear_kernel(%arg0: i32, %arg1: i32, %arg2: i32, %arg3: memref<128x128xf32, #tpu.memory_space<vmem>>, %arg4: memref<128x128xf32, #tpu.memory_space<vmem>>, %arg5: memref<1x128xf32, #tpu.memory_space<vmem>>, %arg6: memref<128x128xf32, #tpu.memory_space<vmem>>, %arg7: memref<128x128xf32, #tpu.memory_space<vmem>>, %arg8: memref<128x128xf32, #tpu.memory_space<vmem>>) attributes {dimension_semantics = [#tpu.dimension_semantics<parallel>, #tpu.dimension_semantics<parallel>, #tpu.dimension_semantics<arbitrary>], iteration_bounds = array<i64: 1, 1, 1>, scalar_prefetch = 0 : i64, scratch_operands = 1 : i64, tpu.core_type = #tpu.core_type<tc>, window_params = [{transform_indices = @transform_0, window_bounds = array<i64: 128, 128>}, {transform_indices = @transform_1, window_bounds = array<i64: 128, 128>}, {transform_indices = @transform_2, window_bounds = array<i64: 1, 128>}, {transform_indices = @transform_3, window_bounds = array<i64: 128, 128>}, {transform_indices = @transform_4, window_bounds = array<i64: 128, 128>}]} {
    %c0_i32 = arith.constant 0 : i32
    %0 = arith.cmpi eq, %arg2, %c0_i32 : i32
    %1 = arith.extui %0 : i1 to i32
    %c0_i32_0 = arith.constant 0 : i32
    %2 = arith.cmpi ne, %1, %c0_i32_0 : i32
    scf.if %2 {
      %cst_10 = arith.constant 0.000000e+00 : f32
      %12 = vector.broadcast %cst_10 : f32 to vector<128x128xf32>
      %c0_11 = arith.constant 0 : index
      %c0_12 = arith.constant 0 : index
      %13 = vector.load %arg8[%c0_11, %c0_12] : memref<128x128xf32, #tpu.memory_space<vmem>>, vector<128x128xf32>
      tpu.vector_store %arg8[%c0_11, %c0_12], %12 {strides = array<i32>} : memref<128x128xf32, #tpu.memory_space<vmem>>, vector<128x128xf32>,
    } else {
    }
    %c0 = arith.constant 0 : index
    %c0_1 = arith.constant 0 : index
    %3 = vector.load %arg3[%c0, %c0_1] : memref<128x128xf32, #tpu.memory_space<vmem>>, vector<128x128xf32>
    %c0_2 = arith.constant 0 : index
    %c0_3 = arith.constant 0 : index
    %4 = vector.load %arg8[%c0_2, %c0_3] : memref<128x128xf32, #tpu.memory_space<vmem>>, vector<128x128xf32>
    %c0_4 = arith.constant 0 : index
    %c0_5 = arith.constant 0 : index
    %5 = vector.load %arg4[%c0_4, %c0_5] : memref<128x128xf32, #tpu.memory_space<vmem>>, vector<128x128xf32>
    %cst = arith.constant dense<0.000000e+00> : vector<128x128xf32>
    %6 = tpu.matmul %3, %5, %cst {dimension_numbers = #tpu.dot_dimension_numbers<[1], [0], [0], [1], [0, 0, 1, 1], [], []>} : vector<128x128xf32>, vector<128x128xf32>, vector<128x128xf32> -> vector<128x128xf32>
    %7 = arith.addf %4, %6 : vector<128x128xf32>
    %c0_6 = arith.constant 0 : index
    %c0_7 = arith.constant 0 : index
    %8 = vector.load %arg8[%c0_6, %c0_7] : memref<128x128xf32, #tpu.memory_space<vmem>>, vector<128x128xf32>
    tpu.vector_store %arg8[%c0_6, %c0_7], %7 {strides = array<i32>} : memref<128x128xf32, #tpu.memory_space<vmem>>, vector<128x128xf32>,
    %c0_i32_8 = arith.constant 0 : i32
    %9 = arith.cmpi eq, %arg2, %c0_i32_8 : i32
    %10 = arith.extui %9 : i1 to i32
    %c0_i32_9 = arith.constant 0 : i32
    %11 = arith.cmpi ne, %10, %c0_i32_9 : i32
    scf.if %11 {
      %c0_10 = arith.constant 0 : index
      %c0_11 = arith.constant 0 : index
      %12 = vector.load %arg8[%c0_10, %c0_11] : memref<128x128xf32, #tpu.memory_space<vmem>>, vector<128x128xf32>
      %c0_12 = arith.constant 0 : index
      %c0_13 = arith.constant 0 : index
      %13 = vector.load %arg5[%c0_12, %c0_13] : memref<1x128xf32, #tpu.memory_space<vmem>>, vector<1x128xf32>
      %14 = vector.broadcast %13 : vector<1x128xf32> to vector<128x128xf32>
      %15 = arith.addf %12, %14 : vector<128x128xf32>
      %c0_14 = arith.constant 0 : index
      %c0_15 = arith.constant 0 : index
      %16 = vector.load %arg6[%c0_14, %c0_15] : memref<128x128xf32, #tpu.memory_space<vmem>>, vector<128x128xf32>
      %17 = arith.addf %15, %16 : vector<128x128xf32>
      %c0_16 = arith.constant 0 : index
      %c0_17 = arith.constant 0 : index
      %18 = vector.load %arg7[%c0_16, %c0_17] : memref<128x128xf32, #tpu.memory_space<vmem>>, vector<128x128xf32>
      tpu.vector_store %arg7[%c0_16, %c0_17], %17 {strides = array<i32>} : memref<128x128xf32, #tpu.memory_space<vmem>>, vector<128x128xf32>,
    } else {
    }
    return
  }
  func.func @transform_0(%arg0: i32, %arg1: i32, %arg2: i32) -> (i32, i32) {
    %c0_i32 = arith.constant 0 : i32
    return %arg0, %arg2 : i32, i32
  }
  func.func @transform_1(%arg0: i32, %arg1: i32, %arg2: i32) -> (i32, i32) {
    %c0_i32 = arith.constant 0 : i32
    return %arg2, %arg1 : i32, i32
  }
  func.func @transform_2(%arg0: i32, %arg1: i32, %arg2: i32) -> (i32, i32) {
    %c0_i32 = arith.constant 0 : i32
    %c0_i32_0 = arith.constant 0 : i32
    return %c0_i32, %arg1 : i32, i32
  }
  func.func @transform_3(%arg0: i32, %arg1: i32, %arg2: i32) -> (i32, i32) {
    %c0_i32 = arith.constant 0 : i32
    return %arg0, %arg1 : i32, i32
  }
  func.func @transform_4(%arg0: i32, %arg1: i32, %arg2: i32) -> (i32, i32) {
    %c0_i32 = arith.constant 0 : i32
    return %arg0, %arg1 : i32, i32
  }
}

module attributes {stable_mosaic.version = 11 : i64} {
  func.func @_linear_kernel(%arg0: i32, %arg1: i32, %arg2: i32, %arg3: memref<128x128xf32, #tpu.memory_space<vmem>>, %arg4: memref<128x128xf32, #tpu.memory_space<vmem>>, %arg5: memref<1x128xf32, #tpu.memory_space<vmem>>, %arg6: memref<1x128xf32, #tpu.memory_space<vmem>>, %arg7: memref<1x128xf32, #tpu.memory_space<vmem>>, %arg8: memref<128x128xf32, #tpu.memory_space<vmem>>, %arg9: memref<128x128xf32, #tpu.memory_space<vmem>>) attributes {dimension_semantics = [#tpu.dimension_semantics<parallel>, #tpu.dimension_semantics<parallel>, #tpu.dimension_semantics<arbitrary>], iteration_bounds = array<i64: 1, 1, 1>, scalar_prefetch = 0 : i64, scratch_operands = 1 : i64, tpu.core_type = #tpu.core_type<tc>, window_params = [{transform_indices = @transform_0, window_bounds = array<i64: 128, 128>}, {transform_indices = @transform_1, window_bounds = array<i64: 128, 128>}, {transform_indices = @transform_2, window_bounds = array<i64: 1, 128>}, {transform_indices = @transform_3, window_bounds = array<i64: 1, 128>}, {transform_indices = @transform_4, window_bounds = array<i64: 1, 128>}, {transform_indices = @transform_5, window_bounds = array<i64: 128, 128>}]} {
    %c0_i32 = arith.constant 0 : i32
    %0 = arith.cmpi eq, %arg2, %c0_i32 : i32
    %1 = arith.extui %0 : i1 to i32
    %c0_i32_0 = arith.constant 0 : i32
    %2 = arith.cmpi ne, %1, %c0_i32_0 : i32
    scf.if %2 {
      %cst_20 = arith.constant 0.000000e+00 : f32
      %38 = vector.broadcast %cst_20 : f32 to vector<128x128xf32>
      %c0_21 = arith.constant 0 : index
      %c0_22 = arith.constant 0 : index
      %39 = vector.load %arg9[%c0_21, %c0_22] : memref<128x128xf32, #tpu.memory_space<vmem>>, vector<128x128xf32>
      tpu.vector_store %arg9[%c0_21, %c0_22], %38 {strides = array<i32>} : memref<128x128xf32, #tpu.memory_space<vmem>>, vector<128x128xf32>,
    } else {
    }
    %c0 = arith.constant 0 : index
    %c0_1 = arith.constant 0 : index
    %3 = vector.load %arg3[%c0, %c0_1] : memref<128x128xf32, #tpu.memory_space<vmem>>, vector<128x128xf32>
    %cst = arith.constant dense<0.000000e+00> : vector<128xf32>
    %4 = vector.multi_reduction <add>, %3, %cst [1] : vector<128x128xf32> to vector<128xf32>
    %5 = vector.shape_cast %4 : vector<128xf32> to vector<128x1xf32>
    %cst_2 = arith.constant 3.125000e-02 : f32
    %6 = vector.broadcast %cst_2 : f32 to vector<128x1xf32>
    %7 = arith.mulf %5, %6 : vector<128x1xf32>
    %8 = arith.mulf %3, %3 : vector<128x128xf32>
    %cst_3 = arith.constant dense<0.000000e+00> : vector<128xf32>
    %9 = vector.multi_reduction <add>, %8, %cst_3 [1] : vector<128x128xf32> to vector<128xf32>
    %10 = vector.shape_cast %9 : vector<128xf32> to vector<128x1xf32>
    %cst_4 = arith.constant 3.125000e-02 : f32
    %11 = vector.broadcast %cst_4 : f32 to vector<128x1xf32>
    %12 = arith.mulf %10, %11 : vector<128x1xf32>
    %13 = arith.mulf %7, %7 : vector<128x1xf32>
    %14 = arith.subf %12, %13 : vector<128x1xf32>
    %cst_5 = arith.constant 0.000000e+00 : f32
    %15 = vector.broadcast %cst_5 : f32 to vector<128x1xf32>
    %16 = arith.maximumf %14, %15 : vector<128x1xf32>
    %cst_6 = arith.constant 9.99999974E-6 : f32
    %17 = vector.broadcast %cst_6 : f32 to vector<128x1xf32>
    %18 = arith.addf %16, %17 : vector<128x1xf32>
    %19 = math.rsqrt %18 : vector<128x1xf32>
    %20 = vector.broadcast %7 : vector<128x1xf32> to vector<128x128xf32>
    %21 = arith.subf %3, %20 : vector<128x128xf32>
    %22 = vector.broadcast %19 : vector<128x1xf32> to vector<128x128xf32>
    %23 = arith.mulf %21, %22 : vector<128x128xf32>
    %c0_7 = arith.constant 0 : index
    %c0_8 = arith.constant 0 : index
    %24 = vector.load %arg6[%c0_7, %c0_8] : memref<1x128xf32, #tpu.memory_space<vmem>>, vector<1x128xf32>
    %25 = vector.broadcast %24 : vector<1x128xf32> to vector<128x128xf32>
    %26 = arith.mulf %23, %25 : vector<128x128xf32>
    %c0_9 = arith.constant 0 : index
    %c0_10 = arith.constant 0 : index
    %27 = vector.load %arg7[%c0_9, %c0_10] : memref<1x128xf32, #tpu.memory_space<vmem>>, vector<1x128xf32>
    %28 = vector.broadcast %27 : vector<1x128xf32> to vector<128x128xf32>
    %29 = arith.addf %26, %28 : vector<128x128xf32>
    %c0_11 = arith.constant 0 : index
    %c0_12 = arith.constant 0 : index
    %30 = vector.load %arg9[%c0_11, %c0_12] : memref<128x128xf32, #tpu.memory_space<vmem>>, vector<128x128xf32>
    %c0_13 = arith.constant 0 : index
    %c0_14 = arith.constant 0 : index
    %31 = vector.load %arg4[%c0_13, %c0_14] : memref<128x128xf32, #tpu.memory_space<vmem>>, vector<128x128xf32>
    %cst_15 = arith.constant dense<0.000000e+00> : vector<128x128xf32>
    %32 = tpu.matmul %29, %31, %cst_15 {dimension_numbers = #tpu.dot_dimension_numbers<[1], [0], [0], [1], [0, 0, 1, 1], [], []>} : vector<128x128xf32>, vector<128x128xf32>, vector<128x128xf32> -> vector<128x128xf32>
    %33 = arith.addf %30, %32 : vector<128x128xf32>
    %c0_16 = arith.constant 0 : index
    %c0_17 = arith.constant 0 : index
    %34 = vector.load %arg9[%c0_16, %c0_17] : memref<128x128xf32, #tpu.memory_space<vmem>>, vector<128x128xf32>
    tpu.vector_store %arg9[%c0_16, %c0_17], %33 {strides = array<i32>} : memref<128x128xf32, #tpu.memory_space<vmem>>, vector<128x128xf32>,
    %c0_i32_18 = arith.constant 0 : i32
    %35 = arith.cmpi eq, %arg2, %c0_i32_18 : i32
    %36 = arith.extui %35 : i1 to i32
    %c0_i32_19 = arith.constant 0 : i32
    %37 = arith.cmpi ne, %36, %c0_i32_19 : i32
    scf.if %37 {
      %c0_20 = arith.constant 0 : index
      %c0_21 = arith.constant 0 : index
      %38 = vector.load %arg9[%c0_20, %c0_21] : memref<128x128xf32, #tpu.memory_space<vmem>>, vector<128x128xf32>
      %c0_22 = arith.constant 0 : index
      %c0_23 = arith.constant 0 : index
      %39 = vector.load %arg5[%c0_22, %c0_23] : memref<1x128xf32, #tpu.memory_space<vmem>>, vector<1x128xf32>
      %40 = vector.broadcast %39 : vector<1x128xf32> to vector<128x128xf32>
      %41 = arith.addf %38, %40 : vector<128x128xf32>
      %cst_24 = arith.constant 0.707106769 : f32
      %42 = vector.broadcast %cst_24 : f32 to vector<128x128xf32>
      %43 = arith.mulf %41, %42 : vector<128x128xf32>
      %44 = math.absf %43 : vector<128x128xf32>
      %cst_25 = arith.constant 0.327591091 : f32
      %45 = vector.broadcast %cst_25 : f32 to vector<128x128xf32>
      %46 = arith.mulf %45, %44 : vector<128x128xf32>
      %cst_26 = arith.constant 1.000000e+00 : f32
      %47 = vector.broadcast %cst_26 : f32 to vector<128x128xf32>
      %48 = arith.addf %47, %46 : vector<128x128xf32>
      %cst_27 = arith.constant 1.000000e+00 : f32
      %49 = vector.broadcast %cst_27 : f32 to vector<128x128xf32>
      %50 = arith.divf %49, %48 : vector<128x128xf32>
      %cst_28 = arith.constant 1.06140542 : f32
      %51 = vector.broadcast %cst_28 : f32 to vector<128x128xf32>
      %52 = arith.mulf %50, %51 : vector<128x128xf32>
      %cst_29 = arith.constant -1.45315206 : f32
      %53 = vector.broadcast %cst_29 : f32 to vector<128x128xf32>
      %54 = arith.addf %53, %52 : vector<128x128xf32>
      %55 = arith.mulf %50, %54 : vector<128x128xf32>
      %cst_30 = arith.constant 1.42141378 : f32
      %56 = vector.broadcast %cst_30 : f32 to vector<128x128xf32>
      %57 = arith.addf %56, %55 : vector<128x128xf32>
      %58 = arith.mulf %50, %57 : vector<128x128xf32>
      %cst_31 = arith.constant -0.284496725 : f32
      %59 = vector.broadcast %cst_31 : f32 to vector<128x128xf32>
      %60 = arith.addf %59, %58 : vector<128x128xf32>
      %61 = arith.mulf %50, %60 : vector<128x128xf32>
      %cst_32 = arith.constant 0.254829586 : f32
      %62 = vector.broadcast %cst_32 : f32 to vector<128x128xf32>
      %63 = arith.addf %62, %61 : vector<128x128xf32>
      %64 = arith.mulf %50, %63 : vector<128x128xf32>
      %cst_33 = arith.constant 0.000000e+00 : f32
      %65 = vector.broadcast %cst_33 : f32 to vector<128x128xf32>
      %66 = arith.subf %65, %44 : vector<128x128xf32>
      %67 = arith.mulf %66, %44 : vector<128x128xf32>
      %68 = math.exp %67 : vector<128x128xf32>
      %69 = arith.mulf %64, %68 : vector<128x128xf32>
      %cst_34 = arith.constant 1.000000e+00 : f32
      %70 = vector.broadcast %cst_34 : f32 to vector<128x128xf32>
      %71 = arith.subf %70, %69 : vector<128x128xf32>
      %cst_35 = arith.constant 0.000000e+00 : f32
      %72 = vector.broadcast %cst_35 : f32 to vector<128x128xf32>
      %73 = arith.cmpf oge, %43, %72 : vector<128x128xf32>
      %cst_36 = arith.constant 0.000000e+00 : f32
      %74 = vector.broadcast %cst_36 : f32 to vector<128x128xf32>
      %75 = arith.subf %74, %71 : vector<128x128xf32>
      %76 = arith.select %73, %71, %75 : vector<128x128xi1>, vector<128x128xf32>
      %cst_37 = arith.constant 5.000000e-01 : f32
      %77 = vector.broadcast %cst_37 : f32 to vector<128x128xf32>
      %78 = arith.mulf %77, %41 : vector<128x128xf32>
      %cst_38 = arith.constant 1.000000e+00 : f32
      %79 = vector.broadcast %cst_38 : f32 to vector<128x128xf32>
      %80 = arith.addf %79, %76 : vector<128x128xf32>
      %81 = arith.mulf %78, %80 : vector<128x128xf32>
      %c0_39 = arith.constant 0 : index
      %c0_40 = arith.constant 0 : index
      %82 = vector.load %arg8[%c0_39, %c0_40] : memref<128x128xf32, #tpu.memory_space<vmem>>, vector<128x128xf32>
      tpu.vector_store %arg8[%c0_39, %c0_40], %81 {strides = array<i32>} : memref<128x128xf32, #tpu.memory_space<vmem>>, vector<128x128xf32>,
    } else {
    }
    return
  }
  func.func @transform_0(%arg0: i32, %arg1: i32, %arg2: i32) -> (i32, i32) {
    %c0_i32 = arith.constant 0 : i32
    return %arg0, %arg2 : i32, i32
  }
  func.func @transform_1(%arg0: i32, %arg1: i32, %arg2: i32) -> (i32, i32) {
    %c0_i32 = arith.constant 0 : i32
    return %arg2, %arg1 : i32, i32
  }
  func.func @transform_2(%arg0: i32, %arg1: i32, %arg2: i32) -> (i32, i32) {
    %c0_i32 = arith.constant 0 : i32
    %c0_i32_0 = arith.constant 0 : i32
    return %c0_i32, %arg1 : i32, i32
  }
  func.func @transform_3(%arg0: i32, %arg1: i32, %arg2: i32) -> (i32, i32) {
    %c0_i32 = arith.constant 0 : i32
    %c0_i32_0 = arith.constant 0 : i32
    return %c0_i32, %arg2 : i32, i32
  }
  func.func @transform_4(%arg0: i32, %arg1: i32, %arg2: i32) -> (i32, i32) {
    %c0_i32 = arith.constant 0 : i32
    %c0_i32_0 = arith.constant 0 : i32
    return %c0_i32, %arg2 : i32, i32
  }
  func.func @transform_5(%arg0: i32, %arg1: i32, %arg2: i32) -> (i32, i32) {
    %c0_i32 = arith.constant 0 : i32
    return %arg0, %arg1 : i32, i32
  }
}

</mosaic_0001>

<bundles_post_ra>
// kernel: _forward.6
= control target key start
LH: loop header
LB: loop body
LE: loop exit
PB: predicated region body
PF: predicated region fallthrough
CT: control target
= control target key end

     0   :  { %s574_s1 = inlined_call_operand.vmem [shape: f32[128,128], index: 1, kind: input, shape index: {}]   ;;  %s575_s0 = inlined_call_operand.vmem [shape: f32[128,128], index: 0, kind: input, shape index: {}]   ;;  %s576_s2 = inlined_call_operand.vmem [shape: f32[128,128], index: 2, kind: output, shape index: {}]  }
   0x1   :  { %v78_v0 = vld [vmem:[%s574_s1 + $0x78] sm:$0xff]  ;;  %v77_v1 = vld [vmem:[%s574_s1 + $0x70] sm:$0xff]  ;;  %v76_v2 = vld [vmem:[%s574_s1 + $0x68] sm:$0xff] }
   0x2   :  { %327 = vmatprep.subr.mxu0 %v78_v0  ;;  %383 = vmatprep.subr.mxu1 %v78_v0  ;;  %v75_v3 = vld [vmem:[%s574_s1 + $0x60] sm:$0xff]  ;;  %v74_v4 = vld [vmem:[%s574_s1 + $0x58] sm:$0xff]  ;;  %v73_v5 = vld [vmem:[%s574_s1 + $0x50] sm:$0xff] }
   0x3   :  { %328 = vmatpush3.msra.mxu0 %v78_v0  ;;  %399 = vmatpush3.msra.mxu1 %v78_v0  ;;  %v72_v6 = vld [vmem:[%s574_s1 + $0x48] sm:$0xff]  ;;  %v71_v7 = vld [vmem:[%s574_s1 + $0x40] sm:$0xff]  ;;  %v70_v8 = vld [vmem:[%s574_s1 + $0x38] sm:$0xff] }
   0x4   :  { %329 = vmatprep.subr.mxu0 %v77_v1  ;;  %384 = vmatprep.subr.mxu1 %v77_v1  ;;  %v69_v9 = vld [vmem:[%s574_s1 + $0x30] sm:$0xff]  ;;  %v68_v10 = vld [vmem:[%s574_s1 + $0x28] sm:$0xff]  ;;  %v67_v11 = vld [vmem:[%s574_s1 + $0x20] sm:$0xff] }
   0x5   :  { %330 = vmatpush3.msra.mxu0 %v77_v1  ;;  %400 = vmatpush3.msra.mxu1 %v77_v1  ;;  %v66_v12 = vld [vmem:[%s574_s1 + $0x18] sm:$0xff]  ;;  %v65_v13 = vld [vmem:[%s574_s1 + $0x10] sm:$0xff]  ;;  %v64_v14 = vld [vmem:[%s574_s1 + $0x8] sm:$0xff] }
   0x6   :  { %331 = vmatprep.subr.mxu0 %v76_v2  ;;  %385 = vmatprep.subr.mxu1 %v76_v2  ;;  %v63_v15 = vld [vmem:[%s574_s1] sm:$0xff]  ;;  %v32_v18 = vld [vmem:[%s575_s0 + $0x8] sm:$0xff]  ;;  %v33_v20 = vld [vmem:[%s575_s0 + $0x10] sm:$0xff] }
   0x7   :  { %332 = vmatpush3.msra.mxu0 %v76_v2  ;;  %401 = vmatpush3.msra.mxu1 %v76_v2  ;;  %v31_v16 = vld [vmem:[%s575_s0] sm:$0xff]  ;;  %v40_v19 = vld [vmem:[%s575_s0 + $0x48] sm:$0xff]  ;;  %v41_v21 = vld [vmem:[%s575_s0 + $0x50] sm:$0xff] }
   0x8   :  { %333 = vmatprep.subr.mxu0 %v75_v3  ;;  %386 = vmatprep.subr.mxu1 %v75_v3  ;;  %v39_v17 = vld [vmem:[%s575_s0 + $0x40] sm:$0xff]  ;;  %v34_v22 = vld [vmem:[%s575_s0 + $0x18] sm:$0xff]  ;;  %v36_v26 = vld [vmem:[%s575_s0 + $0x28] sm:$0xff] }
   0x9   :  { %334 = vmatpush3.msra.mxu0 %v75_v3  ;;  %402 = vmatpush3.msra.mxu1 %v75_v3  ;;  %v42_v23 = vld [vmem:[%s575_s0 + $0x58] sm:$0xff]  ;;  %v35_v24 = vld [vmem:[%s575_s0 + $0x20] sm:$0xff]  ;;  %v44_v27 = vld [vmem:[%s575_s0 + $0x68] sm:$0xff] }
   0xa   :  { %335 = vmatprep.subr.mxu0 %v74_v4  ;;  %387 = vmatprep.subr.mxu1 %v74_v4  ;;  %v43_v25 = vld [vmem:[%s575_s0 + $0x60] sm:$0xff]  ;;  %v37_v28 = vld [vmem:[%s575_s0 + $0x30] sm:$0xff]  ;;  %v38_v30 = vld [vmem:[%s575_s0 + $0x38] sm:$0xff] }
   0xb   :  { %336 = vmatpush3.msra.mxu0 %v74_v4  ;;  %403 = vmatpush3.msra.mxu1 %v74_v4  ;;  %v45_v29 = vld [vmem:[%s575_s0 + $0x70] sm:$0xff]  ;;  %v46_v31 = vld [vmem:[%s575_s0 + $0x78] sm:$0xff] }
   0xc   :  { %337 = vmatprep.subr.mxu0 %v73_v5  ;;  %388 = vmatprep.subr.mxu1 %v73_v5 }
   0xd   :  { %338 = vmatpush3.msra.mxu0 %v73_v5  ;;  %404 = vmatpush3.msra.mxu1 %v73_v5 }
   0xe   :  { %339 = vmatprep.subr.mxu0 %v72_v6  ;;  %389 = vmatprep.subr.mxu1 %v72_v6 }
   0xf   :  { %340 = vmatpush3.msra.mxu0 %v72_v6  ;;  %405 = vmatpush3.msra.mxu1 %v72_v6 }
  0x10   :  { %341 = vmatprep.subr.mxu0 %v71_v7  ;;  %390 = vmatprep.subr.mxu1 %v71_v7 }
  0x11   :  { %342 = vmatpush3.msra.mxu0 %v71_v7  ;;  %406 = vmatpush3.msra.mxu1 %v71_v7 }
  0x12   :  { %343 = vmatprep.subr.mxu0 %v70_v8  ;;  %391 = vmatprep.subr.mxu1 %v70_v8 }
  0x13   :  { %344 = vmatpush3.msra.mxu0 %v70_v8  ;;  %407 = vmatpush3.msra.mxu1 %v70_v8 }
  0x14   :  { %345 = vmatprep.subr.mxu0 %v69_v9  ;;  %392 = vmatprep.subr.mxu1 %v69_v9 }
  0x15   :  { %346 = vmatpush3.msra.mxu0 %v69_v9  ;;  %408 = vmatpush3.msra.mxu1 %v69_v9 }
  0x16   :  { %347 = vmatprep.subr.mxu0 %v68_v10  ;;  %393 = vmatprep.subr.mxu1 %v68_v10 }
  0x17   :  { %348 = vmatpush3.msra.mxu0 %v68_v10  ;;  %409 = vmatpush3.msra.mxu1 %v68_v10 }
  0x18   :  { %349 = vmatprep.subr.mxu0 %v67_v11  ;;  %394 = vmatprep.subr.mxu1 %v67_v11 }
  0x19   :  { %350 = vmatpush3.msra.mxu0 %v67_v11  ;;  %410 = vmatpush3.msra.mxu1 %v67_v11 }
  0x1a   :  { %351 = vmatprep.subr.mxu0 %v66_v12  ;;  %395 = vmatprep.subr.mxu1 %v66_v12 }
  0x1b   :  { %352 = vmatpush3.msra.mxu0 %v66_v12  ;;  %411 = vmatpush3.msra.mxu1 %v66_v12 }
  0x1c   :  { %353 = vmatprep.subr.mxu0 %v65_v13  ;;  %396 = vmatprep.subr.mxu1 %v65_v13 }
  0x1d   :  { %354 = vmatpush3.msra.mxu0 %v65_v13  ;;  %412 = vmatpush3.msra.mxu1 %v65_v13 }
  0x1e   :  { %355 = vmatprep.subr.mxu0 %v64_v14  ;;  %397 = vmatprep.subr.mxu1 %v64_v14 }
  0x1f   :  { %356 = vmatpush3.msra.mxu0 %v64_v14  ;;  %413 = vmatpush3.msra.mxu1 %v64_v14 }
  0x20   :  { %357 = vmatprep.subr.mxu0 %v63_v15  ;;  %398 = vmatprep.subr.mxu1 %v63_v15 }
  0x21   :  { %358 = vmatpush3.msra.mxu0 %v63_v15  ;;  %414 = vmatpush3.msra.mxu1 %v63_v15 }
  0x22   :  { %359 = vmatprep.mubr.f32.mxu0 %v31_v16  ;;  %371 = vmatprep.mubr.f32.mxu1 %v39_v17 }
  0x23   :  { %360 = vmatmul.mubr.f32.vlgmr.msra.gmra.mxu0 %v32_v18  ;;  %372 = vmatmul.mubr.f32.vlgmr.msra.gmra.mxu1 %v40_v19 }
  0x24   :  { %362 = vmatprep.mubr.f32.mxu0 %v33_v20  ;;  %374 = vmatprep.mubr.f32.mxu1 %v41_v21 }
  0x27   :  { %363 = vmatmul.mubr.f32.gmra.mxu0 %v34_v22  ;;  %375 = vmatmul.mubr.f32.gmra.mxu1 %v42_v23 }
  0x28   :  { %365 = vmatprep.mubr.f32.mxu0 %v35_v24  ;;  %377 = vmatprep.mubr.f32.mxu1 %v43_v25 }
  0x2b   :  { %366 = vmatmul.mubr.f32.gmra.mxu0 %v36_v26  ;;  %378 = vmatmul.mubr.f32.gmra.mxu1 %v44_v27 }
  0x2c   :  { %368 = vmatprep.mubr.f32.mxu0 %v37_v28  ;;  %380 = vmatprep.mubr.f32.mxu1 %v45_v29 }
  0x2f   :  { %369 = vmatmul.mubr.f32.gmra.mxu0 %v38_v30  ;;  %381 = vmatmul.mubr.f32.gmra.mxu1 %v46_v31 }
  0xe3   :  { %v361_v32 = vpop.f32.mrf.mxu0  ;;  %v373_v33 = vpop.f32.mrf.mxu1 }
  0xe4   :  { %276 = vst [vmem:[%s576_s2 + $0x8] sm:$0xff] %v361_v32  ;;  %284 = vst [vmem:[%s576_s2 + $0x48] sm:$0xff] %v373_v33 }
  0xe5   :  { %v145_v34 = vpop.f32.mrf.mxu0  ;;  %v185_v35 = vpop.f32.mrf.mxu1 }
  0xe6   :  { %275 = vst [vmem:[%s576_s2] sm:$0xff] %v145_v34  ;;  %283 = vst [vmem:[%s576_s2 + $0x40] sm:$0xff] %v185_v35 }
  0xe7   :  { %v364_v36 = vpop.f32.mrf.mxu0  ;;  %v376_v37 = vpop.f32.mrf.mxu1 }
  0xe8   :  { %278 = vst [vmem:[%s576_s2 + $0x18] sm:$0xff] %v364_v36  ;;  %286 = vst [vmem:[%s576_s2 + $0x58] sm:$0xff] %v376_v37 }
  0xe9   :  { %v155_v38 = vpop.f32.mrf.mxu0  ;;  %v195_v39 = vpop.f32.mrf.mxu1 }
  0xea   :  { %277 = vst [vmem:[%s576_s2 + $0x10] sm:$0xff] %v155_v38  ;;  %285 = vst [vmem:[%s576_s2 + $0x50] sm:$0xff] %v195_v39 }
  0xeb   :  { %v367_v40 = vpop.f32.mrf.mxu0  ;;  %v379_v41 = vpop.f32.mrf.mxu1 }
  0xec   :  { %280 = vst [vmem:[%s576_s2 + $0x28] sm:$0xff] %v367_v40  ;;  %288 = vst [vmem:[%s576_s2 + $0x68] sm:$0xff] %v379_v41 }
  0xed   :  { %v165_v42 = vpop.f32.mrf.mxu0  ;;  %v205_v43 = vpop.f32.mrf.mxu1 }
  0xee   :  { %279 = vst [vmem:[%s576_s2 + $0x20] sm:$0xff] %v165_v42  ;;  %287 = vst [vmem:[%s576_s2 + $0x60] sm:$0xff] %v205_v43 }
  0xef   :  { %v370_v44 = vpop.f32.mrf.mxu0  ;;  %v382_v45 = vpop.f32.mrf.mxu1 }
  0xf0   :  { %282 = vst [vmem:[%s576_s2 + $0x38] sm:$0xff] %v370_v44  ;;  %290 = vst [vmem:[%s576_s2 + $0x78] sm:$0xff] %v382_v45 }
  0xf1   :  { %v175_v46 = vpop.f32.mrf.mxu0  ;;  %v215_v47 = vpop.f32.mrf.mxu1 }
  0xf2   :  { %281 = vst [vmem:[%s576_s2 + $0x30] sm:$0xff] %v175_v46  ;;  %289 = vst [vmem:[%s576_s2 + $0x70] sm:$0xff] %v215_v47 }

// kernel: _forward.9
= control target key start
LH: loop header
LB: loop body
LE: loop exit
PB: predicated region body
PF: predicated region fallthrough
CT: control target
= control target key end

     0   :  { %s715_s1 = inlined_call_operand.vmem [shape: f32[128,128], index: 1, kind: input, shape index: {}]   ;;  %s716_s0 = inlined_call_operand.vmem [shape: f32[128,128], index: 0, kind: input, shape index: {}]   ;;  %s717_s2 = inlined_call_operand.vmem [shape: f32[1,128], index: 2, kind: input, shape index: {}]   ;;  %s718_s3 = inlined_call_operand.vmem [shape: f32[128,128], index: 3, kind: input, shape index: {}]   ;;  %s719_s4 = inlined_call_operand.vmem [shape: f32[128,128], index: 4, kind: output, shape index: {}]  }
   0x1   :  { %v84_v0 = vld [vmem:[%s715_s1 + $0x78] sm:$0xff]  ;;  %v83_v1 = vld [vmem:[%s715_s1 + $0x70] sm:$0xff]  ;;  %v82_v2 = vld [vmem:[%s715_s1 + $0x68] sm:$0xff] }
   0x2   :  { %389 = vmatprep.subr.mxu0 %v84_v0  ;;  %445 = vmatprep.subr.mxu1 %v84_v0  ;;  %v81_v3 = vld [vmem:[%s715_s1 + $0x60] sm:$0xff]  ;;  %v80_v4 = vld [vmem:[%s715_s1 + $0x58] sm:$0xff]  ;;  %v79_v5 = vld [vmem:[%s715_s1 + $0x50] sm:$0xff] }
   0x3   :  { %390 = vmatpush3.msra.mxu0 %v84_v0  ;;  %461 = vmatpush3.msra.mxu1 %v84_v0  ;;  %v78_v6 = vld [vmem:[%s715_s1 + $0x48] sm:$0xff]  ;;  %v77_v7 = vld [vmem:[%s715_s1 + $0x40] sm:$0xff]  ;;  %v76_v8 = vld [vmem:[%s715_s1 + $0x38] sm:$0xff] }
   0x4   :  { %391 = vmatprep.subr.mxu0 %v83_v1  ;;  %446 = vmatprep.subr.mxu1 %v83_v1  ;;  %v75_v9 = vld [vmem:[%s715_s1 + $0x30] sm:$0xff]  ;;  %v74_v10 = vld [vmem:[%s715_s1 + $0x28] sm:$0xff]  ;;  %v73_v11 = vld [vmem:[%s715_s1 + $0x20] sm:$0xff] }
   0x5   :  { %392 = vmatpush3.msra.mxu0 %v83_v1  ;;  %462 = vmatpush3.msra.mxu1 %v83_v1  ;;  %v72_v12 = vld [vmem:[%s715_s1 + $0x18] sm:$0xff]  ;;  %v71_v13 = vld [vmem:[%s715_s1 + $0x10] sm:$0xff]  ;;  %v70_v14 = vld [vmem:[%s715_s1 + $0x8] sm:$0xff] }
   0x6   :  { %393 = vmatprep.subr.mxu0 %v82_v2  ;;  %447 = vmatprep.subr.mxu1 %v82_v2  ;;  %v69_v15 = vld [vmem:[%s715_s1] sm:$0xff]  ;;  %v38_v18 = vld [vmem:[%s716_s0 + $0x8] sm:$0xff]  ;;  %v39_v20 = vld [vmem:[%s716_s0 + $0x10] sm:$0xff] }
   0x7   :  { %394 = vmatpush3.msra.mxu0 %v82_v2  ;;  %463 = vmatpush3.msra.mxu1 %v82_v2  ;;  %v37_v16 = vld [vmem:[%s716_s0] sm:$0xff]  ;;  %v46_v19 = vld [vmem:[%s716_s0 + $0x48] sm:$0xff]  ;;  %v47_v21 = vld [vmem:[%s716_s0 + $0x50] sm:$0xff] }
   0x8   :  { %395 = vmatprep.subr.mxu0 %v81_v3  ;;  %448 = vmatprep.subr.mxu1 %v81_v3  ;;  %v45_v17 = vld [vmem:[%s716_s0 + $0x40] sm:$0xff]  ;;  %v40_v22 = vld [vmem:[%s716_s0 + $0x18] sm:$0xff]  ;;  %v42_v26 = vld [vmem:[%s716_s0 + $0x28] sm:$0xff] }
   0x9   :  { %396 = vmatpush3.msra.mxu0 %v81_v3  ;;  %464 = vmatpush3.msra.mxu1 %v81_v3  ;;  %v48_v23 = vld [vmem:[%s716_s0 + $0x58] sm:$0xff]  ;;  %v41_v24 = vld [vmem:[%s716_s0 + $0x20] sm:$0xff]  ;;  %v50_v27 = vld [vmem:[%s716_s0 + $0x68] sm:$0xff] }
   0xa   :  { %397 = vmatprep.subr.mxu0 %v80_v4  ;;  %449 = vmatprep.subr.mxu1 %v80_v4  ;;  %v49_v25 = vld [vmem:[%s716_s0 + $0x60] sm:$0xff]  ;;  %v43_v28 = vld [vmem:[%s716_s0 + $0x30] sm:$0xff]  ;;  %v44_v30 = vld [vmem:[%s716_s0 + $0x38] sm:$0xff] }
   0xb   :  { %398 = vmatpush3.msra.mxu0 %v80_v4  ;;  %465 = vmatpush3.msra.mxu1 %v80_v4  ;;  %v51_v29 = vld [vmem:[%s716_s0 + $0x70] sm:$0xff]  ;;  %v52_v31 = vld [vmem:[%s716_s0 + $0x78] sm:$0xff]  ;;  %v601_v32 = vld [vmem:[%s717_s2] ss:$0 sm:$0xff] }
   0xc   :  { %399 = vmatprep.subr.mxu0 %v79_v5  ;;  %450 = vmatprep.subr.mxu1 %v79_v5  ;;  %v305_v34 = vld [vmem:[%s718_s3 + $0x8] sm:$0xff]  ;;  %v304_v40 = vld [vmem:[%s718_s3] sm:$0xff]  ;;  %v307_v48 = vld [vmem:[%s718_s3 + $0x18] sm:$0xff] }
   0xd   :  { %400 = vmatpush3.msra.mxu0 %v79_v5  ;;  %466 = vmatpush3.msra.mxu1 %v79_v5  ;;  %v313_v36 = vld [vmem:[%s718_s3 + $0x48] sm:$0xff]  ;;  %v312_v42 = vld [vmem:[%s718_s3 + $0x40] sm:$0xff]  ;;  %v315_v50 = vld [vmem:[%s718_s3 + $0x58] sm:$0xff] }
   0xe   :  { %401 = vmatprep.subr.mxu0 %v78_v6  ;;  %451 = vmatprep.subr.mxu1 %v78_v6  ;;  %v306_v56 = vld [vmem:[%s718_s3 + $0x10] sm:$0xff]  ;;  %v309_v0 = vld [vmem:[%s718_s3 + $0x28] sm:$0xff] }
   0xf   :  { %402 = vmatpush3.msra.mxu0 %v78_v6  ;;  %467 = vmatpush3.msra.mxu1 %v78_v6  ;;  %v314_v58 = vld [vmem:[%s718_s3 + $0x50] sm:$0xff]  ;;  %v317_v2 = vld [vmem:[%s718_s3 + $0x68] sm:$0xff] }
  0x10   :  { %403 = vmatprep.subr.mxu0 %v77_v7  ;;  %452 = vmatprep.subr.mxu1 %v77_v7 }
  0x11   :  { %404 = vmatpush3.msra.mxu0 %v77_v7  ;;  %468 = vmatpush3.msra.mxu1 %v77_v7 }
  0x12   :  { %405 = vmatprep.subr.mxu0 %v76_v8  ;;  %453 = vmatprep.subr.mxu1 %v76_v8 }
  0x13   :  { %406 = vmatpush3.msra.mxu0 %v76_v8  ;;  %469 = vmatpush3.msra.mxu1 %v76_v8  ;;  %v308_v8 = vld [vmem:[%s718_s3 + $0x20] sm:$0xff] }
  0x14   :  { %407 = vmatprep.subr.mxu0 %v75_v9  ;;  %454 = vmatprep.subr.mxu1 %v75_v9 }
  0x15   :  { %408 = vmatpush3.msra.mxu0 %v75_v9  ;;  %470 = vmatpush3.msra.mxu1 %v75_v9 }
  0x16   :  { %409 = vmatprep.subr.mxu0 %v74_v10  ;;  %455 = vmatprep.subr.mxu1 %v74_v10 }
  0x17   :  { %410 = vmatpush3.msra.mxu0 %v74_v10  ;;  %471 = vmatpush3.msra.mxu1 %v74_v10  ;;  %v316_v10 = vld [vmem:[%s718_s3 + $0x60] sm:$0xff] }
  0x18   :  { %411 = vmatprep.subr.mxu0 %v73_v11  ;;  %456 = vmatprep.subr.mxu1 %v73_v11 }
  0x19   :  { %412 = vmatpush3.msra.mxu0 %v73_v11  ;;  %472 = vmatpush3.msra.mxu1 %v73_v11 }
  0x1a   :  { %413 = vmatprep.subr.mxu0 %v72_v12  ;;  %457 = vmatprep.subr.mxu1 %v72_v12 }
  0x1b   :  { %414 = vmatpush3.msra.mxu0 %v72_v12  ;;  %473 = vmatpush3.msra.mxu1 %v72_v12 }
  0x1c   :  { %415 = vmatprep.subr.mxu0 %v71_v13  ;;  %458 = vmatprep.subr.mxu1 %v71_v13 }
  0x1d   :  { %416 = vmatpush3.msra.mxu0 %v71_v13  ;;  %474 = vmatpush3.msra.mxu1 %v71_v13 }
  0x1e   :  { %417 = vmatprep.subr.mxu0 %v70_v14  ;;  %459 = vmatprep.subr.mxu1 %v70_v14 }
  0x1f   :  { %418 = vmatpush3.msra.mxu0 %v70_v14  ;;  %475 = vmatpush3.msra.mxu1 %v70_v14 }
  0x20   :  { %419 = vmatprep.subr.mxu0 %v69_v15  ;;  %460 = vmatprep.subr.mxu1 %v69_v15 }
  0x21   :  { %420 = vmatpush3.msra.mxu0 %v69_v15  ;;  %476 = vmatpush3.msra.mxu1 %v69_v15 }
  0x22   :  { %421 = vmatprep.mubr.f32.mxu0 %v37_v16  ;;  %433 = vmatprep.mubr.f32.mxu1 %v45_v17  ;;  %v311_v16 = vld [vmem:[%s718_s3 + $0x38] sm:$0xff] }
  0x23   :  { %422 = vmatmul.mubr.f32.vlgmr.msra.gmra.mxu0 %v38_v18  ;;  %434 = vmatmul.mubr.f32.vlgmr.msra.gmra.mxu1 %v46_v19  ;;  %v319_v18 = vld [vmem:[%s718_s3 + $0x78] sm:$0xff] }
  0x24   :  { %424 = vmatprep.mubr.f32.mxu0 %v39_v20  ;;  %436 = vmatprep.mubr.f32.mxu1 %v47_v21 }
  0x27   :  { %425 = vmatmul.mubr.f32.gmra.mxu0 %v40_v22  ;;  %437 = vmatmul.mubr.f32.gmra.mxu1 %v48_v23 }
  0x28   :  { %427 = vmatprep.mubr.f32.mxu0 %v41_v24  ;;  %439 = vmatprep.mubr.f32.mxu1 %v49_v25  ;;  %v310_v24 = vld [vmem:[%s718_s3 + $0x30] sm:$0xff] }
  0x2b   :  { %428 = vmatmul.mubr.f32.gmra.mxu0 %v42_v26  ;;  %440 = vmatmul.mubr.f32.gmra.mxu1 %v50_v27  ;;  %v318_v26 = vld [vmem:[%s718_s3 + $0x70] sm:$0xff] }
  0x2c   :  { %430 = vmatprep.mubr.f32.mxu0 %v43_v28  ;;  %442 = vmatprep.mubr.f32.mxu1 %v51_v29 }
  0x2f   :  { %431 = vmatmul.mubr.f32.gmra.mxu0 %v44_v30  ;;  %443 = vmatmul.mubr.f32.gmra.mxu1 %v52_v31 }
  0xe3   :  { %v423_v33 = vpop.f32.mrf.mxu0  ;;  %v435_v35 = vpop.f32.mrf.mxu1 }
  0xe4   :  { %v289_v37 = vadd.f32 %v423_v33, %v601_v32  ;;  %v297_v38 = vadd.f32 %v435_v35, %v601_v32 }
  0xe5   :  { %v151_v39 = vpop.f32.mrf.mxu0  ;;  %v191_v41 = vpop.f32.mrf.mxu1 }
  0xe6   :  { %v321_v43 = vadd.f32 %v305_v34, %v289_v37  ;;  %v329_v44 = vadd.f32 %v313_v36, %v297_v38  ;;  %v288_v45 = vadd.f32 %v601_v32, %v151_v39  ;;  %v296_v46 = vadd.f32 %v601_v32, %v191_v41 }
  0xe7   :  { %v426_v47 = vpop.f32.mrf.mxu0  ;;  %v438_v49 = vpop.f32.mrf.mxu1 }
  0xe8   :  { %337 = vst [vmem:[%s719_s4 + $0x8] sm:$0xff] %v321_v43  ;;  %345 = vst [vmem:[%s719_s4 + $0x48] sm:$0xff] %v329_v44  ;;  %v320_v51 = vadd.f32 %v304_v40, %v288_v45  ;;  %v328_v52 = vadd.f32 %v312_v42, %v296_v46  ;;  %v291_v53 = vadd.f32 %v426_v47, %v601_v32 }
  0xe9   :  { %v299_v54 = vadd.f32 %v438_v49, %v601_v32  ;;  %v161_v55 = vpop.f32.mrf.mxu0  ;;  %v201_v57 = vpop.f32.mrf.mxu1 }
  0xea   :  { %336 = vst [vmem:[%s719_s4] sm:$0xff] %v320_v51  ;;  %344 = vst [vmem:[%s719_s4 + $0x40] sm:$0xff] %v328_v52  ;;  %v323_v59 = vadd.f32 %v307_v48, %v291_v53  ;;  %v290_v61 = vadd.f32 %v601_v32, %v161_v55  ;;  %v298_v62 = vadd.f32 %v601_v32, %v201_v57 }
  0xeb   :  { %v331_v60 = vadd.f32 %v315_v50, %v299_v54  ;;  %v429_v63 = vpop.f32.mrf.mxu0  ;;  %v441_v1 = vpop.f32.mrf.mxu1 }
  0xec   :  { %339 = vst [vmem:[%s719_s4 + $0x18] sm:$0xff] %v323_v59  ;;  %v322_v3 = vadd.f32 %v306_v56, %v290_v61  ;;  %v330_v4 = vadd.f32 %v314_v58, %v298_v62  ;;  %v293_v5 = vadd.f32 %v429_v63, %v601_v32  ;;  %v301_v6 = vadd.f32 %v441_v1, %v601_v32 }
  0xed   :  { %347 = vst [vmem:[%s719_s4 + $0x58] sm:$0xff] %v331_v60  ;;  %v171_v7 = vpop.f32.mrf.mxu0  ;;  %v211_v9 = vpop.f32.mrf.mxu1 }
  0xee   :  { %338 = vst [vmem:[%s719_s4 + $0x10] sm:$0xff] %v322_v3  ;;  %346 = vst [vmem:[%s719_s4 + $0x50] sm:$0xff] %v330_v4  ;;  %v325_v11 = vadd.f32 %v309_v0, %v293_v5  ;;  %v333_v12 = vadd.f32 %v317_v2, %v301_v6  ;;  %v292_v13 = vadd.f32 %v601_v32, %v171_v7 }
  0xef   :  { %v300_v14 = vadd.f32 %v601_v32, %v211_v9  ;;  %v432_v15 = vpop.f32.mrf.mxu0  ;;  %v444_v17 = vpop.f32.mrf.mxu1 }
  0xf0   :  { %341 = vst [vmem:[%s719_s4 + $0x28] sm:$0xff] %v325_v11  ;;  %349 = vst [vmem:[%s719_s4 + $0x68] sm:$0xff] %v333_v12  ;;  %v324_v19 = vadd.f32 %v308_v8, %v292_v13  ;;  %v295_v21 = vadd.f32 %v432_v15, %v601_v32  ;;  %v303_v22 = vadd.f32 %v444_v17, %v601_v32 }
  0xf1   :  { %v332_v20 = vadd.f32 %v316_v10, %v300_v14  ;;  %v181_v23 = vpop.f32.mrf.mxu0  ;;  %v221_v25 = vpop.f32.mrf.mxu1 }
  0xf2   :  { %340 = vst [vmem:[%s719_s4 + $0x20] sm:$0xff] %v324_v19  ;;  %v327_v27 = vadd.f32 %v311_v16, %v295_v21  ;;  %v335_v28 = vadd.f32 %v319_v18, %v303_v22  ;;  %v294_v29 = vadd.f32 %v601_v32, %v181_v23  ;;  %v302_v30 = vadd.f32 %v601_v32, %v221_v25 }
  0xf3   :  { %348 = vst [vmem:[%s719_s4 + $0x60] sm:$0xff] %v332_v20 }
  0xf4   :  { %343 = vst [vmem:[%s719_s4 + $0x38] sm:$0xff] %v327_v27  ;;  %351 = vst [vmem:[%s719_s4 + $0x78] sm:$0xff] %v335_v28  ;;  %v326_v31 = vadd.f32 %v310_v24, %v294_v29  ;;  %v334_v33 = vadd.f32 %v318_v26, %v302_v30 }
  0xf6   :  { %342 = vst [vmem:[%s719_s4 + $0x30] sm:$0xff] %v326_v31  ;;  %350 = vst [vmem:[%s719_s4 + $0x70] sm:$0xff] %v334_v33 }

// kernel: _forward.7
= control target key start
LH: loop header
LB: loop body
LE: loop exit
PB: predicated region body
PF: predicated region fallthrough
CT: control target
= control target key end

     0   :  { %s1112_s0 = inlined_call_operand.vmem [shape: f32[128,128], index: 0, kind: input, shape index: {}]   ;;  %s1113_s1 = inlined_call_operand.vmem [shape: f32[128,128], index: 1, kind: input, shape index: {}]   ;;  %s1114_s2 = inlined_call_operand.vmem [shape: f32[1,128], index: 2, kind: input, shape index: {}]   ;;  %s1115_s3 = inlined_call_operand.vmem [shape: f32[1,128], index: 3, kind: input, shape index: {}]   ;;  %s1116_s4 = inlined_call_operand.vmem [shape: f32[128,128], index: 4, kind: output, shape index: {}]  }
   0x1   :  { %v753_v0 = vld [vmem:[%s1112_s0 + $0x8] sm:$0xff]  ;;  %v758_v1 = vld [vmem:[%s1112_s0] sm:$0xff]  ;;  %v785_v8 = vld [vmem:[%s1112_s0 + $0x50] sm:$0xff] }
   0x2   :  { %55 = vadd.xlane.f32.xlu1 %v753_v0  ;;  %53 = vadd.xlane.f32.xlu0 %v758_v1  ;;  %v765_v2 = vld [vmem:[%s1112_s0 + $0x48] sm:$0xff]  ;;  %v770_v3 = vld [vmem:[%s1112_s0 + $0x40] sm:$0xff]  ;;  %v101_v5 = vmul.f32 %v758_v1, %v758_v1  ;;  %v102_v7 = vmul.f32 %v753_v0, %v753_v0  ;;  %v790_v9 = vld [vmem:[%s1112_s0 + $0x10] sm:$0xff]  ;;  %v111_v13 = vmul.f32 %v785_v8, %v785_v8 }
   0x3   :  { %v109_v4 = vmul.f32 %v770_v3, %v770_v3  ;;  %v110_v6 = vmul.f32 %v765_v2, %v765_v2  ;;  %v797_v10 = vld [vmem:[%s1112_s0 + $0x58] sm:$0xff]  ;;  %v103_v14 = vmul.f32 %v790_v9, %v790_v9  ;;  %v353_v15 = vld [vmem:[%s1113_s1 + $0x70] sm:$0xff]  ;;  %v352_v16 = vld [vmem:[%s1113_s1 + $0x68] sm:$0xff] }
   0x4   :  { %v802_v11 = vld [vmem:[%s1112_s0 + $0x18] sm:$0xff]  ;;  %v112_v17 = vmul.f32 %v797_v10, %v797_v10  ;;  %v351_v19 = vld [vmem:[%s1113_s1 + $0x60] sm:$0xff]  ;;  %v349_v23 = vld [vmem:[%s1113_s1 + $0x50] sm:$0xff] }
   0x5   :  { %v354_v12 = vld [vmem:[%s1113_s1 + $0x78] sm:$0xff]  ;;  %v104_v18 = vmul.f32 %v802_v11, %v802_v11  ;;  %v832_v21 = vld [vmem:[%s1112_s0 + $0x60] sm:$0xff]  ;;  %v348_v24 = vld [vmem:[%s1113_s1 + $0x48] sm:$0xff] }
   0x6   :  { %71 = vadd.xlane.f32.xlu1 %v765_v2  ;;  %69 = vadd.xlane.f32.xlu0 %v770_v3  ;;  %v350_v20 = vld [vmem:[%s1113_s1 + $0x58] sm:$0xff]  ;;  %v837_v22 = vld [vmem:[%s1112_s0 + $0x20] sm:$0xff]  ;;  %v850_v25 = vld [vmem:[%s1112_s0 + $0x68] sm:$0xff]  ;;  %v113_v28 = vmul.f32 %v832_v21, %v832_v21 }
   0x7   :  { %605 = vmatprep.subr.mxu0 %v354_v12  ;;  %661 = vmatprep.subr.mxu1 %v354_v12  ;;  %v855_v26 = vld [vmem:[%s1112_s0 + $0x28] sm:$0xff]  ;;  %v347_v27 = vld [vmem:[%s1113_s1 + $0x40] sm:$0xff]  ;;  %v105_v29 = vmul.f32 %v837_v22, %v837_v22  ;;  %v346_v30 = vld [vmem:[%s1113_s1 + $0x38] sm:$0xff]  ;;  %v114_v31 = vmul.f32 %v850_v25, %v850_v25 }
   0x8   :  { %606 = vmatpush3.msra.mxu0 %v354_v12  ;;  %677 = vmatpush3.msra.mxu1 %v354_v12  ;;  %v106_v32 = vmul.f32 %v855_v26, %v855_v26  ;;  %v345_v33 = vld [vmem:[%s1113_s1 + $0x30] sm:$0xff]  ;;  %v344_v34 = vld [vmem:[%s1113_s1 + $0x28] sm:$0xff]  ;;  %v343_v37 = vld [vmem:[%s1113_s1 + $0x20] sm:$0xff] }
   0x9   :  { %607 = vmatprep.subr.mxu0 %v353_v15  ;;  %662 = vmatprep.subr.mxu1 %v353_v15  ;;  %v882_v35 = vld [vmem:[%s1112_s0 + $0x70] sm:$0xff]  ;;  %v342_v38 = vld [vmem:[%s1113_s1 + $0x18] sm:$0xff]  ;;  %v340_v44 = vld [vmem:[%s1113_s1 + $0x8] sm:$0xff] }
   0xa   :  { %133 = vadd.xlane.f32.xlu1 %v109_v4  ;;  %117 = vadd.xlane.f32.xlu0 %v101_v5  ;;  %v887_v36 = vld [vmem:[%s1112_s0 + $0x30] sm:$0xff]  ;;  %v900_v39 = vld [vmem:[%s1112_s0 + $0x78] sm:$0xff]  ;;  %v115_v42 = vmul.f32 %v882_v35, %v882_v35  ;;  %v339_v47 = vld [vmem:[%s1113_s1] sm:$0xff] }
   0xb   :  { %608 = vmatpush3.msra.mxu0 %v353_v15  ;;  %678 = vmatpush3.msra.mxu1 %v353_v15  ;;  %v905_v40 = vld [vmem:[%s1112_s0 + $0x38] sm:$0xff]  ;;  %v341_v41 = vld [vmem:[%s1113_s1 + $0x10] sm:$0xff]  ;;  %v107_v43 = vmul.f32 %v887_v36, %v887_v36  ;;  %v116_v45 = vmul.f32 %v900_v39, %v900_v39 }
   0xc   :  { %609 = vmatprep.subr.mxu0 %v352_v16  ;;  %663 = vmatprep.subr.mxu1 %v352_v16  ;;  %v108_v46 = vmul.f32 %v905_v40, %v905_v40 }
   0xd   :  { %610 = vmatpush3.msra.mxu0 %v352_v16  ;;  %679 = vmatpush3.msra.mxu1 %v352_v16 }
   0xe   :  { %135 = vadd.xlane.f32.xlu1 %v110_v6  ;;  %119 = vadd.xlane.f32.xlu0 %v102_v7 }
   0xf   :  { %611 = vmatprep.subr.mxu0 %v351_v19  ;;  %664 = vmatprep.subr.mxu1 %v351_v19 }
  0x10   :  { %612 = vmatpush3.msra.mxu0 %v351_v19  ;;  %680 = vmatpush3.msra.mxu1 %v351_v19 }
  0x11   :  { %613 = vmatprep.subr.mxu0 %v350_v20  ;;  %665 = vmatprep.subr.mxu1 %v350_v20 }
  0x12   :  { %73 = vadd.xlane.f32.xlu1 %v785_v8  ;;  %57 = vadd.xlane.f32.xlu0 %v790_v9 }
  0x13   :  { %614 = vmatpush3.msra.mxu0 %v350_v20  ;;  %681 = vmatpush3.msra.mxu1 %v350_v20 }
  0x14   :  { %615 = vmatprep.subr.mxu0 %v349_v23  ;;  %666 = vmatprep.subr.mxu1 %v349_v23 }
  0x15   :  { %616 = vmatpush3.msra.mxu0 %v349_v23  ;;  %682 = vmatpush3.msra.mxu1 %v349_v23 }
  0x16   :  { %75 = vadd.xlane.f32.xlu1 %v797_v10  ;;  %59 = vadd.xlane.f32.xlu0 %v802_v11 }
  0x17   :  { %617 = vmatprep.subr.mxu0 %v348_v24  ;;  %667 = vmatprep.subr.mxu1 %v348_v24 }
  0x18   :  { %618 = vmatpush3.msra.mxu0 %v348_v24  ;;  %683 = vmatpush3.msra.mxu1 %v348_v24 }
  0x19   :  { %619 = vmatprep.subr.mxu0 %v347_v27  ;;  %668 = vmatprep.subr.mxu1 %v347_v27 }
  0x1a   :  { %137 = vadd.xlane.f32.xlu1 %v111_v13  ;;  %121 = vadd.xlane.f32.xlu0 %v103_v14 }
  0x1b   :  { %620 = vmatpush3.msra.mxu0 %v347_v27  ;;  %684 = vmatpush3.msra.mxu1 %v347_v27 }
  0x1c   :  { %621 = vmatprep.subr.mxu0 %v346_v30  ;;  %669 = vmatprep.subr.mxu1 %v346_v30 }
  0x1d   :  { %622 = vmatpush3.msra.mxu0 %v346_v30  ;;  %685 = vmatpush3.msra.mxu1 %v346_v30 }
  0x1e   :  { %139 = vadd.xlane.f32.xlu1 %v112_v17  ;;  %123 = vadd.xlane.f32.xlu0 %v104_v18 }
  0x1f   :  { %623 = vmatprep.subr.mxu0 %v345_v33  ;;  %670 = vmatprep.subr.mxu1 %v345_v33 }
  0x20   :  { %624 = vmatpush3.msra.mxu0 %v345_v33  ;;  %686 = vmatpush3.msra.mxu1 %v345_v33 }
  0x21   :  { %625 = vmatprep.subr.mxu0 %v344_v34  ;;  %671 = vmatprep.subr.mxu1 %v344_v34 }
  0x22   :  { %77 = vadd.xlane.f32.xlu1 %v832_v21  ;;  %61 = vadd.xlane.f32.xlu0 %v837_v22 }
  0x23   :  { %626 = vmatpush3.msra.mxu0 %v344_v34  ;;  %687 = vmatpush3.msra.mxu1 %v344_v34 }
  0x24   :  { %627 = vmatprep.subr.mxu0 %v343_v37  ;;  %672 = vmatprep.subr.mxu1 %v343_v37 }
  0x25   :  { %628 = vmatpush3.msra.mxu0 %v343_v37  ;;  %688 = vmatpush3.msra.mxu1 %v343_v37 }
  0x26   :  { %79 = vadd.xlane.f32.xlu1 %v850_v25  ;;  %63 = vadd.xlane.f32.xlu0 %v855_v26 }
  0x27   :  { %629 = vmatprep.subr.mxu0 %v342_v38  ;;  %673 = vmatprep.subr.mxu1 %v342_v38 }
  0x28   :  { %630 = vmatpush3.msra.mxu0 %v342_v38  ;;  %689 = vmatpush3.msra.mxu1 %v342_v38 }
  0x29   :  { %631 = vmatprep.subr.mxu0 %v341_v41  ;;  %674 = vmatprep.subr.mxu1 %v341_v41 }
  0x2a   :  { %141 = vadd.xlane.f32.xlu1 %v113_v28  ;;  %125 = vadd.xlane.f32.xlu0 %v105_v29 }
  0x2b   :  { %632 = vmatpush3.msra.mxu0 %v341_v41  ;;  %690 = vmatpush3.msra.mxu1 %v341_v41 }
  0x2c   :  { %633 = vmatprep.subr.mxu0 %v340_v44  ;;  %675 = vmatprep.subr.mxu1 %v340_v44 }
  0x2d   :  { %634 = vmatpush3.msra.mxu0 %v340_v44  ;;  %691 = vmatpush3.msra.mxu1 %v340_v44 }
  0x2e   :  { %143 = vadd.xlane.f32.xlu1 %v114_v31  ;;  %127 = vadd.xlane.f32.xlu0 %v106_v32 }
  0x2f   :  { %635 = vmatprep.subr.mxu0 %v339_v47  ;;  %676 = vmatprep.subr.mxu1 %v339_v47 }
  0x30   :  { %636 = vmatpush3.msra.mxu0 %v339_v47  ;;  %692 = vmatpush3.msra.mxu1 %v339_v47 }
  0x32   :  { %81 = vadd.xlane.f32.xlu1 %v882_v35  ;;  %65 = vadd.xlane.f32.xlu0 %v887_v36 }
  0x36   :  { %83 = vadd.xlane.f32.xlu1 %v900_v39  ;;  %67 = vadd.xlane.f32.xlu0 %v905_v40 }
  0x3a   :  { %145 = vadd.xlane.f32.xlu1 %v115_v42  ;;  %129 = vadd.xlane.f32.xlu0 %v107_v43 }
  0x3e   :  { %147 = vadd.xlane.f32.xlu1 %v116_v45  ;;  %131 = vadd.xlane.f32.xlu0 %v108_v46 }
  0x8b   :  { %v56_v48 = vpop.xlane.xlu1 %55  ;;  %v54_v49 = vpop.xlane.xlu0 %53 }
  0x8c   :  { %v926_v52 = vmul.f32 0.03125, %v54_v49  ;;  %v930_v54 = vmul.f32 0.03125, %v56_v48 }
  0x8e   :  { %v165_v58 = vmul.f32 %v926_v52, %v926_v52  ;;  %v166_v4 = vmul.f32 %v930_v54, %v930_v54 }
  0x8f   :  { %v72_v50 = vpop.xlane.xlu1 %71  ;;  %v70_v51 = vpop.xlane.xlu0 %69 }
  0x90   :  { %v928_v53 = vmul.f32 0.03125, %v70_v51  ;;  %v932_v55 = vmul.f32 0.03125, %v72_v50 }
  0x92   :  { %v173_v59 = vmul.f32 %v928_v53, %v928_v53  ;;  %v174_v5 = vmul.f32 %v932_v55, %v932_v55 }
  0x93   :  { %v134_v56 = vpop.xlane.xlu1 %133  ;;  %v118_v57 = vpop.xlane.xlu0 %117 }
  0x94   :  { %v157_v60 = vmul.f32 0.03125, %v134_v56  ;;  %v149_v61 = vmul.f32 0.03125, %v118_v57 }
  0x96   :  { %v189_v62 = vsub.f32 %v157_v60, %v173_v59  ;;  %v181_v63 = vsub.f32 %v149_v61, %v165_v58  ;;  %v245_v61 = vsub.f32 %v758_v1, %v926_v52 }
  0x97   :  { %v136_v6 = vpop.xlane.xlu1 %135  ;;  %v120_v7 = vpop.xlane.xlu0 %119 }
  0x98   :  { %v205_v12 = vmax.f32 %v189_v62, 0.0  ;;  %v197_v13 = vmax.f32 %v181_v63, 0.0  ;;  %v158_v14 = vmul.f32 0.03125, %v136_v6  ;;  %v150_v15 = vmul.f32 0.03125, %v120_v7 }
  0x99   :  { %v253_v62 = vsub.f32 %v770_v3, %v928_v53  ;;  %v970_v3 = vld [vmem:[%s1115_s3] ss:$0 sm:$0xff] }
  0x9a   :  { %v221_v16 = vadd.f32 1e-05, %v205_v12  ;;  %v213_v17 = vadd.f32 1e-05, %v197_v13  ;;  %v190_v18 = vsub.f32 %v158_v14, %v174_v5  ;;  %v182_v19 = vsub.f32 %v150_v15, %v166_v4  ;;  %v965_v12 = vld [vmem:[%s1114_s2] ss:$0 sm:$0xff] }
  0x9b   :  { %v74_v20 = vpop.xlane.xlu1 %73  ;;  %v58_v23 = vpop.xlane.xlu0 %57 }
  0x9c   :  { %693 = vrsqrt.f32 %v221_v16  ;;  %v206_v24 = vmax.f32 %v190_v18, 0.0  ;;  %v198_v27 = vmax.f32 %v182_v19, 0.0  ;;  %v942_v32 = vmul.f32 0.03125, %v74_v20 }
  0x9d   :  { %695 = vrsqrt.f32 %v213_v17  ;;  %v944_v33 = vmul.f32 0.03125, %v58_v23  ;;  %v246_v20 = vsub.f32 %v753_v0, %v930_v54 }
  0x9e   :  { %v222_v28 = vadd.f32 1e-05, %v206_v24  ;;  %v214_v29 = vadd.f32 1e-05, %v198_v27  ;;  %v175_v42 = vmul.f32 %v942_v32, %v942_v32  ;;  %v254_v27 = vsub.f32 %v765_v2, %v932_v55 }
  0x9f   :  { %v76_v30 = vpop.xlane.xlu1 %75  ;;  %v60_v31 = vpop.xlane.xlu0 %59  ;;  %v167_v43 = vmul.f32 %v944_v33, %v944_v33 }
  0xa0   :  { %697 = vrsqrt.f32 %v222_v28  ;;  %v946_v34 = vmul.f32 0.03125, %v76_v30  ;;  %v948_v37 = vmul.f32 0.03125, %v60_v31 }
  0xa1   :  { %699 = vrsqrt.f32 %v214_v29 }
  0xa2   :  { %v176_v48 = vmul.f32 %v946_v34, %v946_v34  ;;  %v168_v49 = vmul.f32 %v948_v37, %v948_v37 }
  0xa3   :  { %v138_v38 = vpop.xlane.xlu1 %137  ;;  %v122_v41 = vpop.xlane.xlu0 %121 }
  0xa4   :  { %v159_v44 = vmul.f32 0.03125, %v138_v38  ;;  %v151_v45 = vmul.f32 0.03125, %v122_v41 }
  0xa6   :  { %v191_v46 = vsub.f32 %v159_v44, %v175_v42  ;;  %v183_v47 = vsub.f32 %v151_v45, %v167_v43 }
  0xa7   :  { %v140_v50 = vpop.xlane.xlu1 %139  ;;  %v124_v51 = vpop.xlane.xlu0 %123 }
  0xa8   :  { %v207_v56 = vmax.f32 %v191_v46, 0.0  ;;  %v199_v57 = vmax.f32 %v183_v47, 0.0  ;;  %v160_v58 = vmul.f32 0.03125, %v140_v50  ;;  %v152_v59 = vmul.f32 0.03125, %v124_v51 }
  0xa9   :  { %v694_v60 = vpop.eup %693 }
  0xaa   :  { %v696_v63 = vpop.eup %695  ;;  %v223_v4 = vadd.f32 1e-05, %v207_v56  ;;  %v215_v5 = vadd.f32 1e-05, %v199_v57  ;;  %v192_v6 = vsub.f32 %v160_v58, %v176_v48  ;;  %v184_v7 = vsub.f32 %v152_v59, %v168_v49 }
  0xab   :  { %v78_v13 = vpop.xlane.xlu1 %77  ;;  %v62_v14 = vpop.xlane.xlu0 %61  ;;  %v261_v15 = vmul.f32 %v696_v63, %v245_v61  ;;  %v269_v16 = vmul.f32 %v694_v60, %v253_v62 }
  0xac   :  { %701 = vrsqrt.f32 %v223_v4  ;;  %v208_v17 = vmax.f32 %v192_v6, 0.0  ;;  %v200_v1 = vmax.f32 %v184_v7, 0.0  ;;  %v980_v38 = vmul.f32 0.03125, %v78_v13 }
  0xad   :  { %v698_v52 = vpop.eup %697  ;;  %703 = vrsqrt.f32 %v215_v5  ;;  %v284_v53 = vmul.f32 %v965_v12, %v261_v15  ;;  %v292_v18 = vmul.f32 %v965_v12, %v269_v16  ;;  %v982_v41 = vmul.f32 0.03125, %v62_v14 }
  0xae   :  { %v700_v19 = vpop.eup %699  ;;  %v224_v23 = vadd.f32 1e-05, %v208_v17  ;;  %v216_v24 = vadd.f32 1e-05, %v200_v1  ;;  %v270_v0 = vmul.f32 %v698_v52, %v254_v27  ;;  %v177_v46 = vmul.f32 %v980_v38, %v980_v38 }
  0xaf   :  { %v80_v28 = vpop.xlane.xlu1 %79  ;;  %v64_v29 = vpop.xlane.xlu0 %63  ;;  %v307_v30 = vadd.f32 %v970_v3, %v284_v53  ;;  %v315_v31 = vadd.f32 %v970_v3, %v292_v18  ;;  %v262_v42 = vmul.f32 %v700_v19, %v246_v20  ;;  %v169_v47 = vmul.f32 %v982_v41, %v982_v41 }
  0xb0   :  { %705 = vrsqrt.f32 %v224_v23  ;;  %v984_v54 = vmul.f32 0.03125, %v80_v28  ;;  %v986_v43 = vmul.f32 0.03125, %v64_v29  ;;  %v293_v45 = vmul.f32 %v965_v12, %v270_v0 }
  0xb1   :  { %707 = vrsqrt.f32 %v216_v24  ;;  %637 = vmatprep.mubr.f32.mxu0 %v307_v30  ;;  %649 = vmatprep.mubr.f32.mxu1 %v315_v31  ;;  %v285_v44 = vmul.f32 %v965_v12, %v262_v42  ;;  %v255_v7 = vsub.f32 %v785_v8, %v942_v32  ;;  %v247_v13 = vsub.f32 %v790_v9, %v944_v33 }
  0xb2   :  { %v316_v51 = vadd.f32 %v970_v3, %v293_v45  ;;  %v178_v58 = vmul.f32 %v984_v54, %v984_v54  ;;  %v170_v59 = vmul.f32 %v986_v43, %v986_v43  ;;  %v248_v9 = vsub.f32 %v802_v11, %v948_v37 }
  0xb3   :  { %v142_v2 = vpop.xlane.xlu1 %141  ;;  %v126_v55 = vpop.xlane.xlu0 %125  ;;  %v308_v50 = vadd.f32 %v970_v3, %v285_v44  ;;  %v256_v29 = vsub.f32 %v797_v10, %v946_v34 }
  0xb4   :  { %v161_v48 = vmul.f32 0.03125, %v142_v2  ;;  %v153_v49 = vmul.f32 0.03125, %v126_v55  ;;  %650 = vmatmul.mubr.f32.vlgmr.msra.gmra.mxu1 %v316_v51 }
  0xb5   :  { %638 = vmatmul.mubr.f32.vlgmr.msra.gmra.mxu0 %v308_v50 }
  0xb6   :  { %v193_v56 = vsub.f32 %v161_v48, %v177_v46  ;;  %v185_v57 = vsub.f32 %v153_v49, %v169_v47 }
  0xb7   :  { %v144_v60 = vpop.xlane.xlu1 %143  ;;  %v128_v61 = vpop.xlane.xlu0 %127 }
  0xb8   :  { %v209_v62 = vmax.f32 %v193_v56, 0.0  ;;  %v201_v63 = vmax.f32 %v185_v57, 0.0  ;;  %v162_v4 = vmul.f32 0.03125, %v144_v60  ;;  %v154_v5 = vmul.f32 0.03125, %v128_v61 }
  0xb9   :  { %v702_v6 = vpop.eup %701 }
  0xba   :  { %v704_v14 = vpop.eup %703  ;;  %v225_v15 = vadd.f32 1e-05, %v209_v62  ;;  %v217_v16 = vadd.f32 1e-05, %v201_v63  ;;  %v194_v17 = vsub.f32 %v162_v4, %v178_v58  ;;  %v186_v1 = vsub.f32 %v154_v5, %v170_v59 }
  0xbb   :  { %v82_v52 = vpop.xlane.xlu1 %81  ;;  %v66_v53 = vpop.xlane.xlu0 %65  ;;  %v263_v18 = vmul.f32 %v704_v14, %v247_v13  ;;  %v271_v19 = vmul.f32 %v702_v6, %v255_v7  ;;  %v257_v14 = vsub.f32 %v832_v21, %v980_v38  ;;  %v250_v21 = vsub.f32 %v855_v26, %v986_v43 }
  0xbc   :  { %709 = vrsqrt.f32 %v225_v15  ;;  %v210_v20 = vmax.f32 %v194_v17, 0.0  ;;  %v202_v23 = vmax.f32 %v186_v1, 0.0  ;;  %v1012_v2 = vmul.f32 0.03125, %v82_v52 }
  0xbd   :  { %v706_v24 = vpop.eup %705  ;;  %711 = vrsqrt.f32 %v217_v16  ;;  %v286_v27 = vmul.f32 %v965_v12, %v263_v18  ;;  %v294_v8 = vmul.f32 %v965_v12, %v271_v19  ;;  %v1014_v55 = vmul.f32 0.03125, %v66_v53 }
  0xbe   :  { %v708_v32 = vpop.eup %707  ;;  %v226_v33 = vadd.f32 1e-05, %v210_v20  ;;  %v218_v28 = vadd.f32 1e-05, %v202_v23  ;;  %v272_v11 = vmul.f32 %v706_v24, %v256_v29  ;;  %v179_v48 = vmul.f32 %v1012_v2, %v1012_v2 }
  0xbf   :  { %v84_v30 = vpop.xlane.xlu1 %83  ;;  %v68_v31 = vpop.xlane.xlu0 %67  ;;  %v309_v42 = vadd.f32 %v970_v3, %v286_v27  ;;  %v317_v0 = vadd.f32 %v970_v3, %v294_v8  ;;  %v264_v44 = vmul.f32 %v708_v32, %v248_v9  ;;  %v171_v49 = vmul.f32 %v1014_v55, %v1014_v55 }
  0xc0   :  { %713 = vrsqrt.f32 %v226_v33  ;;  %v1016_v37 = vmul.f32 0.03125, %v84_v30  ;;  %v1018_v45 = vmul.f32 0.03125, %v68_v31  ;;  %v295_v47 = vmul.f32 %v965_v12, %v272_v11 }
  0xc1   :  { %715 = vrsqrt.f32 %v218_v28  ;;  %640 = vmatprep.mubr.f32.mxu0 %v309_v42  ;;  %652 = vmatprep.mubr.f32.mxu1 %v317_v0  ;;  %v287_v46 = vmul.f32 %v965_v12, %v264_v44  ;;  %v249_v15 = vsub.f32 %v837_v22, %v982_v41  ;;  %v258_v20 = vsub.f32 %v850_v25, %v984_v54 }
  0xc2   :  { %v318_v57 = vadd.f32 %v970_v3, %v295_v47  ;;  %v180_v60 = vmul.f32 %v1016_v37, %v1016_v37  ;;  %v172_v61 = vmul.f32 %v1018_v45, %v1018_v45  ;;  %v259_v30 = vsub.f32 %v882_v35, %v1012_v2 }
  0xc3   :  { %v146_v10 = vpop.xlane.xlu1 %145  ;;  %v130_v34 = vpop.xlane.xlu0 %129  ;;  %v310_v56 = vadd.f32 %v970_v3, %v287_v46  ;;  %v251_v42 = vsub.f32 %v887_v36, %v1014_v55  ;;  %v252_v47 = vsub.f32 %v905_v40, %v1018_v45 }
  0xc4   :  { %v163_v50 = vmul.f32 0.03125, %v146_v10  ;;  %v155_v51 = vmul.f32 0.03125, %v130_v34  ;;  %653 = vmatmul.mubr.f32.gmra.mxu1 %v318_v57  ;;  %v260_v10 = vsub.f32 %v900_v39, %v1016_v37 }
  0xc5   :  { %641 = vmatmul.mubr.f32.gmra.mxu0 %v310_v56 }
  0xc6   :  { %v195_v58 = vsub.f32 %v163_v50, %v179_v48  ;;  %v187_v59 = vsub.f32 %v155_v51, %v171_v49 }
  0xc7   :  { %v148_v62 = vpop.xlane.xlu1 %147  ;;  %v132_v63 = vpop.xlane.xlu0 %131 }
  0xc8   :  { %v211_v4 = vmax.f32 %v195_v58, 0.0  ;;  %v203_v5 = vmax.f32 %v187_v59, 0.0  ;;  %v164_v6 = vmul.f32 0.03125, %v148_v62  ;;  %v156_v7 = vmul.f32 0.03125, %v132_v63 }
  0xc9   :  { %v710_v13 = vpop.eup %709 }
  0xca   :  { %v712_v16 = vpop.eup %711  ;;  %v227_v17 = vadd.f32 1e-05, %v211_v4  ;;  %v219_v1 = vadd.f32 1e-05, %v203_v5  ;;  %v196_v52 = vsub.f32 %v164_v6, %v180_v60  ;;  %v188_v53 = vsub.f32 %v156_v7, %v172_v61 }
  0xcb   :  { %v265_v18 = vmul.f32 %v712_v16, %v249_v15  ;;  %v273_v19 = vmul.f32 %v710_v13, %v257_v14 }
  0xcc   :  { %717 = vrsqrt.f32 %v227_v17  ;;  %v212_v23 = vmax.f32 %v196_v52, 0.0  ;;  %v204_v24 = vmax.f32 %v188_v53, 0.0 }
  0xcd   :  { %v714_v27 = vpop.eup %713  ;;  %719 = vrsqrt.f32 %v219_v1  ;;  %v288_v22 = vmul.f32 %v965_v12, %v265_v18  ;;  %v296_v38 = vmul.f32 %v965_v12, %v273_v19 }
  0xce   :  { %v716_v41 = vpop.eup %715  ;;  %v228_v8 = vadd.f32 1e-05, %v212_v23  ;;  %v220_v32 = vadd.f32 1e-05, %v204_v24  ;;  %v274_v9 = vmul.f32 %v714_v27, %v258_v20 }
  0xcf   :  { %v311_v33 = vadd.f32 %v970_v3, %v288_v22  ;;  %v319_v25 = vadd.f32 %v970_v3, %v296_v38  ;;  %v266_v54 = vmul.f32 %v716_v41, %v250_v21 }
  0xd0   :  { %721 = vrsqrt.f32 %v228_v8  ;;  %v297_v28 = vmul.f32 %v965_v12, %v274_v9 }
  0xd1   :  { %723 = vrsqrt.f32 %v220_v32  ;;  %643 = vmatprep.mubr.f32.mxu0 %v311_v33  ;;  %655 = vmatprep.mubr.f32.mxu1 %v319_v25  ;;  %v289_v26 = vmul.f32 %v965_v12, %v266_v54 }
  0xd2   :  { %v320_v43 = vadd.f32 %v970_v3, %v297_v28 }
  0xd3   :  { %v312_v29 = vadd.f32 %v970_v3, %v289_v26 }
  0xd4   :  { %656 = vmatmul.mubr.f32.gmra.mxu1 %v320_v43 }
  0xd5   :  { %644 = vmatmul.mubr.f32.gmra.mxu0 %v312_v29 }
  0xd9   :  { %v718_v31 = vpop.eup %717 }
  0xda   :  { %v720_v0 = vpop.eup %719  ;;  %v275_v44 = vmul.f32 %v718_v31, %v259_v30 }
  0xdb   :  { %v267_v11 = vmul.f32 %v720_v0, %v251_v42 }
  0xdc   :  { %v298_v34 = vmul.f32 %v965_v12, %v275_v44 }
  0xdd   :  { %v722_v46 = vpop.eup %721  ;;  %v290_v48 = vmul.f32 %v965_v12, %v267_v11 }
  0xde   :  { %v724_v49 = vpop.eup %723  ;;  %v321_v35 = vadd.f32 %v970_v3, %v298_v34  ;;  %v276_v2 = vmul.f32 %v722_v46, %v260_v10 }
  0xdf   :  { %v313_v36 = vadd.f32 %v970_v3, %v290_v48  ;;  %v268_v55 = vmul.f32 %v724_v49, %v252_v47 }
  0xe0   :  { %658 = vmatprep.mubr.f32.mxu1 %v321_v35  ;;  %v299_v50 = vmul.f32 %v965_v12, %v276_v2 }
  0xe1   :  { %646 = vmatprep.mubr.f32.mxu0 %v313_v36  ;;  %v291_v39 = vmul.f32 %v965_v12, %v268_v55 }
  0xe2   :  { %v322_v37 = vadd.f32 %v970_v3, %v299_v50 }
  0xe3   :  { %v314_v51 = vadd.f32 %v970_v3, %v291_v39 }
  0xe4   :  { %659 = vmatmul.mubr.f32.gmra.mxu1 %v322_v37 }
  0xe5   :  { %647 = vmatmul.mubr.f32.gmra.mxu0 %v314_v51 }
 0x174   :  { %v651_v45 = vpop.f32.mrf.mxu1 }
 0x175   :  { %v639_v40 = vpop.f32.mrf.mxu0  ;;  %560 = vst [vmem:[%s1116_s4 + $0x48] sm:$0xff] %v651_v45 }
 0x176   :  { %552 = vst [vmem:[%s1116_s4 + $0x8] sm:$0xff] %v639_v40  ;;  %v461_v57 = vpop.f32.mrf.mxu1 }
 0x177   :  { %v421_v56 = vpop.f32.mrf.mxu0  ;;  %559 = vst [vmem:[%s1116_s4 + $0x40] sm:$0xff] %v461_v57 }
 0x178   :  { %551 = vst [vmem:[%s1116_s4] sm:$0xff] %v421_v56 }
 0x184   :  { %v654_v3 = vpop.f32.mrf.mxu1 }
 0x185   :  { %v642_v12 = vpop.f32.mrf.mxu0  ;;  %562 = vst [vmem:[%s1116_s4 + $0x58] sm:$0xff] %v654_v3 }
 0x186   :  { %554 = vst [vmem:[%s1116_s4 + $0x18] sm:$0xff] %v642_v12  ;;  %v471_v59 = vpop.f32.mrf.mxu1 }
 0x187   :  { %v431_v58 = vpop.f32.mrf.mxu0  ;;  %561 = vst [vmem:[%s1116_s4 + $0x50] sm:$0xff] %v471_v59 }
 0x188   :  { %553 = vst [vmem:[%s1116_s4 + $0x10] sm:$0xff] %v431_v58 }
 0x194   :  { %v657_v60 = vpop.f32.mrf.mxu1 }
 0x195   :  { %v645_v61 = vpop.f32.mrf.mxu0  ;;  %564 = vst [vmem:[%s1116_s4 + $0x68] sm:$0xff] %v657_v60 }
 0x196   :  { %556 = vst [vmem:[%s1116_s4 + $0x28] sm:$0xff] %v645_v61  ;;  %v481_v62 = vpop.f32.mrf.mxu1 }
 0x197   :  { %v441_v63 = vpop.f32.mrf.mxu0  ;;  %563 = vst [vmem:[%s1116_s4 + $0x60] sm:$0xff] %v481_v62 }
 0x198   :  { %555 = vst [vmem:[%s1116_s4 + $0x20] sm:$0xff] %v441_v63 }
 0x1a4   :  { %v660_v4 = vpop.f32.mrf.mxu1 }
 0x1a5   :  { %v648_v5 = vpop.f32.mrf.mxu0  ;;  %566 = vst [vmem:[%s1116_s4 + $0x78] sm:$0xff] %v660_v4 }
 0x1a6   :  { %558 = vst [vmem:[%s1116_s4 + $0x38] sm:$0xff] %v648_v5  ;;  %v491_v6 = vpop.f32.mrf.mxu1 }
 0x1a7   :  { %v451_v7 = vpop.f32.mrf.mxu0  ;;  %565 = vst [vmem:[%s1116_s4 + $0x70] sm:$0xff] %v491_v6 }
 0x1a8   :  { %557 = vst [vmem:[%s1116_s4 + $0x30] sm:$0xff] %v451_v7 }

// kernel: _forward.8
= control target key start
LH: loop header
LB: loop body
LE: loop exit
PB: predicated region body
PF: predicated region fallthrough
CT: control target
= control target key end

     0   :  { %s2810_s9 = smov 0   ;;  %s3666_s0 = inlined_call_operand.vmem [shape: f32[2,64,32], index: 0, kind: input, shape index: {}]   ;;  %s3667_s1 = inlined_call_operand.vmem [shape: f32[2,64,64], index: 1, kind: input, shape index: {}]   ;;  %s3668_s2 = inlined_call_operand.vmem [shape: f32[2,64,32], index: 2, kind: output, shape index: {}]  }
   0x1 LB: > { %s2159_s10 = sadd.s32 4294967295, %s2783_s9   ;;  %p2163_p0 = scmp.ge.s32.totalorder %s2783_s9, 1  ;;  %s2783_s9 = sphi %s2810_s9, %s12_s9  }
   0x2   : > { %p122_p1 = scmp.lt.s32.totalorder %s2783_s9, 3 }
   0x4   : > { %p123_p2 = pnand %p2163_p0, %p122_p1 }
   0x6   : > { %126 = sbr.rel (%p123_p2) target bundleno = 2639 (0xa4f), region = 28 }
   0xb   : > { %p149_p3 = scmp.lt.s32.totalorder %s2159_s10, 1  ;;  %vm207_vm0 = vcmask 64512   ;;  %s2785_s18 = smov 96   ;;  %v188_v33 = vlaneseq  ;;  %vm369_vm2 = vcmask 523264   ;;  %vm2065_vm10 = vcmask 130048  }
   0xc   : > { %s2786_s19 = smov 120   ;;  %s2787_s20 = smov 88   ;;  %vm2074_vm11 = vcmask 195584   ;;  %vm2083_vm12 = vcmask 261120  }
   0xd   : > { %s3680_s10 = smov (!%p149_p3, %s2159_s10), 1  ;;  %v2944_v34 = vshrl.u32 %v188_v33, 7  ;;  %v2949_v36 = vand.u32 127, %v188_v33  ;;  %s2788_s21 = smov 112  }
   0xe   : > { %s2818_s11 = sshll.u32 %s3680_s10, 6  ;;  %s2789_s22 = smov 80  }
   0xf   : > { %s2824_s14 = scalar_lea.vmem %s3667_s1, %s2818_s11  ;;  %s2830_s17 = scalar_lea.vmem %s3666_s0, %s2818_s11  ;;  %v2947_v35 = vadd.s32 8, %v2944_v34  ;;  %v2954_v37 = vadd.s32 24, %v2944_v34  ;;  %vm199_vm3 = vcmp.gt.s32.totalorder %v2949_v36, %v2944_v34  ;;  %v2959_v39 = vadd.s32 16, %v2944_v34 }
  0x10   : > { %v2833_v0 = vld [vmem:[%s2824_s14 + $0x38] sm:$0xff]  ;;  %v2836_v1 = vld [vmem:[%s2824_s14 + $0x30] sm:$0xff]  ;;  %v164_v2 = vld [vmem:[%s2830_s17] sm:$0xff]  ;;  %v2968_v43 = vadd.s32 40, %v2944_v34  ;;  %v2976_v46 = vadd.s32 32, %v2944_v34  ;;  %v2986_v51 = vadd.s32 56, %v2944_v34  ;;  %s3615_s30 = scalar_lea.vmem %s3668_s2, %s2818_s11 }
  0x11   : > { %2399 = vmatprep.subr.msk.mxu0 %vm207_vm0, %v2833_v0  ;;  %496 = vrot.lane.b32.xlu0 %v2833_v0, %s2785_s18  ;;  %v2847_v3 = vmul.f32 0.35355338, %v164_v2  ;;  %v2850_v4 = vld [vmem:[%s2824_s14 + $0x28] sm:$0xff]  ;;  %v2853_v5 = vld [vmem:[%s2824_s14 + $0x18] sm:$0xff]  ;;  %v2864_v6 = vld [vmem:[%s2824_s14 + $0x20] sm:$0xff]  ;;  %vm200_vm1 = vcmp.gt.s32.totalorder %v2949_v36, %v2947_v35  ;;  %vm202_vm4 = vcmp.gt.s32.totalorder %v2949_v36, %v2954_v37  ;;  %vm201_vm5 = vcmp.gt.s32.totalorder %v2949_v36, %v2959_v39  ;;  %s2790_s23 = smov 104  }
  0x12   : > { %2400 = vmatpush3.xpose.msk.msra.mxu0 %vm207_vm0, %v2833_v0  ;;  %494 = vrot.lane.b32.xlu1 %v2836_v1, %s2785_s18  ;;  %v2867_v7 = vld [vmem:[%s2824_s14 + $0x8] sm:$0xff]  ;;  %v2876_v8 = vld [vmem:[%s2824_s14 + $0x10] sm:$0xff]  ;;  %v2879_v9 = vld [vmem:[%s2824_s14] sm:$0xff]  ;;  %vm204_vm6 = vcmp.gt.s32.totalorder %v2949_v36, %v2968_v43  ;;  %vm203_vm7 = vcmp.gt.s32.totalorder %v2949_v36, %v2976_v46  ;;  %v2995_v55 = vadd.s32 48, %v2944_v34  ;;  %vm206_vm8 = vcmp.gt.s32.totalorder %v2949_v36, %v2986_v51  ;;  %s2791_s24 = smov 72   ;;  %s2792_s25 = smov 8  }
  0x13   : > { %2401 = vmatprep.subr.msk.mxu0 %vm207_vm0, %v2836_v1  ;;  %2415 = vmatprep.mubr.msk.f32.mxu0 %vm207_vm0, %v2847_v3  ;;  %v165_v10 = vld [vmem:[%s2830_s17 + $0x8] sm:$0xff]  ;;  %v166_v11 = vld [vmem:[%s2830_s17 + $0x10] sm:$0xff]  ;;  %v167_v14 = vld [vmem:[%s2830_s17 + $0x18] sm:$0xff]  ;;  %s2793_s26 = smov 16   ;;  %s2794_s27 = smov 24  }
  0x14   : > { %v2905_v12 = vmul.f32 0.35355338, %v165_v10  ;;  %v2909_v13 = vmul.f32 0.35355338, %v166_v11  ;;  %v168_v15 = vld [vmem:[%s2830_s17 + $0x20] sm:$0xff]  ;;  %v169_v18 = vld [vmem:[%s2830_s17 + $0x28] sm:$0xff]  ;;  %vm205_vm9 = vcmp.gt.s32.totalorder %v2949_v36, %v2995_v55 }
  0x15   : > { %492 = vrot.lane.b32.xlu0 %v2850_v4, %s2785_s18  ;;  %v2915_v16 = vmul.f32 0.35355338, %v167_v14  ;;  %v2919_v17 = vmul.f32 0.35355338, %v168_v15  ;;  %v170_v19 = vld [vmem:[%s2830_s17 + $0x30] sm:$0xff]  ;;  %v171_v22 = vld [vmem:[%s2830_s17 + $0x38] sm:$0xff] }
  0x16   : > { %2402 = vmatpush3.xpose.msk.msra.mxu0 %vm207_vm0, %v2836_v1  ;;  %488 = vrot.lane.b32.xlu1 %v2853_v5, %s2785_s18  ;;  %v2925_v20 = vmul.f32 0.35355338, %v169_v18  ;;  %v2929_v21 = vmul.f32 0.35355338, %v170_v19  ;;  %v2934_v23 = vmul.f32 0.35355338, %v171_v22 }
  0x17   : > { %2403 = vmatprep.subr.msk.mxu0 %vm207_vm0, %v2850_v4 }
  0x19   : > { %490 = vrot.lane.b32.xlu0 %v2864_v6, %s2785_s18 }
  0x1a   : > { %2404 = vmatpush3.xpose.msk.msra.mxu0 %vm207_vm0, %v2850_v4  ;;  %484 = vrot.lane.b32.xlu1 %v2867_v7, %s2785_s18 }
  0x1b   : > { %2405 = vmatprep.subr.msk.mxu0 %vm207_vm0, %v2864_v6 }
  0x1d   : > { %486 = vrot.lane.b32.xlu0 %v2876_v8, %s2785_s18 }
  0x1e   : > { %2406 = vmatpush3.xpose.msk.msra.mxu0 %vm207_vm0, %v2864_v6  ;;  %482 = vrot.lane.b32.xlu1 %v2879_v9, %s2785_s18 }
  0x1f   : > { %2407 = vmatprep.subr.msk.mxu0 %vm207_vm0, %v2853_v5 }
  0x21   : > { %665 = vrot.lane.b32.xlu0 %v2833_v0, %s2786_s19 }
  0x22   : > { %2408 = vmatpush3.xpose.msk.msra.mxu0 %vm207_vm0, %v2853_v5  ;;  %663 = vrot.lane.b32.xlu1 %v2836_v1, %s2786_s19 }
  0x23   : > { %2409 = vmatprep.subr.msk.mxu0 %vm207_vm0, %v2876_v8 }
  0x26   : > { %2410 = vmatpush3.xpose.msk.msra.mxu0 %vm207_vm0, %v2876_v8 }
  0x27   : > { %2411 = vmatprep.subr.msk.mxu0 %vm207_vm0, %v2867_v7 }
  0x2a   : > { %2412 = vmatpush3.xpose.msk.msra.mxu0 %vm207_vm0, %v2867_v7 }
  0x2b   : > { %2413 = vmatprep.subr.msk.mxu0 %vm207_vm0, %v2879_v9 }
  0x2e   : > { %2414 = vmatpush3.xpose.msk.msra.mxu0 %vm207_vm0, %v2879_v9 }
  0x31   : > { %2416 = vmatmul.mubr.msk.f32.vlgmr.msra.gmra.mxu0 %vm207_vm0, %v2905_v12 }
  0x32   : > { %2418 = vmatprep.mubr.msk.f32.mxu0 %vm207_vm0, %v2909_v13 }
  0x35   : > { %2419 = vmatmul.mubr.msk.f32.gmra.mxu0 %vm207_vm0, %v2915_v16 }
  0x36   : > { %2421 = vmatprep.mubr.msk.f32.mxu0 %vm207_vm0, %v2919_v17 }
  0x39   : > { %2422 = vmatmul.mubr.msk.f32.gmra.mxu0 %vm207_vm0, %v2925_v20 }
  0x3a   : > { %2424 = vmatprep.mubr.msk.f32.mxu0 %vm207_vm0, %v2929_v21 }
  0x3d   : > { %2425 = vmatmul.mubr.msk.f32.gmra.mxu0 %vm207_vm0, %v2934_v23 }
  0x83   : > { %v497_v24 = vpop.permute.xlu0 %496 }
  0x84   : > { %v495_v25 = vpop.permute.xlu1 %494  ;;  %2427 = vmatprep.subr.mxu1 %v497_v24 }
  0x85   : > { %2428 = vmatpush3.msra.mxu1 %v497_v24 }
  0x86   : > { %2429 = vmatprep.subr.mxu1 %v495_v25 }
  0x87   : > { %v493_v26 = vpop.permute.xlu0 %492  ;;  %2430 = vmatpush3.msra.mxu1 %v495_v25 }
  0x88   : > { %v489_v27 = vpop.permute.xlu1 %488  ;;  %2431 = vmatprep.subr.mxu1 %v493_v26 }
  0x89   : > { %2432 = vmatpush3.msra.mxu1 %v493_v26 }
  0x8b   : > { %v491_v28 = vpop.permute.xlu0 %490 }
  0x8c   : > { %v485_v29 = vpop.permute.xlu1 %484  ;;  %2433 = vmatprep.subr.mxu1 %v491_v28 }
  0x8d   : > { %2434 = vmatpush3.msra.mxu1 %v491_v28 }
  0x8e   : > { %2435 = vmatprep.subr.mxu1 %v489_v27 }
  0x8f   : > { %2436 = vmatpush3.msra.mxu1 %v489_v27  ;;  %v487_v30 = vpop.permute.xlu0 %486 }
  0x90   : > { %2437 = vmatprep.subr.mxu1 %v487_v30  ;;  %v483_v31 = vpop.permute.xlu1 %482 }
  0x91   : > { %2438 = vmatpush3.msra.mxu1 %v487_v30 }
  0x92   : > { %2439 = vmatprep.subr.mxu1 %v485_v29 }
  0x93   : > { %2440 = vmatpush3.msra.mxu1 %v485_v29  ;;  %v2940_v32 = vpop.permute.xlu0 %665 }
  0x94   : > { %2441 = vmatprep.subr.mxu1 %v483_v31  ;;  %v3029_v29 = vpop.permute.xlu1 %663 }
  0x95   : > { %2442 = vmatpush3.msra.mxu1 %v483_v31 }
  0x96   : > { %2455 = vmatprep.subr.msk.mxu1 %vm207_vm0, %v2940_v32 }
  0xf1   : > { %v2417_v38 = vpop.f32.mrf.mxu0 }
  0xf2   : > { %v362_v40 = vsel %vm200_vm1, -1e+09, %v2417_v38 }
  0xf3   : > { %v322_v41 = vpop.f32.mrf.mxu0  ;;  %v373_v42 = vsel %vm369_vm2, %v362_v40, -inf }
  0xf4   : > { %v361_v44 = vsel %vm199_vm3, -1e+09, %v322_v41  ;;  %374 = vmax.xlane.f32.xlu0 %v373_v42 }
  0xf5   : > { %v2420_v45 = vpop.f32.mrf.mxu0  ;;  %v370_v49 = vsel %vm369_vm2, %v361_v44, -inf }
  0xf6   : > { %v364_v47 = vsel %vm202_vm4, -1e+09, %v2420_v45 }
  0xf7   : > { %v332_v48 = vpop.f32.mrf.mxu0  ;;  %v379_v50 = vsel %vm369_vm2, %v364_v47, -inf }
  0xf8   : > { %v363_v52 = vsel %vm201_vm5, -1e+09, %v332_v48  ;;  %371 = vmax.xlane.f32.xlu0 %v370_v49  ;;  %380 = vmax.xlane.f32.xlu1 %v379_v50 }
  0xf9   : > { %v2423_v53 = vpop.f32.mrf.mxu0  ;;  %v376_v54 = vsel %vm369_vm2, %v363_v52, -inf }
  0xfa   : > { %v366_v56 = vsel %vm204_vm6, -1e+09, %v2423_v53 }
  0xfb   : > { %v342_v57 = vpop.f32.mrf.mxu0  ;;  %v385_v61 = vsel %vm369_vm2, %v366_v56, -inf }
  0xfc   : > { %v365_v58 = vsel %vm203_vm7, -1e+09, %v342_v57  ;;  %377 = vmax.xlane.f32.xlu1 %v376_v54 }
  0xfd   : > { %v2426_v59 = vpop.f32.mrf.mxu0  ;;  %v382_v60 = vsel %vm369_vm2, %v365_v58, -inf }
  0xfe   : > { %v368_v62 = vsel %vm206_vm8, -1e+09, %v2426_v59  ;;  %383 = vmax.xlane.f32.xlu0 %v382_v60 }
  0xff   : > { %v352_v63 = vpop.f32.mrf.mxu0  ;;  %v391_v11 = vsel %vm369_vm2, %v368_v62, -inf }
 0x100   : > { %v367_v2 = vsel %vm205_vm9, -1e+09, %v352_v63  ;;  %386 = vmax.xlane.f32.xlu1 %v385_v61 }
 0x101   : > { %v388_v10 = vsel %vm369_vm2, %v367_v2, -inf }
 0x102   : > { %389 = vmax.xlane.f32.xlu0 %v388_v10 }
 0x104   : > { %392 = vmax.xlane.f32.xlu1 %v391_v11 }
 0x115   : > { %659 = vrot.lane.b32.xlu1 %v2864_v6, %s2786_s19 }
 0x118   : > { %661 = vrot.lane.b32.xlu0 %v2850_v4, %s2786_s19 }
 0x17d   : > { %v375_v14 = vpop.xlane.xlu0 %374 }
 0x17e   : > { %v395_v15 = vsub.f32 %v362_v40, %v375_v14 }
 0x180   : > { %v404_v18 = vmul.f32 1.442695, %v395_v15 }
 0x181   : > { %v372_v19 = vpop.xlane.xlu0 %371  ;;  %v381_v30 = vpop.xlane.xlu1 %380 }
 0x182   : > { %2641 = vpow2.f32 %v404_v18  ;;  %v394_v22 = vsub.f32 %v361_v44, %v372_v19  ;;  %v397_v38 = vsub.f32 %v364_v47, %v381_v30 }
 0x184   : > { %v402_v24 = vmul.f32 1.442695, %v394_v22  ;;  %v408_v42 = vmul.f32 1.442695, %v397_v38 }
 0x185   : > { %v378_v31 = vpop.xlane.xlu1 %377 }
 0x186   : > { %2643 = vpow2.f32 %v402_v24  ;;  %v396_v40 = vsub.f32 %v363_v52, %v378_v31 }
 0x187   : > { %v384_v41 = vpop.xlane.xlu0 %383  ;;  %2645 = vpow2.f32 %v408_v42 }
 0x188   : > { %v406_v48 = vmul.f32 1.442695, %v396_v40  ;;  %v398_v49 = vsub.f32 %v365_v58, %v384_v41 }
 0x189   : > { %v387_v33 = vpop.xlane.xlu1 %386 }
 0x18a   : > { %v399_v44 = vsub.f32 %v366_v56, %v387_v33  ;;  %2647 = vpow2.f32 %v406_v48  ;;  %v410_v57 = vmul.f32 1.442695, %v398_v49 }
 0x18b   : > { %v390_v54 = vpop.xlane.xlu0 %389 }
 0x18c   : > { %v412_v50 = vmul.f32 1.442695, %v399_v44  ;;  %v400_v59 = vsub.f32 %v367_v2, %v390_v54 }
 0x18d   : > { %v393_v45 = vpop.xlane.xlu1 %392 }
 0x18e   : > { %v401_v53 = vsub.f32 %v368_v62, %v393_v45  ;;  %2649 = vpow2.f32 %v412_v50  ;;  %v414_v61 = vmul.f32 1.442695, %v400_v59 }
 0x18f   : > { %v3021_v25 = vpop.eup %2641  ;;  %2651 = vpow2.f32 %v410_v57  ;;  %v662_v22 = vpop.permute.xlu0 %661 }
 0x190   : > { %v421_v26 = vsel %vm369_vm2, %v3021_v25, 0.0  ;;  %v416_v60 = vmul.f32 1.442695, %v401_v53 }
 0x191   : > { %422 = vadd.xlane.f32.xlu1 %v421_v26  ;;  %v660_v19 = vpop.permute.xlu1 %659 }
 0x192   : > { %2653 = vpow2.f32 %v416_v60 }
 0x193   : > { %v3025_v27 = vpop.eup %2643  ;;  %2655 = vpow2.f32 %v414_v61 }
 0x194   : > { %v418_v28 = vsel %vm369_vm2, %v3025_v27, 0.0  ;;  %v3035_v47 = vpop.eup %2645 }
 0x195   : > { %419 = vadd.xlane.f32.xlu0 %v418_v28  ;;  %v427_v56 = vsel %vm369_vm2, %v3035_v47, 0.0 }
 0x197   : > { %v3037_v52 = vpop.eup %2647 }
 0x198   : > { %v424_v63 = vsel %vm369_vm2, %v3037_v52, 0.0 }
 0x19b   : > { %v3041_v58 = vpop.eup %2649 }
 0x19c   : > { %v3043_v62 = vpop.eup %2651  ;;  %v433_v2 = vsel %vm369_vm2, %v3041_v58, 0.0 }
 0x19d   : > { %v430_v11 = vsel %vm369_vm2, %v3043_v62, 0.0 }
 0x19f   : > { %v3049_v10 = vpop.eup %2653 }
 0x1a0   : > { %v439_v14 = vsel %vm369_vm2, %v3049_v10, 0.0  ;;  %v3055_v15 = vpop.eup %2655 }
 0x1a1   : > { %v436_v18 = vsel %vm369_vm2, %v3055_v15, 0.0 }
 0x1a2   : > { %655 = vrot.lane.b32.xlu1 %v2876_v8, %s2786_s19 }
 0x1ab   : > { %657 = vrot.lane.b32.xlu0 %v2853_v5, %s2786_s19 }
 0x1c6   : > { %428 = vadd.xlane.f32.xlu1 %v427_v56 }
 0x1ca   : > { %425 = vadd.xlane.f32.xlu1 %v424_v63  ;;  %434 = vadd.xlane.f32.xlu0 %v433_v2 }
 0x1ce   : > { %431 = vadd.xlane.f32.xlu1 %v430_v11  ;;  %440 = vadd.xlane.f32.xlu0 %v439_v14 }
 0x1d2   : > { %437 = vadd.xlane.f32.xlu1 %v436_v18 }
 0x1e3   : > { %651 = vrot.lane.b32.xlu1 %v2879_v9, %s2786_s19 }
 0x1e4   : > { %653 = vrot.lane.b32.xlu0 %v2867_v7, %s2786_s19 }
 0x1e7   : > { %637 = vrot.lane.b32.xlu1 %v2905_v12, %s2786_s19 }
 0x1e8   : > { %635 = vrot.lane.b32.xlu0 %v2847_v3, %s2786_s19 }
 0x1eb   : > { %641 = vrot.lane.b32.xlu1 %v2915_v16, %s2786_s19 }
 0x1ec   : > { %639 = vrot.lane.b32.xlu0 %v2909_v13, %s2786_s19 }
 0x1ef   : > { %645 = vrot.lane.b32.xlu1 %v2925_v20, %s2786_s19 }
 0x1f0   : > { %643 = vrot.lane.b32.xlu0 %v2919_v17, %s2786_s19 }
 0x1f3   : > { %649 = vrot.lane.b32.xlu1 %v2934_v23, %s2786_s19 }
 0x1f4   : > { %647 = vrot.lane.b32.xlu0 %v2929_v21, %s2786_s19 }
 0x1f7   : > { %936 = vrot.lane.b32.xlu1 %v2836_v1, %s2787_s20 }
 0x1f8   : > { %938 = vrot.lane.b32.xlu0 %v2833_v0, %s2787_s20 }
 0x1fb   : > { %930 = vrot.lane.b32.xlu1 %v2853_v5, %s2787_s20 }
 0x1fc   : > { %934 = vrot.lane.b32.xlu0 %v2850_v4, %s2787_s20 }
 0x1ff   : > { %926 = vrot.lane.b32.xlu1 %v2867_v7, %s2787_s20 }
 0x200   : > { %932 = vrot.lane.b32.xlu0 %v2864_v6, %s2787_s20 }
 0x203   : > { %924 = vrot.lane.b32.xlu1 %v2879_v9, %s2787_s20 }
 0x204   : > { %928 = vrot.lane.b32.xlu0 %v2876_v8, %s2787_s20 }
 0x207   : > { %1105 = vrot.lane.b32.xlu1 %v2836_v1, %s2788_s21 }
 0x208   : > { %1107 = vrot.lane.b32.xlu0 %v2833_v0, %s2788_s21 }
 0x21a   : > { %v423_v24 = vpop.xlane.xlu1 %422 }
 0x21b   : > { %2657 = vrcp.f32 %v423_v24 }
 0x21e   : > { %v420_v26 = vpop.xlane.xlu0 %419 }
 0x21f   : > { %2659 = vrcp.f32 %v420_v26 }
 0x228   : > { %v2658_v28 = vpop.eup %2657 }
 0x229   : > { %v451_v30 = vmul.f32 %v2658_v28, %v423_v24 }
 0x22b   : > { %v459_v33 = vsub.f32 2.0, %v451_v30 }
 0x22c   : > { %v2660_v31 = vpop.eup %2659 }
 0x22d   : > { %v450_v38 = vmul.f32 %v2660_v31, %v420_v26  ;;  %v467_v41 = vmul.f32 %v2658_v28, %v459_v33 }
 0x22f   : > { %v458_v40 = vsub.f32 2.0, %v450_v38  ;;  %v475_v45 = vmul.f32 %v3021_v25, %v467_v41  ;;  %v658_v25 = vpop.permute.xlu0 %657 }
 0x231   : > { %v466_v42 = vmul.f32 %v2660_v31, %v458_v40 }
 0x233   : > { %v474_v44 = vmul.f32 %v3025_v27, %v466_v42  ;;  %v656_v27 = vpop.permute.xlu1 %655 }
 0x235   : > { %2443 = vmatprep.mubr.msk.f32.mxu1 %vm369_vm2, %v474_v44 }
 0x236   : > { %2444 = vmatmul.mubr.msk.f32.vlgmr.msra.gmra.mxu1 %vm369_vm2, %v475_v45 }
 0x237   : > { %2456 = vmatpush3.xpose.msk.msra.mxu1 %vm207_vm0, %v2940_v32 }
 0x238   : > { %2457 = vmatprep.subr.msk.mxu1 %vm207_vm0, %v3029_v29 }
 0x23b   : > { %2458 = vmatpush3.xpose.msk.msra.mxu1 %vm207_vm0, %v3029_v29 }
 0x23c   : > { %2459 = vmatprep.subr.msk.mxu1 %vm207_vm0, %v662_v22 }
 0x23f   : > { %2460 = vmatpush3.xpose.msk.msra.mxu1 %vm207_vm0, %v662_v22 }
 0x240   : > { %2461 = vmatprep.subr.msk.mxu1 %vm207_vm0, %v660_v19 }
 0x243   : > { %2462 = vmatpush3.xpose.msk.msra.mxu1 %vm207_vm0, %v660_v19 }
 0x244   : > { %2463 = vmatprep.subr.msk.mxu1 %vm207_vm0, %v658_v25 }
 0x247   : > { %2464 = vmatpush3.xpose.msk.msra.mxu1 %vm207_vm0, %v658_v25 }
 0x248   : > { %2465 = vmatprep.subr.msk.mxu1 %vm207_vm0, %v656_v27 }
 0x24b   : > { %2466 = vmatpush3.xpose.msk.msra.mxu1 %vm207_vm0, %v656_v27 }
 0x24f   : > { %v429_v32 = vpop.xlane.xlu1 %428 }
 0x250   : > { %2661 = vrcp.f32 %v429_v32 }
 0x253   : > { %v426_v29 = vpop.xlane.xlu1 %425  ;;  %v435_v48 = vpop.xlane.xlu0 %434 }
 0x254   : > { %2663 = vrcp.f32 %v426_v29 }
 0x255   : > { %2665 = vrcp.f32 %v435_v48 }
 0x257   : > { %v432_v49 = vpop.xlane.xlu1 %431  ;;  %v441_v50 = vpop.xlane.xlu0 %440 }
 0x258   : > { %2667 = vrcp.f32 %v432_v49 }
 0x259   : > { %2669 = vrcp.f32 %v441_v50 }
 0x25b   : > { %v438_v53 = vpop.xlane.xlu1 %437  ;;  %v654_v54 = vpop.permute.xlu0 %653 }
 0x25c   : > { %2671 = vrcp.f32 %v438_v53  ;;  %2467 = vmatprep.subr.msk.mxu1 %vm207_vm0, %v654_v54 }
 0x25d   : > { %v2662_v57 = vpop.eup %2661  ;;  %2468 = vmatpush3.xpose.msk.msra.mxu1 %vm207_vm0, %v654_v54 }
 0x25e   : > { %v453_v59 = vmul.f32 %v2662_v57, %v429_v32 }
 0x25f   : > { %v652_v60 = vpop.permute.xlu1 %651  ;;  %v636_v25 = vpop.permute.xlu0 %635 }
 0x260   : > { %2469 = vmatprep.subr.msk.mxu1 %vm207_vm0, %v652_v60  ;;  %v461_v56 = vsub.f32 2.0, %v453_v59 }
 0x261   : > { %v2664_v61 = vpop.eup %2663  ;;  %2470 = vmatpush3.xpose.msk.msra.mxu1 %vm207_vm0, %v652_v60 }
 0x262   : > { %v2666_v63 = vpop.eup %2665  ;;  %v452_v2 = vmul.f32 %v2664_v61, %v426_v29  ;;  %v469_v19 = vmul.f32 %v2662_v57, %v461_v56 }
 0x263   : > { %v455_v11 = vmul.f32 %v2666_v63, %v435_v48 }
 0x264   : > { %v460_v14 = vsub.f32 2.0, %v452_v2  ;;  %v477_v42 = vmul.f32 %v3035_v47, %v469_v19 }
 0x265   : > { %v2668_v18 = vpop.eup %2667  ;;  %v463_v22 = vsub.f32 2.0, %v455_v11 }
 0x266   : > { %v2670_v24 = vpop.eup %2669  ;;  %v468_v26 = vmul.f32 %v2664_v61, %v460_v14  ;;  %v454_v28 = vmul.f32 %v2668_v18, %v432_v49 }
 0x267   : > { %v457_v30 = vmul.f32 %v2670_v24, %v441_v50  ;;  %v471_v40 = vmul.f32 %v2666_v63, %v463_v22 }
 0x268   : > { %v462_v31 = vsub.f32 2.0, %v454_v28  ;;  %v476_v33 = vmul.f32 %v3037_v52, %v468_v26  ;;  %v638_v52 = vpop.permute.xlu1 %637 }
 0x269   : > { %v2672_v38 = vpop.eup %2671  ;;  %v465_v41 = vsub.f32 2.0, %v457_v30  ;;  %v479_v48 = vmul.f32 %v3041_v58, %v471_v40 }
 0x26a   : > { %v470_v44 = vmul.f32 %v2668_v18, %v462_v31  ;;  %v456_v45 = vmul.f32 %v2672_v38, %v438_v53  ;;  %2446 = vmatprep.mubr.msk.f32.mxu1 %vm369_vm2, %v476_v33  ;;  %v640_v53 = vpop.permute.xlu0 %639 }
 0x26b   : > { %2447 = vmatmul.mubr.msk.f32.gmra.mxu1 %vm369_vm2, %v477_v42  ;;  %v473_v29 = vmul.f32 %v2670_v24, %v465_v41 }
 0x26c   : > { %v464_v27 = vsub.f32 2.0, %v456_v45  ;;  %v478_v32 = vmul.f32 %v3043_v62, %v470_v44  ;;  %v642_v62 = vpop.permute.xlu1 %641 }
 0x26d   : > { %v481_v50 = vmul.f32 %v3049_v10, %v473_v29 }
 0x26e   : > { %v472_v49 = vmul.f32 %v2672_v38, %v464_v27  ;;  %2449 = vmatprep.mubr.msk.f32.mxu1 %vm369_vm2, %v478_v32  ;;  %v644_v58 = vpop.permute.xlu0 %643 }
 0x26f   : > { %2450 = vmatmul.mubr.msk.f32.gmra.mxu1 %vm369_vm2, %v479_v48 }
 0x270   : > { %v480_v47 = vmul.f32 %v3055_v15, %v472_v49  ;;  %v646_v15 = vpop.permute.xlu1 %645 }
 0x272   : > { %2452 = vmatprep.mubr.msk.f32.mxu1 %vm369_vm2, %v480_v47  ;;  %v648_v10 = vpop.permute.xlu0 %647 }
 0x273   : > { %2453 = vmatmul.mubr.msk.f32.gmra.mxu1 %vm369_vm2, %v481_v50 }
 0x274   : > { %2471 = vmatprep.mubr.msk.f32.mxu1 %vm207_vm0, %v636_v25  ;;  %v650_v54 = vpop.permute.xlu1 %649 }
 0x276   : > { %v939_v57 = vpop.permute.xlu0 %938 }
 0x277   : > { %2472 = vmatmul.mubr.msk.f32.vlgmr.msra.gmra.mxu1 %vm207_vm0, %v638_v52  ;;  %2483 = vmatprep.subr.mxu0 %v939_v57 }
 0x278   : > { %2474 = vmatprep.mubr.msk.f32.mxu1 %vm207_vm0, %v640_v53  ;;  %v937_v59 = vpop.permute.xlu1 %936  ;;  %2484 = vmatpush3.msra.mxu0 %v939_v57 }
 0x279   : > { %2485 = vmatprep.subr.mxu0 %v937_v59 }
 0x27a   : > { %v935_v60 = vpop.permute.xlu0 %934  ;;  %2486 = vmatpush3.msra.mxu0 %v937_v59 }
 0x27b   : > { %2475 = vmatmul.mubr.msk.f32.gmra.mxu1 %vm207_vm0, %v642_v62  ;;  %2487 = vmatprep.subr.mxu0 %v935_v60 }
 0x27c   : > { %2477 = vmatprep.mubr.msk.f32.mxu1 %vm207_vm0, %v644_v58  ;;  %v931_v61 = vpop.permute.xlu1 %930  ;;  %2488 = vmatpush3.msra.mxu0 %v935_v60 }
 0x27e   : > { %v933_v56 = vpop.permute.xlu0 %932 }
 0x27f   : > { %2478 = vmatmul.mubr.msk.f32.gmra.mxu1 %vm207_vm0, %v646_v15  ;;  %2489 = vmatprep.subr.mxu0 %v933_v56 }
 0x280   : > { %2480 = vmatprep.mubr.msk.f32.mxu1 %vm207_vm0, %v648_v10  ;;  %v927_v63 = vpop.permute.xlu1 %926  ;;  %2490 = vmatpush3.msra.mxu0 %v933_v56 }
 0x281   : > { %2491 = vmatprep.subr.mxu0 %v931_v61 }
 0x282   : > { %2492 = vmatpush3.msra.mxu0 %v931_v61  ;;  %v929_v1 = vpop.permute.xlu0 %928 }
 0x283   : > { %2481 = vmatmul.mubr.msk.f32.gmra.mxu1 %vm207_vm0, %v650_v54  ;;  %2493 = vmatprep.subr.mxu0 %v929_v1 }
 0x284   : > { %2494 = vmatpush3.msra.mxu0 %v929_v1  ;;  %v925_v0 = vpop.permute.xlu1 %924 }
 0x285   : > { %2495 = vmatprep.subr.mxu0 %v927_v63 }
 0x286   : > { %2496 = vmatpush3.msra.mxu0 %v927_v63  ;;  %v3133_v2 = vpop.permute.xlu0 %1107 }
 0x287   : > { %2497 = vmatprep.subr.mxu0 %v925_v0 }
 0x288   : > { %2498 = vmatpush3.msra.mxu0 %v925_v0  ;;  %v3189_v57 = vpop.permute.xlu1 %1105 }
 0x289   : > { %2511 = vmatprep.subr.msk.mxu0 %vm207_vm0, %v3133_v2 }
 0x2f6   : > { %v3137_v11 = vpop.f32.mrf.mxu1 }
 0x2f8   : > { %v3139_v14 = vpop.f32.mrf.mxu1 }
 0x32b   : > { %v3141_v18 = vpop.f32.mrf.mxu1 }
 0x32d   : > { %v3143_v19 = vpop.f32.mrf.mxu1 }
 0x32e   : > { %3669 = vst [vmem:[#allocation2_spill] sm:$0xff] %v3143_v19 }
 0x32f   : > { %v3145_v22 = vpop.f32.mrf.mxu1 }
 0x330   : > { %3670 = vst [vmem:[#allocation3_spill] sm:$0xff] %v3145_v22 }
 0x331   : > { %v3147_v24 = vpop.f32.mrf.mxu1 }
 0x332   : > { %3671 = vst [vmem:[#allocation4_spill] sm:$0xff] %v3147_v24 }
 0x333   : > { %v3149_v26 = vpop.f32.mrf.mxu1 }
 0x334   : > { %3672 = vst [vmem:[#allocation5_spill] sm:$0xff] %v3149_v26 }
 0x335   : > { %v3151_v28 = vpop.f32.mrf.mxu1 }
 0x336   : > { %3673 = vst [vmem:[#allocation6_spill] sm:$0xff] %v3151_v28 }
 0x337   : > { %v2473_v30 = vpop.f32.mrf.mxu1 }
 0x338   : > { %v805_v31 = vsel %vm200_vm1, -1e+09, %v2473_v30 }
 0x339   : > { %v765_v33 = vpop.f32.mrf.mxu1  ;;  %v815_v38 = vsel %vm369_vm2, %v805_v31, -inf }
 0x33a   : > { %v804_v40 = vsel %vm199_vm3, -1e+09, %v765_v33  ;;  %816 = vmax.xlane.f32.xlu1 %v815_v38 }
 0x33b   : > { %v2476_v41 = vpop.f32.mrf.mxu1  ;;  %v812_v42 = vsel %vm369_vm2, %v804_v40, -inf }
 0x33c   : > { %v807_v44 = vsel %vm202_vm4, -1e+09, %v2476_v41  ;;  %813 = vmax.xlane.f32.xlu0 %v812_v42 }
 0x33d   : > { %v775_v45 = vpop.f32.mrf.mxu1  ;;  %v821_v25 = vsel %vm369_vm2, %v807_v44, -inf }
 0x33e   : > { %v806_v27 = vsel %vm201_vm5, -1e+09, %v775_v45 }
 0x33f   : > { %v2479_v32 = vpop.f32.mrf.mxu1  ;;  %v818_v52 = vsel %vm369_vm2, %v806_v27, -inf }
 0x340   : > { %v809_v29 = vsel %vm204_vm6, -1e+09, %v2479_v32  ;;  %822 = vmax.xlane.f32.xlu0 %v821_v25 }
 0x341   : > { %v785_v48 = vpop.f32.mrf.mxu1  ;;  %v827_v49 = vsel %vm369_vm2, %v809_v29, -inf }
 0x342   : > { %v808_v47 = vsel %vm203_vm7, -1e+09, %v785_v48  ;;  %828 = vmax.xlane.f32.xlu1 %v827_v49 }
 0x343   : > { %v2482_v50 = vpop.f32.mrf.mxu1  ;;  %v824_v58 = vsel %vm369_vm2, %v808_v47, -inf }
 0x344   : > { %v811_v53 = vsel %vm206_vm8, -1e+09, %v2482_v50  ;;  %819 = vmax.xlane.f32.xlu0 %v818_v52 }
 0x345   : > { %v833_v62 = vsel %vm369_vm2, %v811_v53, -inf  ;;  %v795_v15 = vpop.f32.mrf.mxu1 }
 0x346   : > { %834 = vmax.xlane.f32.xlu1 %v833_v62  ;;  %v810_v10 = vsel %vm205_vm9, -1e+09, %v795_v15 }
 0x347   : > { %v830_v54 = vsel %vm369_vm2, %v810_v10, -inf }
 0x348   : > { %825 = vmax.xlane.f32.xlu0 %v824_v58 }
 0x34c   : > { %831 = vmax.xlane.f32.xlu0 %v830_v54 }
 0x357   : > { %1101 = vrot.lane.b32.xlu1 %v2864_v6, %s2788_s21 }
 0x362   : > { %1103 = vrot.lane.b32.xlu0 %v2850_v4, %s2788_s21 }
 0x3c3   : > { %v817_v59 = vpop.xlane.xlu1 %816 }
 0x3c4   : > { %v837_v60 = vsub.f32 %v805_v31, %v817_v59 }
 0x3c5   : > { %v814_v61 = vpop.xlane.xlu0 %813 }
 0x3c6   : > { %v846_v56 = vmul.f32 1.442695, %v837_v60  ;;  %v836_v63 = vsub.f32 %v804_v40, %v814_v61 }
 0x3c8   : > { %2673 = vpow2.f32 %v846_v56  ;;  %v844_v1 = vmul.f32 1.442695, %v836_v63 }
 0x3c9   : > { %v823_v6 = vpop.xlane.xlu0 %822 }
 0x3ca   : > { %2675 = vpow2.f32 %v844_v1  ;;  %v839_v40 = vsub.f32 %v807_v44, %v823_v6 }
 0x3cb   : > { %v829_v31 = vpop.xlane.xlu1 %828 }
 0x3cc   : > { %v841_v41 = vsub.f32 %v809_v29, %v829_v31  ;;  %v850_v25 = vmul.f32 1.442695, %v839_v40 }
 0x3cd   : > { %v820_v38 = vpop.xlane.xlu0 %819 }
 0x3ce   : > { %v838_v32 = vsub.f32 %v806_v27, %v820_v38  ;;  %v854_v48 = vmul.f32 1.442695, %v841_v41  ;;  %2677 = vpow2.f32 %v850_v25 }
 0x3cf   : > { %v835_v42 = vpop.xlane.xlu1 %834 }
 0x3d0   : > { %v843_v49 = vsub.f32 %v811_v53, %v835_v42  ;;  %v848_v52 = vmul.f32 1.442695, %v838_v32  ;;  %2679 = vpow2.f32 %v854_v48 }
 0x3d1   : > { %v826_v45 = vpop.xlane.xlu0 %825 }
 0x3d2   : > { %v840_v50 = vsub.f32 %v808_v47, %v826_v45  ;;  %2681 = vpow2.f32 %v848_v52 }
 0x3d4   : > { %v852_v58 = vmul.f32 1.442695, %v840_v50 }
 0x3d5   : > { %v3191_v0 = vpop.eup %2673  ;;  %v832_v62 = vpop.xlane.xlu0 %831 }
 0x3d6   : > { %v863_v30 = vsel %vm369_vm2, %v3191_v0, 0.0  ;;  %v842_v15 = vsub.f32 %v810_v10, %v832_v62 }
 0x3d7   : > { %v3195_v33 = vpop.eup %2675  ;;  %864 = vadd.xlane.f32.xlu1 %v863_v30 }
 0x3d8   : > { %v860_v4 = vsel %vm369_vm2, %v3195_v33, 0.0 }
 0x3d9   : > { %861 = vadd.xlane.f32.xlu0 %v860_v4 }
 0x3db   : > { %v3203_v44 = vpop.eup %2677 }
 0x3dc   : > { %v869_v27 = vsel %vm369_vm2, %v3203_v44, 0.0 }
 0x3dd   : > { %v3205_v29 = vpop.eup %2679 }
 0x3de   : > { %v875_v47 = vsel %vm369_vm2, %v3205_v29, 0.0 }
 0x3df   : > { %v3209_v53 = vpop.eup %2681 }
 0x3e0   : > { %v866_v10 = vsel %vm369_vm2, %v3209_v53, 0.0 }
 0x3e8   : > { %1097 = vrot.lane.b32.xlu1 %v2876_v8, %s2788_s21  ;;  %v858_v8 = vmul.f32 1.442695, %v843_v49 }
 0x3ea   : > { %2683 = vpow2.f32 %v858_v8 }
 0x3eb   : > { %2685 = vpow2.f32 %v852_v58 }
 0x3ef   : > { %1099 = vrot.lane.b32.xlu0 %v2853_v5, %s2788_s21  ;;  %v856_v5 = vmul.f32 1.442695, %v842_v15 }
 0x3f1   : > { %2687 = vpow2.f32 %v856_v5 }
 0x3f7   : > { %v3213_v54 = vpop.eup %2683 }
 0x3f8   : > { %v3217_v59 = vpop.eup %2685  ;;  %v881_v60 = vsel %vm369_vm2, %v3213_v54, 0.0 }
 0x3f9   : > { %v872_v61 = vsel %vm369_vm2, %v3217_v59, 0.0 }
 0x3fe   : > { %v3223_v56 = vpop.eup %2687 }
 0x3ff   : > { %v878_v63 = vsel %vm369_vm2, %v3223_v56, 0.0 }
 0x40c   : > { %870 = vadd.xlane.f32.xlu1 %v869_v27 }
 0x40e   : > { %876 = vadd.xlane.f32.xlu0 %v875_v47 }
 0x410   : > { %867 = vadd.xlane.f32.xlu1 %v866_v10 }
 0x412   : > { %882 = vadd.xlane.f32.xlu0 %v881_v60 }
 0x414   : > { %873 = vadd.xlane.f32.xlu1 %v872_v61 }
 0x418   : > { %879 = vadd.xlane.f32.xlu1 %v878_v63 }
 0x428   : > { %1095 = vrot.lane.b32.xlu0 %v2867_v7, %s2788_s21  ;;  %v1102_v7 = vpop.permute.xlu1 %1101 }
 0x429   : > { %1093 = vrot.lane.b32.xlu1 %v2879_v9, %s2788_s21  ;;  %v1104_v9 = vpop.permute.xlu0 %1103 }
 0x42c   : > { %1077 = vrot.lane.b32.xlu0 %v2847_v3, %s2788_s21 }
 0x42d   : > { %1079 = vrot.lane.b32.xlu1 %v2905_v12, %s2788_s21 }
 0x430   : > { %1081 = vrot.lane.b32.xlu0 %v2909_v13, %s2788_s21 }
 0x431   : > { %1083 = vrot.lane.b32.xlu1 %v2915_v16, %s2788_s21 }
 0x434   : > { %1085 = vrot.lane.b32.xlu0 %v2919_v17, %s2788_s21 }
 0x435   : > { %1087 = vrot.lane.b32.xlu1 %v2925_v20, %s2788_s21 }
 0x438   : > { %1089 = vrot.lane.b32.xlu0 %v2929_v21, %s2788_s21 }
 0x439   : > { %1091 = vrot.lane.b32.xlu1 %v2934_v23, %s2788_s21 }
 0x460   : > { %v865_v1 = vpop.xlane.xlu1 %864 }
 0x461   : > { %2689 = vrcp.f32 %v865_v1 }
 0x462   : > { %v862_v30 = vpop.xlane.xlu0 %861 }
 0x463   : > { %2691 = vrcp.f32 %v862_v30 }
 0x46e   : > { %v2690_v4 = vpop.eup %2689 }
 0x46f   : > { %v893_v6 = vmul.f32 %v2690_v4, %v865_v1 }
 0x470   : > { %v2692_v31 = vpop.eup %2691 }
 0x471   : > { %v901_v38 = vsub.f32 2.0, %v893_v6  ;;  %v892_v40 = vmul.f32 %v2692_v31, %v862_v30 }
 0x473   : > { %v900_v41 = vsub.f32 2.0, %v892_v40  ;;  %v909_v42 = vmul.f32 %v2690_v4, %v901_v38 }
 0x475   : > { %v908_v45 = vmul.f32 %v2692_v31, %v900_v41  ;;  %v917_v32 = vmul.f32 %v3191_v0, %v909_v42  ;;  %v1100_v0 = vpop.permute.xlu0 %1099 }
 0x477   : > { %v916_v25 = vmul.f32 %v3195_v33, %v908_v45  ;;  %v1098_v33 = vpop.permute.xlu1 %1097 }
 0x479   : > { %2499 = vmatprep.mubr.msk.f32.mxu0 %vm369_vm2, %v916_v25 }
 0x47a   : > { %2500 = vmatmul.mubr.msk.f32.vlgmr.msra.gmra.mxu0 %vm369_vm2, %v917_v32 }
 0x47b   : > { %2512 = vmatpush3.xpose.msk.msra.mxu0 %vm207_vm0, %v3133_v2 }
 0x47c   : > { %2513 = vmatprep.subr.msk.mxu0 %vm207_vm0, %v3189_v57 }
 0x47f   : > { %2514 = vmatpush3.xpose.msk.msra.mxu0 %vm207_vm0, %v3189_v57 }
 0x480   : > { %2515 = vmatprep.subr.msk.mxu0 %vm207_vm0, %v1104_v9 }
 0x483   : > { %2516 = vmatpush3.xpose.msk.msra.mxu0 %vm207_vm0, %v1104_v9 }
 0x484   : > { %2517 = vmatprep.subr.msk.mxu0 %vm207_vm0, %v1102_v7 }
 0x487   : > { %2518 = vmatpush3.xpose.msk.msra.mxu0 %vm207_vm0, %v1102_v7 }
 0x488   : > { %2519 = vmatprep.subr.msk.mxu0 %vm207_vm0, %v1100_v0 }
 0x48b   : > { %2520 = vmatpush3.xpose.msk.msra.mxu0 %vm207_vm0, %v1100_v0 }
 0x48c   : > { %2521 = vmatprep.subr.msk.mxu0 %vm207_vm0, %v1098_v33 }
 0x48f   : > { %2522 = vmatpush3.xpose.msk.msra.mxu0 %vm207_vm0, %v1098_v33 }
 0x495   : > { %v871_v2 = vpop.xlane.xlu1 %870 }
 0x496   : > { %2693 = vrcp.f32 %v871_v2 }
 0x497   : > { %v877_v57 = vpop.xlane.xlu0 %876 }
 0x498   : > { %2695 = vrcp.f32 %v877_v57 }
 0x499   : > { %v868_v48 = vpop.xlane.xlu1 %867 }
 0x49a   : > { %2697 = vrcp.f32 %v868_v48 }
 0x49b   : > { %v883_v49 = vpop.xlane.xlu0 %882 }
 0x49c   : > { %2699 = vrcp.f32 %v883_v49 }
 0x49d   : > { %v874_v52 = vpop.xlane.xlu1 %873 }
 0x49e   : > { %2701 = vrcp.f32 %v874_v52 }
 0x49f   : > { %v1096_v50 = vpop.permute.xlu0 %1095 }
 0x4a0   : > { %2523 = vmatprep.subr.msk.mxu0 %vm207_vm0, %v1096_v50 }
 0x4a1   : > { %v880_v62 = vpop.xlane.xlu1 %879  ;;  %2524 = vmatpush3.xpose.msk.msra.mxu0 %vm207_vm0, %v1096_v50 }
 0x4a2   : > { %2703 = vrcp.f32 %v880_v62 }
 0x4a3   : > { %v2694_v8 = vpop.eup %2693  ;;  %v1078_v0 = vpop.permute.xlu0 %1077 }
 0x4a4   : > { %v895_v58 = vmul.f32 %v2694_v8, %v871_v2 }
 0x4a5   : > { %v2696_v15 = vpop.eup %2695  ;;  %v1094_v5 = vpop.permute.xlu1 %1093 }
 0x4a6   : > { %2525 = vmatprep.subr.msk.mxu0 %vm207_vm0, %v1094_v5  ;;  %v903_v47 = vsub.f32 2.0, %v895_v58  ;;  %v897_v10 = vmul.f32 %v2696_v15, %v877_v57  ;;  %v3299_v58 = vld [vmem:[%s2824_s14 + $0x18] sm:$0xff] }
 0x4a7   : > { %v2698_v27 = vpop.eup %2697  ;;  %2526 = vmatpush3.xpose.msk.msra.mxu0 %vm207_vm0, %v1094_v5  ;;  %v1082_v50 = vpop.permute.xlu0 %1081  ;;  %v3304_v5 = vld [vmem:[%s2824_s14 + $0x20] sm:$0xff] }
 0x4a8   : > { %v894_v60 = vmul.f32 %v2698_v27, %v868_v48  ;;  %v911_v9 = vmul.f32 %v2694_v8, %v903_v47  ;;  %v905_v1 = vsub.f32 2.0, %v897_v10  ;;  %v3294_v8 = vld [vmem:[%s2824_s14 + $0x28] sm:$0xff]  ;;  %v3314_v10 = vld [vmem:[%s2824_s14 + $0x10] sm:$0xff] }
 0x4a9   : > { %v2700_v61 = vpop.eup %2699  ;;  %v3309_v47 = vld [vmem:[%s2824_s14 + $0x8] sm:$0xff] }
 0x4aa   : > { %v902_v63 = vsub.f32 2.0, %v894_v60  ;;  %v899_v30 = vmul.f32 %v2700_v61, %v883_v49  ;;  %v913_v41 = vmul.f32 %v2696_v15, %v905_v1  ;;  %v919_v45 = vmul.f32 %v3203_v44, %v911_v9  ;;  %v1080_v49 = vpop.permute.xlu1 %1079  ;;  %v3318_v60 = vld [vmem:[%s2824_s14] sm:$0xff] }
 0x4ab   : > { %v2702_v7 = vpop.eup %2701 }
 0x4ac   : > { %v910_v4 = vmul.f32 %v2698_v27, %v902_v63  ;;  %v896_v6 = vmul.f32 %v2702_v7, %v874_v52  ;;  %v907_v42 = vsub.f32 2.0, %v899_v30  ;;  %v921_v48 = vmul.f32 %v3205_v29, %v913_v41 }
 0x4ae   : > { %v904_v31 = vsub.f32 2.0, %v896_v6  ;;  %v918_v38 = vmul.f32 %v3209_v53, %v910_v4  ;;  %v915_v57 = vmul.f32 %v2700_v61, %v907_v42  ;;  %v1084_v29 = vpop.permute.xlu1 %1083 }
 0x4af   : > { %v2704_v40 = vpop.eup %2703 }
 0x4b0   : > { %v912_v25 = vmul.f32 %v2702_v7, %v904_v31  ;;  %v898_v32 = vmul.f32 %v2704_v40, %v880_v62  ;;  %2502 = vmatprep.mubr.msk.f32.mxu0 %vm369_vm2, %v918_v38  ;;  %v923_v52 = vmul.f32 %v3213_v54, %v915_v57  ;;  %v3284_v62 = vld [vmem:[%s2824_s14 + $0x38] sm:$0xff]  ;;  %v3289_v54 = vld [vmem:[%s2824_s14 + $0x30] sm:$0xff] }
 0x4b1   : > { %2503 = vmatmul.mubr.msk.f32.gmra.mxu0 %vm369_vm2, %v919_v45  ;;  %1380 = vrot.lane.b32.xlu0 %v3284_v62, %s2789_s22 }
 0x4b2   : > { %v906_v33 = vsub.f32 2.0, %v898_v32  ;;  %v920_v2 = vmul.f32 %v3217_v59, %v912_v25  ;;  %v1086_v59 = vpop.permute.xlu0 %1085  ;;  %1378 = vrot.lane.b32.xlu1 %v3289_v54, %s2789_s22 }
 0x4b4   : > { %v914_v53 = vmul.f32 %v2704_v40, %v906_v33  ;;  %2505 = vmatprep.mubr.msk.f32.mxu0 %vm369_vm2, %v920_v2 }
 0x4b5   : > { %2506 = vmatmul.mubr.msk.f32.gmra.mxu0 %vm369_vm2, %v921_v48  ;;  %1376 = vrot.lane.b32.xlu0 %v3294_v8, %s2789_s22 }
 0x4b6   : > { %v922_v44 = vmul.f32 %v3223_v56, %v914_v53  ;;  %v1088_v56 = vpop.permute.xlu1 %1087  ;;  %1372 = vrot.lane.b32.xlu1 %v3299_v58, %s2789_s22  ;;  %v1090_v15 = vpop.permute.xlu0 %1089 }
 0x4b8   : > { %2508 = vmatprep.mubr.msk.f32.mxu0 %vm369_vm2, %v922_v44 }
 0x4b9   : > { %2509 = vmatmul.mubr.msk.f32.gmra.mxu0 %vm369_vm2, %v923_v52  ;;  %1374 = vrot.lane.b32.xlu0 %v3304_v5, %s2789_s22 }
 0x4ba   : > { %2527 = vmatprep.mubr.msk.f32.mxu0 %vm207_vm0, %v1078_v0  ;;  %v1092_v27 = vpop.permute.xlu1 %1091  ;;  %1368 = vrot.lane.b32.xlu1 %v3309_v47, %s2789_s22 }
 0x4bd   : > { %2528 = vmatmul.mubr.msk.f32.vlgmr.msra.gmra.mxu0 %vm207_vm0, %v1080_v49  ;;  %1370 = vrot.lane.b32.xlu0 %v3314_v10, %s2789_s22 }
 0x4be   : > { %2530 = vmatprep.mubr.msk.f32.mxu0 %vm207_vm0, %v1082_v50  ;;  %1366 = vrot.lane.b32.xlu1 %v3318_v60, %s2789_s22 }
 0x4c1   : > { %2531 = vmatmul.mubr.msk.f32.gmra.mxu0 %vm207_vm0, %v1084_v29  ;;  %1549 = vrot.lane.b32.xlu0 %v3284_v62, %s2790_s23 }
 0x4c2   : > { %2533 = vmatprep.mubr.msk.f32.mxu0 %vm207_vm0, %v1086_v59  ;;  %1547 = vrot.lane.b32.xlu1 %v3289_v54, %s2790_s23 }
 0x4c5   : > { %2534 = vmatmul.mubr.msk.f32.gmra.mxu0 %vm207_vm0, %v1088_v56 }
 0x4c6   : > { %2536 = vmatprep.mubr.msk.f32.mxu0 %vm207_vm0, %v1090_v15 }
 0x4c9   : > { %2537 = vmatmul.mubr.msk.f32.gmra.mxu0 %vm207_vm0, %v1092_v27 }
 0x523   : > { %v1381_v61 = vpop.permute.xlu0 %1380 }
 0x524   : > { %2539 = vmatprep.subr.mxu1 %v1381_v61  ;;  %v1379_v63 = vpop.permute.xlu1 %1378 }
 0x525   : > { %2540 = vmatpush3.msra.mxu1 %v1381_v61 }
 0x526   : > { %2541 = vmatprep.subr.mxu1 %v1379_v63 }
 0x527   : > { %v1377_v7 = vpop.permute.xlu0 %1376  ;;  %2542 = vmatpush3.msra.mxu1 %v1379_v63 }
 0x528   : > { %2543 = vmatprep.subr.mxu1 %v1377_v7  ;;  %v1373_v9 = vpop.permute.xlu1 %1372 }
 0x529   : > { %2544 = vmatpush3.msra.mxu1 %v1377_v7 }
 0x52b   : > { %v1375_v1 = vpop.permute.xlu0 %1374 }
 0x52c   : > { %2545 = vmatprep.subr.mxu1 %v1375_v1  ;;  %v1369_v30 = vpop.permute.xlu1 %1368 }
 0x52d   : > { %2546 = vmatpush3.msra.mxu1 %v1375_v1 }
 0x52e   : > { %2547 = vmatprep.subr.mxu1 %v1373_v9 }
 0x52f   : > { %2548 = vmatpush3.msra.mxu1 %v1373_v9  ;;  %v1371_v4 = vpop.permute.xlu0 %1370 }
 0x530   : > { %2549 = vmatprep.subr.mxu1 %v1371_v4  ;;  %v1367_v6 = vpop.permute.xlu1 %1366 }
 0x531   : > { %2550 = vmatpush3.msra.mxu1 %v1371_v4 }
 0x532   : > { %2551 = vmatprep.subr.mxu1 %v1369_v30 }
 0x533   : > { %2552 = vmatpush3.msra.mxu1 %v1369_v30  ;;  %v3325_v31 = vpop.permute.xlu0 %1549 }
 0x534   : > { %2553 = vmatprep.subr.mxu1 %v1367_v6 }
 0x535   : > { %2554 = vmatpush3.msra.mxu1 %v1367_v6 }
 0x536   : > { %2567 = vmatprep.subr.msk.mxu1 %vm207_vm0, %v3325_v31 }
 0x53a   : > { %v3329_v38 = vpop.f32.mrf.mxu0 }
 0x53c   : > { %v3331_v40 = vpop.f32.mrf.mxu0 }
 0x571   : > { %v3333_v41 = vpop.f32.mrf.mxu0 }
 0x573   : > { %v3335_v42 = vpop.f32.mrf.mxu0 }
 0x575   : > { %v3337_v45 = vpop.f32.mrf.mxu0 }
 0x577   : > { %v3339_v25 = vpop.f32.mrf.mxu0 }
 0x579   : > { %v3341_v32 = vpop.f32.mrf.mxu0 }
 0x57b   : > { %v3343_v0 = vpop.f32.mrf.mxu0 }
 0x57d   : > { %v2529_v33 = vpop.f32.mrf.mxu0 }
 0x57e   : > { %v1247_v2 = vsel %vm200_vm1, -1e+09, %v2529_v33 }
 0x57f   : > { %v1207_v57 = vpop.f32.mrf.mxu0  ;;  %v1257_v48 = vsel %vm369_vm2, %v1247_v2, -inf }
 0x580   : > { %v1246_v53 = vsel %vm199_vm3, -1e+09, %v1207_v57  ;;  %1258 = vmax.xlane.f32.xlu1 %v1257_v48  ;;  %v3381_v48 = vpop.permute.xlu1 %1547 }
 0x581   : > { %v2532_v49 = vpop.f32.mrf.mxu0  ;;  %v1254_v44 = vsel %vm369_vm2, %v1246_v53, -inf }
 0x582   : > { %v1249_v52 = vsel %vm202_vm4, -1e+09, %v2532_v49  ;;  %1255 = vmax.xlane.f32.xlu0 %v1254_v44 }
 0x583   : > { %v1217_v50 = vpop.f32.mrf.mxu0  ;;  %v1263_v29 = vsel %vm369_vm2, %v1249_v52, -inf }
 0x584   : > { %v1248_v59 = vsel %vm201_vm5, -1e+09, %v1217_v50 }
 0x585   : > { %v2535_v56 = vpop.f32.mrf.mxu0  ;;  %v1260_v63 = vsel %vm369_vm2, %v1248_v59, -inf }
 0x586   : > { %v1251_v15 = vsel %vm204_vm6, -1e+09, %v2535_v56  ;;  %1264 = vmax.xlane.f32.xlu0 %v1263_v29 }
 0x587   : > { %v1227_v27 = vpop.f32.mrf.mxu0  ;;  %v1269_v61 = vsel %vm369_vm2, %v1251_v15, -inf }
 0x588   : > { %v1250_v7 = vsel %vm203_vm7, -1e+09, %v1227_v27  ;;  %1270 = vmax.xlane.f32.xlu1 %v1269_v61 }
 0x589   : > { %v2538_v9 = vpop.f32.mrf.mxu0  ;;  %v1266_v4 = vsel %vm369_vm2, %v1250_v7, -inf }
 0x58a   : > { %v1253_v1 = vsel %vm206_vm8, -1e+09, %v2538_v9  ;;  %1261 = vmax.xlane.f32.xlu0 %v1260_v63 }
 0x58b   : > { %v1275_v30 = vsel %vm369_vm2, %v1253_v1, -inf  ;;  %v1237_v6 = vpop.f32.mrf.mxu0 }
 0x58c   : > { %1276 = vmax.xlane.f32.xlu1 %v1275_v30  ;;  %v1252_v33 = vsel %vm205_vm9, -1e+09, %v1237_v6 }
 0x58d   : > { %v1272_v57 = vsel %vm369_vm2, %v1252_v33, -inf }
 0x58e   : > { %1267 = vmax.xlane.f32.xlu0 %v1266_v4 }
 0x592   : > { %1273 = vmax.xlane.f32.xlu0 %v1272_v57 }
 0x59d   : > { %1543 = vrot.lane.b32.xlu1 %v3304_v5, %s2790_s23 }
 0x5a8   : > { %1545 = vrot.lane.b32.xlu0 %v3294_v8, %s2790_s23 }
 0x609   : > { %v1259_v49 = vpop.xlane.xlu1 %1258 }
 0x60a   : > { %v1279_v44 = vsub.f32 %v1247_v2, %v1259_v49 }
 0x60b   : > { %v1256_v50 = vpop.xlane.xlu0 %1255 }
 0x60c   : > { %v1288_v29 = vmul.f32 1.442695, %v1279_v44  ;;  %v1278_v56 = vsub.f32 %v1246_v53, %v1256_v50 }
 0x60e   : > { %2705 = vpow2.f32 %v1288_v29  ;;  %v1286_v27 = vmul.f32 1.442695, %v1278_v56 }
 0x60f   : > { %v1265_v2 = vpop.xlane.xlu0 %1264 }
 0x610   : > { %2707 = vpow2.f32 %v1286_v27  ;;  %v1281_v6 = vsub.f32 %v1249_v52, %v1265_v2 }
 0x611   : > { %v1271_v53 = vpop.xlane.xlu1 %1270 }
 0x612   : > { %v1283_v57 = vsub.f32 %v1251_v15, %v1271_v53  ;;  %v1292_v50 = vmul.f32 1.442695, %v1281_v6 }
 0x613   : > { %v1262_v4 = vpop.xlane.xlu0 %1261 }
 0x614   : > { %v1280_v29 = vsub.f32 %v1248_v59, %v1262_v4  ;;  %v1296_v56 = vmul.f32 1.442695, %v1283_v57  ;;  %2709 = vpow2.f32 %v1292_v50 }
 0x615   : > { %v1277_v49 = vpop.xlane.xlu1 %1276 }
 0x616   : > { %v1285_v27 = vsub.f32 %v1253_v1, %v1277_v49  ;;  %2711 = vpow2.f32 %v1296_v56 }
 0x617   : > { %v1268_v44 = vpop.xlane.xlu0 %1267 }
 0x618   : > { %v1300_v26 = vmul.f32 1.442695, %v1285_v27 }
 0x61b   : > { %v3383_v61 = vpop.eup %2705  ;;  %v1274_v28 = vpop.xlane.xlu0 %1273 }
 0x61c   : > { %v1305_v63 = vsel %vm369_vm2, %v3383_v61, 0.0  ;;  %v1284_v22 = vsub.f32 %v1252_v33, %v1274_v28 }
 0x61d   : > { %v3387_v9 = vpop.eup %2707  ;;  %1306 = vadd.xlane.f32.xlu1 %v1305_v63  ;;  %v1290_v63 = vmul.f32 1.442695, %v1280_v29 }
 0x61e   : > { %v1302_v30 = vsel %vm369_vm2, %v3387_v9, 0.0  ;;  %v1298_v19 = vmul.f32 1.442695, %v1284_v22 }
 0x61f   : > { %1303 = vadd.xlane.f32.xlu0 %v1302_v30  ;;  %v1282_v30 = vsub.f32 %v1250_v7, %v1268_v44  ;;  %2713 = vpow2.f32 %v1290_v63 }
 0x620   : > { %2715 = vpow2.f32 %v1300_v26 }
 0x621   : > { %v1294_v24 = vmul.f32 1.442695, %v1282_v30  ;;  %v3395_v52 = vpop.eup %2709 }
 0x622   : > { %v1311_v59 = vsel %vm369_vm2, %v3395_v52, 0.0 }
 0x623   : > { %2717 = vpow2.f32 %v1294_v24  ;;  %v3397_v15 = vpop.eup %2711 }
 0x624   : > { %2719 = vpow2.f32 %v1298_v19  ;;  %v1317_v7 = vsel %vm369_vm2, %v3397_v15, 0.0 }
 0x62c   : > { %v3401_v1 = vpop.eup %2713 }
 0x62d   : > { %v3405_v2 = vpop.eup %2715  ;;  %v1308_v22 = vsel %vm369_vm2, %v3401_v1, 0.0 }
 0x62e   : > { %1539 = vrot.lane.b32.xlu1 %v3314_v10, %s2790_s23  ;;  %v1323_v24 = vsel %vm369_vm2, %v3405_v2, 0.0 }
 0x630   : > { %v3409_v19 = vpop.eup %2717 }
 0x631   : > { %v1314_v26 = vsel %vm369_vm2, %v3409_v19, 0.0  ;;  %v3415_v28 = vpop.eup %2719 }
 0x632   : > { %v1320_v33 = vsel %vm369_vm2, %v3415_v28, 0.0 }
 0x635   : > { %1541 = vrot.lane.b32.xlu0 %v3299_v58, %s2790_s23 }
 0x652   : > { %1312 = vadd.xlane.f32.xlu1 %v1311_v59 }
 0x654   : > { %1318 = vadd.xlane.f32.xlu0 %v1317_v7 }
 0x656   : > { %1309 = vadd.xlane.f32.xlu1 %v1308_v22 }
 0x658   : > { %1324 = vadd.xlane.f32.xlu0 %v1323_v24 }
 0x65a   : > { %1315 = vadd.xlane.f32.xlu1 %v1314_v26 }
 0x65e   : > { %1321 = vadd.xlane.f32.xlu1 %v1320_v33 }
 0x66e   : > { %1537 = vrot.lane.b32.xlu0 %v3309_v47, %s2790_s23 }
 0x66f   : > { %1535 = vrot.lane.b32.xlu1 %v3318_v60, %s2790_s23 }
 0x672   : > { %1519 = vrot.lane.b32.xlu0 %v2847_v3, %s2790_s23  ;;  %v1544_v3 = vpop.permute.xlu1 %1543 }
 0x673   : > { %1521 = vrot.lane.b32.xlu1 %v2905_v12, %s2790_s23  ;;  %v1546_v12 = vpop.permute.xlu0 %1545 }
 0x676   : > { %1523 = vrot.lane.b32.xlu0 %v2909_v13, %s2790_s23 }
 0x677   : > { %1525 = vrot.lane.b32.xlu1 %v2915_v16, %s2790_s23 }
 0x67a   : > { %1527 = vrot.lane.b32.xlu0 %v2919_v17, %s2790_s23 }
 0x67b   : > { %1529 = vrot.lane.b32.xlu1 %v2925_v20, %s2790_s23 }
 0x67e   : > { %1531 = vrot.lane.b32.xlu0 %v2929_v21, %s2790_s23 }
 0x67f   : > { %1533 = vrot.lane.b32.xlu1 %v2934_v23, %s2790_s23 }
 0x6a6   : > { %v1307_v53 = vpop.xlane.xlu1 %1306 }
 0x6a7   : > { %2721 = vrcp.f32 %v1307_v53 }
 0x6a8   : > { %v1304_v13 = vpop.xlane.xlu0 %1303 }
 0x6a9   : > { %2723 = vrcp.f32 %v1304_v13 }
 0x6ac   : > { %v1542_v23 = vpop.permute.xlu0 %1541 }
 0x6b4   : > { %v2722_v4 = vpop.eup %2721 }
 0x6b5   : > { %v1335_v16 = vmul.f32 %v2722_v4, %v1307_v53 }
 0x6b6   : > { %v2724_v6 = vpop.eup %2723 }
 0x6b7   : > { %v1343_v57 = vsub.f32 2.0, %v1335_v16  ;;  %v1334_v17 = vmul.f32 %v2724_v6, %v1304_v13 }
 0x6b9   : > { %v1342_v49 = vsub.f32 2.0, %v1334_v17  ;;  %v1351_v44 = vmul.f32 %v2722_v4, %v1343_v57 }
 0x6bb   : > { %v1350_v20 = vmul.f32 %v2724_v6, %v1342_v49  ;;  %v1359_v21 = vmul.f32 %v3383_v61, %v1351_v44  ;;  %v1540_v61 = vpop.permute.xlu1 %1539 }
 0x6bd   : > { %v1358_v50 = vmul.f32 %v3387_v9, %v1350_v20 }
 0x6bf   : > { %2555 = vmatprep.mubr.msk.f32.mxu1 %vm369_vm2, %v1358_v50 }
 0x6c0   : > { %2556 = vmatmul.mubr.msk.f32.vlgmr.msra.gmra.mxu1 %vm369_vm2, %v1359_v21 }
 0x6c1   : > { %2568 = vmatpush3.xpose.msk.msra.mxu1 %vm207_vm0, %v3325_v31 }
 0x6c2   : > { %2569 = vmatprep.subr.msk.mxu1 %vm207_vm0, %v3381_v48 }
 0x6c5   : > { %2570 = vmatpush3.xpose.msk.msra.mxu1 %vm207_vm0, %v3381_v48 }
 0x6c6   : > { %2571 = vmatprep.subr.msk.mxu1 %vm207_vm0, %v1546_v12 }
 0x6c9   : > { %2572 = vmatpush3.xpose.msk.msra.mxu1 %vm207_vm0, %v1546_v12 }
 0x6ca   : > { %2573 = vmatprep.subr.msk.mxu1 %vm207_vm0, %v1544_v3 }
 0x6cd   : > { %2574 = vmatpush3.xpose.msk.msra.mxu1 %vm207_vm0, %v1544_v3 }
 0x6ce   : > { %2575 = vmatprep.subr.msk.mxu1 %vm207_vm0, %v1542_v23 }
 0x6d1   : > { %2576 = vmatpush3.xpose.msk.msra.mxu1 %vm207_vm0, %v1542_v23 }
 0x6d2   : > { %2577 = vmatprep.subr.msk.mxu1 %vm207_vm0, %v1540_v61 }
 0x6d5   : > { %2578 = vmatpush3.xpose.msk.msra.mxu1 %vm207_vm0, %v1540_v61 }
 0x6db   : > { %v1313_v31 = vpop.xlane.xlu1 %1312 }
 0x6dc   : > { %2725 = vrcp.f32 %v1313_v31 }
 0x6dd   : > { %v1319_v48 = vpop.xlane.xlu0 %1318 }
 0x6de   : > { %2727 = vrcp.f32 %v1319_v48 }
 0x6df   : > { %v1310_v9 = vpop.xlane.xlu1 %1309 }
 0x6e0   : > { %2729 = vrcp.f32 %v1310_v9 }
 0x6e1   : > { %v1325_v29 = vpop.xlane.xlu0 %1324 }
 0x6e2   : > { %2731 = vrcp.f32 %v1325_v29 }
 0x6e3   : > { %v1316_v56 = vpop.xlane.xlu1 %1315 }
 0x6e4   : > { %2733 = vrcp.f32 %v1316_v56 }
 0x6e5   : > { %v1538_v27 = vpop.permute.xlu0 %1537 }
 0x6e6   : > { %2579 = vmatprep.subr.msk.mxu1 %vm207_vm0, %v1538_v27 }
 0x6e7   : > { %v1322_v63 = vpop.xlane.xlu1 %1321  ;;  %2580 = vmatpush3.xpose.msk.msra.mxu1 %vm207_vm0, %v1538_v27 }
 0x6e8   : > { %2735 = vrcp.f32 %v1322_v63 }
 0x6e9   : > { %v2726_v30 = vpop.eup %2725 }
 0x6ea   : > { %v1337_v59 = vmul.f32 %v2726_v30, %v1313_v31 }
 0x6eb   : > { %v2728_v7 = vpop.eup %2727  ;;  %v1536_v22 = vpop.permute.xlu1 %1535 }
 0x6ec   : > { %2581 = vmatprep.subr.msk.mxu1 %vm207_vm0, %v1536_v22  ;;  %v1345_v26 = vsub.f32 2.0, %v1337_v59  ;;  %v1339_v33 = vmul.f32 %v2728_v7, %v1319_v48  ;;  %v1520_v48 = vpop.permute.xlu0 %1519 }
 0x6ed   : > { %v2730_v24 = vpop.eup %2729  ;;  %2582 = vmatpush3.xpose.msk.msra.mxu1 %vm207_vm0, %v1536_v22 }
 0x6ee   : > { %v1336_v3 = vmul.f32 %v2730_v24, %v1310_v9  ;;  %v1353_v4 = vmul.f32 %v2726_v30, %v1345_v26  ;;  %v1347_v16 = vsub.f32 2.0, %v1339_v33 }
 0x6ef   : > { %v2732_v12 = vpop.eup %2731  ;;  %v1522_v30 = vpop.permute.xlu1 %1521 }
 0x6f0   : > { %v1344_v53 = vsub.f32 2.0, %v1336_v3  ;;  %v1341_v6 = vmul.f32 %v2732_v12, %v1325_v29  ;;  %v1361_v50 = vmul.f32 %v3395_v52, %v1353_v4  ;;  %v1355_v21 = vmul.f32 %v2728_v7, %v1347_v16  ;;  %v1524_v59 = vpop.permute.xlu0 %1523 }
 0x6f1   : > { %v2734_v13 = vpop.eup %2733 }
 0x6f2   : > { %v1352_v57 = vmul.f32 %v2730_v24, %v1344_v53  ;;  %v1338_v17 = vmul.f32 %v2734_v13, %v1316_v56  ;;  %v1349_v23 = vsub.f32 2.0, %v1341_v6  ;;  %v1363_v56 = vmul.f32 %v3397_v15, %v1355_v21 }
 0x6f4   : > { %v1360_v49 = vmul.f32 %v3401_v1, %v1352_v57  ;;  %v1346_v44 = vsub.f32 2.0, %v1338_v17  ;;  %v1357_v27 = vmul.f32 %v2732_v12, %v1349_v23  ;;  %v1528_v15 = vpop.permute.xlu0 %1527 }
 0x6f5   : > { %v2736_v20 = vpop.eup %2735 }
 0x6f6   : > { %v1354_v61 = vmul.f32 %v2734_v13, %v1346_v44  ;;  %v1340_v31 = vmul.f32 %v2736_v20, %v1322_v63  ;;  %2558 = vmatprep.mubr.msk.f32.mxu1 %vm369_vm2, %v1360_v49  ;;  %v1365_v63 = vmul.f32 %v3405_v2, %v1357_v27 }
 0x6f7   : > { %2559 = vmatmul.mubr.msk.f32.gmra.mxu1 %vm369_vm2, %v1361_v50 }
 0x6f8   : > { %v1362_v9 = vmul.f32 %v3409_v19, %v1354_v61  ;;  %v1348_v29 = vsub.f32 2.0, %v1340_v31  ;;  %v1526_v19 = vpop.permute.xlu1 %1525 }
 0x6fa   : > { %v1356_v1 = vmul.f32 %v2736_v20, %v1348_v29  ;;  %2561 = vmatprep.mubr.msk.f32.mxu1 %vm369_vm2, %v1362_v9 }
 0x6fb   : > { %2562 = vmatmul.mubr.msk.f32.gmra.mxu1 %vm369_vm2, %v1363_v56 }
 0x6fc   : > { %v1364_v52 = vmul.f32 %v3415_v28, %v1356_v1  ;;  %v1530_v7 = vpop.permute.xlu1 %1529  ;;  %v1532_v28 = vpop.permute.xlu0 %1531 }
 0x6fe   : > { %2564 = vmatprep.mubr.msk.f32.mxu1 %vm369_vm2, %v1364_v52 }
 0x6ff   : > { %2565 = vmatmul.mubr.msk.f32.gmra.mxu1 %vm369_vm2, %v1365_v63 }
 0x700   : > { %2583 = vmatprep.mubr.msk.f32.mxu1 %vm207_vm0, %v1520_v48  ;;  %v1534_v2 = vpop.permute.xlu1 %1533 }
 0x703   : > { %2584 = vmatmul.mubr.msk.f32.vlgmr.msra.gmra.mxu1 %vm207_vm0, %v1522_v30 }
 0x704   : > { %2586 = vmatprep.mubr.msk.f32.mxu1 %vm207_vm0, %v1524_v59 }
 0x707   : > { %2587 = vmatmul.mubr.msk.f32.gmra.mxu1 %vm207_vm0, %v1526_v19 }
 0x708   : > { %2589 = vmatprep.mubr.msk.f32.mxu1 %vm207_vm0, %v1528_v15 }
 0x70b   : > { %2590 = vmatmul.mubr.msk.f32.gmra.mxu1 %vm207_vm0, %v1530_v7 }
 0x70c   : > { %2592 = vmatprep.mubr.msk.f32.mxu1 %vm207_vm0, %v1532_v28 }
 0x70f   : > { %2593 = vmatmul.mubr.msk.f32.gmra.mxu1 %vm207_vm0, %v1534_v2 }
 0x780   : > { %v3481_v22 = vpop.f32.mrf.mxu1 }
 0x782   : > { %v3483_v24 = vpop.f32.mrf.mxu1 }
 0x7b7   : > { %v3485_v26 = vpop.f32.mrf.mxu1 }
 0x7b9   : > { %v3487_v33 = vpop.f32.mrf.mxu1 }
 0x7bb   : > { %v3489_v3 = vpop.f32.mrf.mxu1 }
 0x7bd   : > { %v3491_v12 = vpop.f32.mrf.mxu1 }
 0x7bf   : > { %v3493_v53 = vpop.f32.mrf.mxu1 }
 0x7c1   : > { %v3495_v13 = vpop.f32.mrf.mxu1 }
 0x7c3   : > { %v2585_v4 = vpop.f32.mrf.mxu1 }
 0x7c4   : > { %v1689_v16 = vsel %vm200_vm1, -1e+09, %v2585_v4 }
 0x7c5   : > { %v1699_v6 = vsel %vm369_vm2, %v1689_v16, -inf  ;;  %v1649_v57 = vpop.f32.mrf.mxu1 }
 0x7c6   : > { %v1688_v17 = vsel %vm199_vm3, -1e+09, %v1649_v57  ;;  %1700 = vmax.xlane.f32.xlu1 %v1699_v6 }
 0x7c7   : > { %v1696_v49 = vsel %vm369_vm2, %v1688_v17, -inf  ;;  %v2588_v44 = vpop.f32.mrf.mxu1 }
 0x7c8   : > { %v1691_v20 = vsel %vm202_vm4, -1e+09, %v2588_v44  ;;  %1697 = vmax.xlane.f32.xlu0 %v1696_v49 }
 0x7c9   : > { %v1705_v50 = vsel %vm369_vm2, %v1691_v20, -inf  ;;  %v1659_v35 = vpop.f32.mrf.mxu1 }
 0x7ca   : > { %v1690_v23 = vsel %vm201_vm5, -1e+09, %v1659_v35 }
 0x7cb   : > { %v2591_v21 = vpop.f32.mrf.mxu1  ;;  %v1702_v37 = vsel %vm369_vm2, %v1690_v23, -inf }
 0x7cc   : > { %v1693_v34 = vsel %vm204_vm6, -1e+09, %v2591_v21  ;;  %1706 = vmax.xlane.f32.xlu0 %v1705_v50 }
 0x7cd   : > { %v1711_v61 = vsel %vm369_vm2, %v1693_v34, -inf  ;;  %v1669_v31 = vpop.f32.mrf.mxu1 }
 0x7ce   : > { %1712 = vmax.xlane.f32.xlu1 %v1711_v61  ;;  %v1692_v9 = vsel %vm203_vm7, -1e+09, %v1669_v31 }
 0x7cf   : > { %v2594_v48 = vpop.f32.mrf.mxu1  ;;  %v1708_v56 = vsel %vm369_vm2, %v1692_v9, -inf }
 0x7d0   : > { %v1695_v39 = vsel %vm206_vm8, -1e+09, %v2594_v48  ;;  %1703 = vmax.xlane.f32.xlu0 %v1702_v37 }
 0x7d1   : > { %v1717_v43 = vsel %vm369_vm2, %v1695_v39, -inf  ;;  %v1679_v29 = vpop.f32.mrf.mxu1 }
 0x7d2   : > { %1718 = vmax.xlane.f32.xlu1 %v1717_v43  ;;  %v1694_v27 = vsel %vm205_vm9, -1e+09, %v1679_v29 }
 0x7d3   : > { %v1714_v1 = vsel %vm369_vm2, %v1694_v27, -inf }
 0x7d4   : > { %1709 = vmax.xlane.f32.xlu0 %v1708_v56 }
 0x7d8   : > { %1715 = vmax.xlane.f32.xlu0 %v1714_v1 }
 0x7e3   : > { %1820 = vrot.lane.b32.xlu1 %v3289_v54, %s2791_s24 }
 0x7e7   : > { %1818 = vrot.lane.b32.xlu1 %v3294_v8, %s2791_s24 }
 0x7eb   : > { %1816 = vrot.lane.b32.xlu1 %v3304_v5, %s2791_s24 }
 0x7ee   : > { %1822 = vrot.lane.b32.xlu0 %v3284_v62, %s2791_s24 }
 0x7ef   : > { %1812 = vrot.lane.b32.xlu1 %v3314_v10, %s2791_s24 }
 0x7f2   : > { %1814 = vrot.lane.b32.xlu0 %v3299_v58, %s2791_s24 }
 0x84f   : > { %v1701_v36 = vpop.xlane.xlu1 %1700 }
 0x850   : > { %v1721_v46 = vsub.f32 %v1689_v16, %v1701_v36 }
 0x851   : > { %v1698_v51 = vpop.xlane.xlu0 %1697 }
 0x852   : > { %v1730_v55 = vmul.f32 1.442695, %v1721_v46  ;;  %v1720_v54 = vsub.f32 %v1688_v17, %v1698_v51 }
 0x854   : > { %2737 = vpow2.f32 %v1730_v55  ;;  %v1728_v30 = vmul.f32 1.442695, %v1720_v54 }
 0x855   : > { %v1707_v8 = vpop.xlane.xlu0 %1706 }
 0x856   : > { %2739 = vpow2.f32 %v1728_v30  ;;  %v1723_v52 = vsub.f32 %v1691_v20, %v1707_v8 }
 0x857   : > { %v1713_v5 = vpop.xlane.xlu1 %1712 }
 0x858   : > { %v1734_v63 = vmul.f32 1.442695, %v1723_v52  ;;  %v1725_v59 = vsub.f32 %v1693_v34, %v1713_v5 }
 0x859   : > { %v1704_v62 = vpop.xlane.xlu0 %1703 }
 0x85a   : > { %2741 = vpow2.f32 %v1734_v63  ;;  %v1738_v19 = vmul.f32 1.442695, %v1725_v59  ;;  %v1722_v10 = vsub.f32 %v1690_v23, %v1704_v62 }
 0x85b   : > { %v1719_v15 = vpop.xlane.xlu1 %1718 }
 0x85c   : > { %2743 = vpow2.f32 %v1738_v19  ;;  %v1732_v58 = vmul.f32 1.442695, %v1722_v10  ;;  %v1727_v7 = vsub.f32 %v1695_v39, %v1719_v15 }
 0x85d   : > { %v1710_v28 = vpop.xlane.xlu0 %1709 }
 0x85e   : > { %2745 = vpow2.f32 %v1732_v58  ;;  %v1742_v2 = vmul.f32 1.442695, %v1727_v7  ;;  %v1724_v4 = vsub.f32 %v1692_v9, %v1710_v28 }
 0x85f   : > { %v1821_v16 = vpop.permute.xlu1 %1820 }
 0x860   : > { %2747 = vpow2.f32 %v1742_v2  ;;  %v1736_v6 = vmul.f32 1.442695, %v1724_v4 }
 0x861   : > { %v3541_v57 = vpop.eup %2737  ;;  %v1716_v17 = vpop.xlane.xlu0 %1715 }
 0x862   : > { %2749 = vpow2.f32 %v1736_v6  ;;  %v1726_v49 = vsub.f32 %v1694_v27, %v1716_v17  ;;  %v1747_v44 = vsel %vm369_vm2, %v3541_v57, 0.0 }
 0x863   : > { %v3545_v20 = vpop.eup %2739  ;;  %1748 = vadd.xlane.f32.xlu1 %v1747_v44  ;;  %v1819_v50 = vpop.permute.xlu1 %1818 }
 0x864   : > { %v1740_v35 = vmul.f32 1.442695, %v1726_v49  ;;  %v1744_v21 = vsel %vm369_vm2, %v3545_v20, 0.0 }
 0x865   : > { %1745 = vadd.xlane.f32.xlu0 %v1744_v21  ;;  %v1823_v23 = vpop.permute.xlu0 %1822 }
 0x866   : > { %2751 = vpow2.f32 %v1740_v35  ;;  %2595 = vmatprep.subr.mxu0 %v1823_v23 }
 0x867   : > { %v3549_v34 = vpop.eup %2741  ;;  %2596 = vmatpush3.msra.mxu0 %v1823_v23  ;;  %v1817_v37 = vpop.permute.xlu1 %1816 }
 0x868   : > { %v1753_v61 = vsel %vm369_vm2, %v3549_v34, 0.0  ;;  %2597 = vmatprep.subr.mxu0 %v1821_v16 }
 0x869   : > { %v3553_v31 = vpop.eup %2743  ;;  %1754 = vadd.xlane.f32.xlu1 %v1753_v61  ;;  %2598 = vmatpush3.msra.mxu0 %v1821_v16  ;;  %v1815_v43 = vpop.permute.xlu0 %1814 }
 0x86a   : > { %2599 = vmatprep.subr.mxu0 %v1819_v50  ;;  %v1759_v9 = vsel %vm369_vm2, %v3553_v31, 0.0 }
 0x86b   : > { %v3555_v48 = vpop.eup %2745  ;;  %2600 = vmatpush3.msra.mxu0 %v1819_v50  ;;  %v1813_v27 = vpop.permute.xlu1 %1812 }
 0x86c   : > { %v1750_v39 = vsel %vm369_vm2, %v3555_v48, 0.0  ;;  %2601 = vmatprep.subr.mxu0 %v1817_v37 }
 0x86d   : > { %v3561_v29 = vpop.eup %2747  ;;  %1760 = vadd.xlane.f32.xlu1 %v1759_v9  ;;  %1751 = vadd.xlane.f32.xlu0 %v1750_v39 }
 0x86e   : > { %2602 = vmatpush3.msra.mxu0 %v1817_v37  ;;  %v1765_v1 = vsel %vm369_vm2, %v3561_v29, 0.0 }
 0x86f   : > { %v3563_v56 = vpop.eup %2749  ;;  %2603 = vmatprep.subr.mxu0 %v1815_v43 }
 0x870   : > { %v1756_v36 = vsel %vm369_vm2, %v3563_v56, 0.0  ;;  %2604 = vmatpush3.msra.mxu0 %v1815_v43 }
 0x871   : > { %1766 = vadd.xlane.f32.xlu1 %v1765_v1  ;;  %1757 = vadd.xlane.f32.xlu0 %v1756_v36 }
 0x872   : > { %2605 = vmatprep.subr.mxu0 %v1813_v27 }
 0x873   : > { %v3569_v46 = vpop.eup %2751  ;;  %2606 = vmatpush3.msra.mxu0 %v1813_v27 }
 0x874   : > { %v1762_v51 = vsel %vm369_vm2, %v3569_v46, 0.0 }
 0x875   : > { %1763 = vadd.xlane.f32.xlu0 %v1762_v51 }
 0x882   : > { %1808 = vrot.lane.b32.xlu1 %v3318_v60, %s2791_s24 }
 0x886   : > { %1971 = vrot.lane.b32.xlu1 %v3329_v38, %s2792_s25 }
 0x88a   : > { %1975 = vrot.lane.b32.xlu1 %v3333_v41, %s2792_s25 }
 0x88b   : > { %1810 = vrot.lane.b32.xlu0 %v3309_v47, %s2791_s24 }
 0x88e   : > { %1979 = vrot.lane.b32.xlu1 %v3337_v45, %s2792_s25 }
 0x88f   : > { %1969 = vrot.lane.b32.xlu0 %v3331_v40, %s2792_s25 }
 0x892   : > { %1983 = vrot.lane.b32.xlu1 %v3341_v32, %s2792_s25 }
 0x893   : > { %1973 = vrot.lane.b32.xlu0 %v3335_v42, %s2792_s25 }
 0x896   : > { %2003 = vrot.lane.b32.xlu1 %v3481_v22, %s2793_s26 }
 0x897   : > { %1977 = vrot.lane.b32.xlu0 %v3339_v25, %s2792_s25 }
 0x89a   : > { %2007 = vrot.lane.b32.xlu1 %v3485_v26, %s2793_s26 }
 0x89b   : > { %1981 = vrot.lane.b32.xlu0 %v3343_v0, %s2792_s25 }
 0x89e   : > { %2011 = vrot.lane.b32.xlu1 %v3489_v3, %s2793_s26 }
 0x89f   : > { %2001 = vrot.lane.b32.xlu0 %v3483_v24, %s2793_s26 }
 0x8a2   : > { %2015 = vrot.lane.b32.xlu1 %v3493_v53, %s2793_s26 }
 0x8a3   : > { %2005 = vrot.lane.b32.xlu0 %v3487_v33, %s2793_s26 }
 0x8a7   : > { %2009 = vrot.lane.b32.xlu0 %v3491_v12, %s2793_s26 }
 0x8ab   : > { %2013 = vrot.lane.b32.xlu0 %v3495_v13, %s2793_s26 }
 0x8ec   : > { %v1749_v47 = vpop.xlane.xlu1 %1748 }
 0x8ed   : > { %2753 = vrcp.f32 %v1749_v47 }
 0x8ee   : > { %v1746_v60 = vpop.xlane.xlu0 %1745 }
 0x8ef   : > { %2755 = vrcp.f32 %v1746_v60 }
 0x8f2   : > { %v1755_v38 = vpop.xlane.xlu1 %1754 }
 0x8f3   : > { %2757 = vrcp.f32 %v1755_v38 }
 0x8f6   : > { %v1761_v40 = vpop.xlane.xlu1 %1760  ;;  %v1752_v41 = vpop.xlane.xlu0 %1751 }
 0x8f7   : > { %2759 = vrcp.f32 %v1761_v40 }
 0x8f8   : > { %2761 = vrcp.f32 %v1752_v41 }
 0x8fa   : > { %v2754_v42 = vpop.eup %2753  ;;  %v1767_v45 = vpop.xlane.xlu1 %1766 }
 0x8fb   : > { %v1758_v25 = vpop.xlane.xlu0 %1757  ;;  %v1777_v32 = vmul.f32 %v2754_v42, %v1749_v47  ;;  %2763 = vrcp.f32 %v1767_v45 }
 0x8fc   : > { %v2756_v0 = vpop.eup %2755  ;;  %2765 = vrcp.f32 %v1758_v25 }
 0x8fd   : > { %v1785_v22 = vsub.f32 2.0, %v1777_v32  ;;  %v1776_v24 = vmul.f32 %v2756_v0, %v1746_v60 }
 0x8fe   : > { %v1809_v8 = vpop.permute.xlu1 %1808 }
 0x8ff   : > { %v1764_v26 = vpop.xlane.xlu0 %1763  ;;  %v1784_v33 = vsub.f32 2.0, %v1776_v24  ;;  %v1793_v12 = vmul.f32 %v2754_v42, %v1785_v22 }
 0x900   : > { %2767 = vrcp.f32 %v1764_v26  ;;  %v2758_v3 = vpop.eup %2757 }
 0x901   : > { %v1792_v53 = vmul.f32 %v2756_v0, %v1784_v33  ;;  %v1779_v13 = vmul.f32 %v2758_v3, %v1755_v38  ;;  %v1801_v5 = vmul.f32 %v3541_v57, %v1793_v12 }
 0x902   : > { %v1972_v36 = vpop.permute.xlu1 %1971 }
 0x903   : > { %v1811_v55 = vpop.permute.xlu0 %1810  ;;  %v1800_v54 = vmul.f32 %v3545_v20, %v1792_v53  ;;  %v1787_v63 = vsub.f32 2.0, %v1779_v13  ;;  %v2058_v33 = vsel %vm207_vm0, %v3137_v11, %v1972_v36 }
 0x904   : > { %2607 = vmatprep.subr.mxu0 %v1811_v55  ;;  %v2760_v30 = vpop.eup %2759 }
 0x905   : > { %2608 = vmatpush3.msra.mxu0 %v1811_v55  ;;  %v2762_v52 = vpop.eup %2761  ;;  %v1781_v59 = vmul.f32 %v2760_v30, %v1761_v40  ;;  %2611 = vmatprep.mubr.msk.f32.mxu0 %vm369_vm2, %v1800_v54  ;;  %v1795_v58 = vmul.f32 %v2758_v3, %v1787_v63 }
 0x906   : > { %2609 = vmatprep.subr.mxu0 %v1809_v8  ;;  %v1778_v62 = vmul.f32 %v2762_v52, %v1752_v41  ;;  %v1976_v51 = vpop.permute.xlu1 %1975 }
 0x907   : > { %2610 = vmatpush3.msra.mxu0 %v1809_v8  ;;  %v1789_v7 = vsub.f32 2.0, %v1781_v59  ;;  %v1803_v17 = vmul.f32 %v3549_v34, %v1795_v58 }
 0x908   : > { %2612 = vmatmul.mubr.msk.f32.vlgmr.msra.gmra.mxu0 %vm369_vm2, %v1801_v5  ;;  %v2764_v19 = vpop.eup %2763  ;;  %v1786_v10 = vsub.f32 2.0, %v1778_v62 }
 0x909   : > { %v2766_v15 = vpop.eup %2765  ;;  %v1783_v28 = vmul.f32 %v2764_v19, %v1767_v45  ;;  %v1797_v49 = vmul.f32 %v2760_v30, %v1789_v7  ;;  %v2060_v30 = vsel %vm207_vm0, %v3141_v18, %v1976_v51  ;;  %v3676_v7 = vld [vmem:[#allocation4_spill] sm:$0xff] }
 0x90a   : > { %v1794_v2 = vmul.f32 %v2762_v52, %v1786_v10  ;;  %v1780_v4 = vmul.f32 %v2766_v15, %v1758_v25  ;;  %v1980_v60 = vpop.permute.xlu1 %1979 }
 0x90b   : > { %v1791_v44 = vsub.f32 2.0, %v1783_v28  ;;  %v1805_v23 = vmul.f32 %v3553_v31, %v1797_v49 }
 0x90c   : > { %v1802_v6 = vmul.f32 %v3555_v48, %v1794_v2  ;;  %v1788_v57 = vsub.f32 2.0, %v1780_v4 }
 0x90d   : > { %v2768_v16 = vpop.eup %2767  ;;  %v1799_v61 = vmul.f32 %v2764_v19, %v1791_v44  ;;  %v3675_v19 = vld [vmem:[#allocation3_spill] sm:$0xff] }
 0x90e   : > { %v1782_v20 = vmul.f32 %v2768_v16, %v1764_v26  ;;  %v1796_v50 = vmul.f32 %v2766_v15, %v1788_v57  ;;  %2614 = vmatprep.mubr.msk.f32.mxu0 %vm369_vm2, %v1802_v6  ;;  %v1984_v40 = vpop.permute.xlu1 %1983  ;;  %v2062_v10 = vsel %vm207_vm0, %v3675_v19, %v1980_v60  ;;  %v3677_v6 = vld [vmem:[#allocation5_spill] sm:$0xff] }
 0x90f   : > { %2615 = vmatmul.mubr.msk.f32.gmra.mxu0 %vm369_vm2, %v1803_v17  ;;  %v1807_v34 = vmul.f32 %v3561_v29, %v1799_v61  ;;  %v2064_v57 = vsel %vm207_vm0, %v3677_v6, %v1984_v40 }
 0x910   : > { %v1790_v35 = vsub.f32 2.0, %v1782_v20  ;;  %v1804_v21 = vmul.f32 %v3563_v56, %v1796_v50  ;;  %v3678_v20 = vld [vmem:[#allocation6_spill] sm:$0xff] }
 0x912   : > { %v1798_v37 = vmul.f32 %v2768_v16, %v1790_v35  ;;  %2617 = vmatprep.mubr.msk.f32.mxu0 %vm369_vm2, %v1804_v21  ;;  %v2004_v42 = vpop.permute.xlu1 %2003 }
 0x913   : > { %2618 = vmatmul.mubr.msk.f32.gmra.mxu0 %vm369_vm2, %v1805_v23  ;;  %v2067_v3 = vsel %vm2065_vm10, %v2058_v33, %v2004_v42 }
 0x914   : > { %v1806_v48 = vmul.f32 %v3569_v46, %v1798_v37  ;;  %v1970_v46 = vpop.permute.xlu0 %1969 }
 0x915   : > { %v2057_v53 = vsel %vm207_vm0, %v3139_v14, %v1970_v46  ;;  %v3674_v14 = vld [vmem:[#allocation2_spill] sm:$0xff] }
 0x916   : > { %2620 = vmatprep.mubr.msk.f32.mxu0 %vm369_vm2, %v1806_v48  ;;  %v2008_v25 = vpop.permute.xlu1 %2007 }
 0x917   : > { %2621 = vmatmul.mubr.msk.f32.gmra.mxu0 %vm369_vm2, %v1807_v34  ;;  %v2069_v8 = vsel %vm2065_vm10, %v2060_v30, %v2008_v25 }
 0x918   : > { %v1974_v47 = vpop.permute.xlu0 %1973 }
 0x919   : > { %v2059_v5 = vsel %vm207_vm0, %v3674_v14, %v1974_v47 }
 0x91a   : > { %v2012_v0 = vpop.permute.xlu1 %2011 }
 0x91b   : > { %v2071_v15 = vsel %vm2065_vm10, %v2062_v10, %v2012_v0 }
 0x91c   : > { %v1978_v38 = vpop.permute.xlu0 %1977 }
 0x91d   : > { %v2061_v28 = vsel %vm207_vm0, %v3676_v7, %v1978_v38 }
 0x91e   : > { %v2016_v24 = vpop.permute.xlu1 %2015 }
 0x91f   : > { %v2073_v49 = vsel %vm2065_vm10, %v2064_v57, %v2016_v24 }
 0x920   : > { %v1982_v41 = vpop.permute.xlu0 %1981 }
 0x921   : > { %v2063_v50 = vsel %vm207_vm0, %v3678_v20, %v1982_v41 }
 0x924   : > { %v2002_v45 = vpop.permute.xlu0 %2001 }
 0x925   : > { %v2066_v55 = vsel %vm2065_vm10, %v2057_v53, %v2002_v45 }
 0x928   : > { %v2006_v32 = vpop.permute.xlu0 %2005 }
 0x929   : > { %v2068_v59 = vsel %vm2065_vm10, %v2059_v5, %v2006_v32 }
 0x92c   : > { %v2010_v22 = vpop.permute.xlu0 %2009 }
 0x92d   : > { %v2070_v4 = vsel %vm2065_vm10, %v2061_v28, %v2010_v22 }
 0x930   : > { %v2014_v26 = vpop.permute.xlu0 %2013 }
 0x931   : > { %v2072_v21 = vsel %vm2065_vm10, %v2063_v50, %v2014_v26 }
 0x9c8   : > { %v2613_v9 = vpop.f32.mrf.mxu0 }
 0x9c9   : > { %2035 = vrot.lane.b32.xlu1 %v2613_v9, %s2794_s27 }
 0x9ca   : > { %v1922_v39 = vpop.f32.mrf.mxu0 }
 0x9cb   : > { %2033 = vrot.lane.b32.xlu0 %v1922_v39, %s2794_s27 }
 0x9cf   : > { %v2616_v31 = vpop.f32.mrf.mxu0 }
 0x9d0   : > { %2039 = vrot.lane.b32.xlu1 %v2616_v31, %s2794_s27 }
 0x9d1   : > { %v1932_v43 = vpop.f32.mrf.mxu0 }
 0x9d2   : > { %2037 = vrot.lane.b32.xlu0 %v1932_v43, %s2794_s27 }
 0x9d3   : > { %v2619_v56 = vpop.f32.mrf.mxu0 }
 0x9d4   : > { %2043 = vrot.lane.b32.xlu1 %v2619_v56, %s2794_s27 }
 0x9d5   : > { %v1942_v27 = vpop.f32.mrf.mxu0 }
 0x9d6   : > { %2041 = vrot.lane.b32.xlu0 %v1942_v27, %s2794_s27 }
 0x9d7   : > { %v2622_v1 = vpop.f32.mrf.mxu0 }
 0x9d8   : > { %2047 = vrot.lane.b32.xlu1 %v2622_v1, %s2794_s27 }
 0x9d9   : > { %v1952_v29 = vpop.f32.mrf.mxu0 }
 0x9da   : > { %2045 = vrot.lane.b32.xlu0 %v1952_v29, %s2794_s27 }
 0xa3b   : > { %v2036_v12 = vpop.permute.xlu1 %2035 }
 0xa3c   : > { %v2076_v13 = vsel %vm2074_vm11, %v2067_v3, %v2036_v12 }
 0xa3d   : > { %2085 = vst.msk [vmem:[%s3615_s30 + $0x8] sm:$0xff] %vm2083_vm12, %v2076_v13  ;;  %v2034_v11 = vpop.permute.xlu0 %2033 }
 0xa3e   : > { %v2075_v54 = vsel %vm2074_vm11, %v2066_v55, %v2034_v11 }
 0xa3f   : > { %2084 = vst.msk [vmem:[%s3615_s30] sm:$0xff] %vm2083_vm12, %v2075_v54 }
 0xa42   : > { %v2040_v52 = vpop.permute.xlu1 %2039 }
 0xa43   : > { %v2078_v63 = vsel %vm2074_vm11, %v2069_v8, %v2040_v52 }
 0xa44   : > { %2087 = vst.msk [vmem:[%s3615_s30 + $0x18] sm:$0xff] %vm2083_vm12, %v2078_v63  ;;  %v2038_v62 = vpop.permute.xlu0 %2037 }
 0xa45   : > { %v2077_v18 = vsel %vm2074_vm11, %v2068_v59, %v2038_v62 }
 0xa46   : > { %2086 = vst.msk [vmem:[%s3615_s30 + $0x10] sm:$0xff] %vm2083_vm12, %v2077_v18  ;;  %v2044_v58 = vpop.permute.xlu1 %2043 }
 0xa47   : > { %v2080_v2 = vsel %vm2074_vm11, %v2071_v15, %v2044_v58 }
 0xa48   : > { %2089 = vst.msk [vmem:[%s3615_s30 + $0x28] sm:$0xff] %vm2083_vm12, %v2080_v2  ;;  %v2042_v16 = vpop.permute.xlu0 %2041 }
 0xa49   : > { %v2079_v17 = vsel %vm2074_vm11, %v2070_v4, %v2042_v16 }
 0xa4a   : > { %2088 = vst.msk [vmem:[%s3615_s30 + $0x20] sm:$0xff] %vm2083_vm12, %v2079_v17  ;;  %v2048_v44 = vpop.permute.xlu1 %2047 }
 0xa4b   : > { %v2082_v35 = vsel %vm2074_vm11, %v2073_v49, %v2048_v44 }
 0xa4c   : > { %2091 = vst.msk [vmem:[%s3615_s30 + $0x38] sm:$0xff] %vm2083_vm12, %v2082_v35  ;;  %v2046_v23 = vpop.permute.xlu0 %2045 }
 0xa4d   : > { %v2081_v61 = vsel %vm2074_vm11, %v2072_v21, %v2046_v23 }
 0xa4e   : > { %2090 = vst.msk [vmem:[%s3615_s30 + $0x30] sm:$0xff] %vm2083_vm12, %v2081_v61 }
 0xa4f PF: > { %s12_s9 = sadd.s32 1, %s2783_s9  }
 0xa50   : > { %p9_p4 = scmp.ge.s32.totalorder %s12_s9, 4  }
 0xa52   :  { %11 = sbr.rel (!%p9_p4) target bundleno = 1 (0x1), region = 61 }

// kernel: _forward.10
= control target key start
LH: loop header
LB: loop body
LE: loop exit
PB: predicated region body
PF: predicated region fallthrough
CT: control target
= control target key end

     0   :  { %s1918_s0 = inlined_call_operand.vmem [shape: f32[128,128], index: 0, kind: input, shape index: {}]   ;;  %s1919_s1 = inlined_call_operand.vmem [shape: f32[128,128], index: 1, kind: input, shape index: {}]   ;;  %s1920_s3 = inlined_call_operand.vmem [shape: f32[1,128], index: 3, kind: input, shape index: {}]   ;;  %s1921_s4 = inlined_call_operand.vmem [shape: f32[1,128], index: 4, kind: input, shape index: {}]   ;;  %s1922_s2 = inlined_call_operand.vmem [shape: f32[1,128], index: 2, kind: input, shape index: {}]   ;;  %s1923_s5 = inlined_call_operand.vmem [shape: f32[128,128], index: 5, kind: output, shape index: {}]  }
   0x1   :  { %v1281_v0 = vld [vmem:[%s1918_s0 + $0x8] sm:$0xff]  ;;  %v1286_v1 = vld [vmem:[%s1918_s0] sm:$0xff]  ;;  %v1313_v8 = vld [vmem:[%s1918_s0 + $0x50] sm:$0xff] }
   0x2   :  { %58 = vadd.xlane.f32.xlu1 %v1281_v0  ;;  %56 = vadd.xlane.f32.xlu0 %v1286_v1  ;;  %v1293_v2 = vld [vmem:[%s1918_s0 + $0x48] sm:$0xff]  ;;  %v1298_v3 = vld [vmem:[%s1918_s0 + $0x40] sm:$0xff]  ;;  %v104_v5 = vmul.f32 %v1286_v1, %v1286_v1  ;;  %v105_v7 = vmul.f32 %v1281_v0, %v1281_v0  ;;  %v1318_v9 = vld [vmem:[%s1918_s0 + $0x10] sm:$0xff]  ;;  %v114_v13 = vmul.f32 %v1313_v8, %v1313_v8 }
   0x3   :  { %v112_v4 = vmul.f32 %v1298_v3, %v1298_v3  ;;  %v113_v6 = vmul.f32 %v1293_v2, %v1293_v2  ;;  %v1325_v10 = vld [vmem:[%s1918_s0 + $0x58] sm:$0xff]  ;;  %v106_v14 = vmul.f32 %v1318_v9, %v1318_v9  ;;  %v356_v15 = vld [vmem:[%s1919_s1 + $0x70] sm:$0xff]  ;;  %v355_v16 = vld [vmem:[%s1919_s1 + $0x68] sm:$0xff] }
   0x4   :  { %v1330_v11 = vld [vmem:[%s1918_s0 + $0x18] sm:$0xff]  ;;  %v115_v17 = vmul.f32 %v1325_v10, %v1325_v10  ;;  %v354_v19 = vld [vmem:[%s1919_s1 + $0x60] sm:$0xff]  ;;  %v352_v23 = vld [vmem:[%s1919_s1 + $0x50] sm:$0xff] }
   0x5   :  { %v357_v12 = vld [vmem:[%s1919_s1 + $0x78] sm:$0xff]  ;;  %v107_v18 = vmul.f32 %v1330_v11, %v1330_v11  ;;  %v1360_v21 = vld [vmem:[%s1918_s0 + $0x60] sm:$0xff]  ;;  %v351_v24 = vld [vmem:[%s1919_s1 + $0x48] sm:$0xff] }
   0x6   :  { %74 = vadd.xlane.f32.xlu1 %v1293_v2  ;;  %72 = vadd.xlane.f32.xlu0 %v1298_v3  ;;  %v353_v20 = vld [vmem:[%s1919_s1 + $0x58] sm:$0xff]  ;;  %v1365_v22 = vld [vmem:[%s1918_s0 + $0x20] sm:$0xff]  ;;  %v1378_v25 = vld [vmem:[%s1918_s0 + $0x68] sm:$0xff]  ;;  %v116_v28 = vmul.f32 %v1360_v21, %v1360_v21 }
   0x7   :  { %1064 = vmatprep.subr.mxu0 %v357_v12  ;;  %1120 = vmatprep.subr.mxu1 %v357_v12  ;;  %v1383_v26 = vld [vmem:[%s1918_s0 + $0x28] sm:$0xff]  ;;  %v350_v27 = vld [vmem:[%s1919_s1 + $0x40] sm:$0xff]  ;;  %v108_v29 = vmul.f32 %v1365_v22, %v1365_v22  ;;  %v349_v30 = vld [vmem:[%s1919_s1 + $0x38] sm:$0xff]  ;;  %v117_v31 = vmul.f32 %v1378_v25, %v1378_v25 }
   0x8   :  { %1065 = vmatpush3.msra.mxu0 %v357_v12  ;;  %1136 = vmatpush3.msra.mxu1 %v357_v12  ;;  %v109_v32 = vmul.f32 %v1383_v26, %v1383_v26  ;;  %v348_v33 = vld [vmem:[%s1919_s1 + $0x30] sm:$0xff]  ;;  %v347_v34 = vld [vmem:[%s1919_s1 + $0x28] sm:$0xff]  ;;  %v346_v37 = vld [vmem:[%s1919_s1 + $0x20] sm:$0xff] }
   0x9   :  { %1066 = vmatprep.subr.mxu0 %v356_v15  ;;  %1121 = vmatprep.subr.mxu1 %v356_v15  ;;  %v1410_v35 = vld [vmem:[%s1918_s0 + $0x70] sm:$0xff]  ;;  %v345_v38 = vld [vmem:[%s1919_s1 + $0x18] sm:$0xff]  ;;  %v343_v44 = vld [vmem:[%s1919_s1 + $0x8] sm:$0xff] }
   0xa   :  { %136 = vadd.xlane.f32.xlu1 %v112_v4  ;;  %120 = vadd.xlane.f32.xlu0 %v104_v5  ;;  %v1415_v36 = vld [vmem:[%s1918_s0 + $0x30] sm:$0xff]  ;;  %v1428_v39 = vld [vmem:[%s1918_s0 + $0x78] sm:$0xff]  ;;  %v118_v42 = vmul.f32 %v1410_v35, %v1410_v35  ;;  %v342_v47 = vld [vmem:[%s1919_s1] sm:$0xff] }
   0xb   :  { %1067 = vmatpush3.msra.mxu0 %v356_v15  ;;  %1137 = vmatpush3.msra.mxu1 %v356_v15  ;;  %v1433_v40 = vld [vmem:[%s1918_s0 + $0x38] sm:$0xff]  ;;  %v344_v41 = vld [vmem:[%s1919_s1 + $0x10] sm:$0xff]  ;;  %v110_v43 = vmul.f32 %v1415_v36, %v1415_v36  ;;  %v119_v45 = vmul.f32 %v1428_v39, %v1428_v39 }
   0xc   :  { %1068 = vmatprep.subr.mxu0 %v355_v16  ;;  %1122 = vmatprep.subr.mxu1 %v355_v16  ;;  %v111_v46 = vmul.f32 %v1433_v40, %v1433_v40 }
   0xd   :  { %1069 = vmatpush3.msra.mxu0 %v355_v16  ;;  %1138 = vmatpush3.msra.mxu1 %v355_v16 }
   0xe   :  { %138 = vadd.xlane.f32.xlu1 %v113_v6  ;;  %122 = vadd.xlane.f32.xlu0 %v105_v7 }
   0xf   :  { %1070 = vmatprep.subr.mxu0 %v354_v19  ;;  %1123 = vmatprep.subr.mxu1 %v354_v19 }
  0x10   :  { %1071 = vmatpush3.msra.mxu0 %v354_v19  ;;  %1139 = vmatpush3.msra.mxu1 %v354_v19 }
  0x11   :  { %1072 = vmatprep.subr.mxu0 %v353_v20  ;;  %1124 = vmatprep.subr.mxu1 %v353_v20 }
  0x12   :  { %76 = vadd.xlane.f32.xlu1 %v1313_v8  ;;  %60 = vadd.xlane.f32.xlu0 %v1318_v9 }
  0x13   :  { %1073 = vmatpush3.msra.mxu0 %v353_v20  ;;  %1140 = vmatpush3.msra.mxu1 %v353_v20 }
  0x14   :  { %1074 = vmatprep.subr.mxu0 %v352_v23  ;;  %1125 = vmatprep.subr.mxu1 %v352_v23 }
  0x15   :  { %1075 = vmatpush3.msra.mxu0 %v352_v23  ;;  %1141 = vmatpush3.msra.mxu1 %v352_v23 }
  0x16   :  { %78 = vadd.xlane.f32.xlu1 %v1325_v10  ;;  %62 = vadd.xlane.f32.xlu0 %v1330_v11 }
  0x17   :  { %1076 = vmatprep.subr.mxu0 %v351_v24  ;;  %1126 = vmatprep.subr.mxu1 %v351_v24 }
  0x18   :  { %1077 = vmatpush3.msra.mxu0 %v351_v24  ;;  %1142 = vmatpush3.msra.mxu1 %v351_v24 }
  0x19   :  { %1078 = vmatprep.subr.mxu0 %v350_v27  ;;  %1127 = vmatprep.subr.mxu1 %v350_v27 }
  0x1a   :  { %140 = vadd.xlane.f32.xlu1 %v114_v13  ;;  %124 = vadd.xlane.f32.xlu0 %v106_v14 }
  0x1b   :  { %1079 = vmatpush3.msra.mxu0 %v350_v27  ;;  %1143 = vmatpush3.msra.mxu1 %v350_v27 }
  0x1c   :  { %1080 = vmatprep.subr.mxu0 %v349_v30  ;;  %1128 = vmatprep.subr.mxu1 %v349_v30 }
  0x1d   :  { %1081 = vmatpush3.msra.mxu0 %v349_v30  ;;  %1144 = vmatpush3.msra.mxu1 %v349_v30 }
  0x1e   :  { %142 = vadd.xlane.f32.xlu1 %v115_v17  ;;  %126 = vadd.xlane.f32.xlu0 %v107_v18 }
  0x1f   :  { %1082 = vmatprep.subr.mxu0 %v348_v33  ;;  %1129 = vmatprep.subr.mxu1 %v348_v33 }
  0x20   :  { %1083 = vmatpush3.msra.mxu0 %v348_v33  ;;  %1145 = vmatpush3.msra.mxu1 %v348_v33 }
  0x21   :  { %1084 = vmatprep.subr.mxu0 %v347_v34  ;;  %1130 = vmatprep.subr.mxu1 %v347_v34 }
  0x22   :  { %80 = vadd.xlane.f32.xlu1 %v1360_v21  ;;  %64 = vadd.xlane.f32.xlu0 %v1365_v22 }
  0x23   :  { %1085 = vmatpush3.msra.mxu0 %v347_v34  ;;  %1146 = vmatpush3.msra.mxu1 %v347_v34 }
  0x24   :  { %1086 = vmatprep.subr.mxu0 %v346_v37  ;;  %1131 = vmatprep.subr.mxu1 %v346_v37 }
  0x25   :  { %1087 = vmatpush3.msra.mxu0 %v346_v37  ;;  %1147 = vmatpush3.msra.mxu1 %v346_v37 }
  0x26   :  { %82 = vadd.xlane.f32.xlu1 %v1378_v25  ;;  %66 = vadd.xlane.f32.xlu0 %v1383_v26 }
  0x27   :  { %1088 = vmatprep.subr.mxu0 %v345_v38  ;;  %1132 = vmatprep.subr.mxu1 %v345_v38 }
  0x28   :  { %1089 = vmatpush3.msra.mxu0 %v345_v38  ;;  %1148 = vmatpush3.msra.mxu1 %v345_v38 }
  0x29   :  { %1090 = vmatprep.subr.mxu0 %v344_v41  ;;  %1133 = vmatprep.subr.mxu1 %v344_v41 }
  0x2a   :  { %144 = vadd.xlane.f32.xlu1 %v116_v28  ;;  %128 = vadd.xlane.f32.xlu0 %v108_v29 }
  0x2b   :  { %1091 = vmatpush3.msra.mxu0 %v344_v41  ;;  %1149 = vmatpush3.msra.mxu1 %v344_v41 }
  0x2c   :  { %1092 = vmatprep.subr.mxu0 %v343_v44  ;;  %1134 = vmatprep.subr.mxu1 %v343_v44 }
  0x2d   :  { %1093 = vmatpush3.msra.mxu0 %v343_v44  ;;  %1150 = vmatpush3.msra.mxu1 %v343_v44 }
  0x2e   :  { %146 = vadd.xlane.f32.xlu1 %v117_v31  ;;  %130 = vadd.xlane.f32.xlu0 %v109_v32 }
  0x2f   :  { %1094 = vmatprep.subr.mxu0 %v342_v47  ;;  %1135 = vmatprep.subr.mxu1 %v342_v47 }
  0x30   :  { %1095 = vmatpush3.msra.mxu0 %v342_v47  ;;  %1151 = vmatpush3.msra.mxu1 %v342_v47 }
  0x32   :  { %84 = vadd.xlane.f32.xlu1 %v1410_v35  ;;  %68 = vadd.xlane.f32.xlu0 %v1415_v36 }
  0x36   :  { %86 = vadd.xlane.f32.xlu1 %v1428_v39  ;;  %70 = vadd.xlane.f32.xlu0 %v1433_v40 }
  0x3a   :  { %148 = vadd.xlane.f32.xlu1 %v118_v42  ;;  %132 = vadd.xlane.f32.xlu0 %v110_v43 }
  0x3e   :  { %150 = vadd.xlane.f32.xlu1 %v119_v45  ;;  %134 = vadd.xlane.f32.xlu0 %v111_v46 }
  0x8b   :  { %v59_v48 = vpop.xlane.xlu1 %58  ;;  %v57_v49 = vpop.xlane.xlu0 %56 }
  0x8c   :  { %v1454_v52 = vmul.f32 0.03125, %v57_v49  ;;  %v1458_v54 = vmul.f32 0.03125, %v59_v48 }
  0x8e   :  { %v168_v58 = vmul.f32 %v1454_v52, %v1454_v52  ;;  %v169_v4 = vmul.f32 %v1458_v54, %v1458_v54 }
  0x8f   :  { %v75_v50 = vpop.xlane.xlu1 %74  ;;  %v73_v51 = vpop.xlane.xlu0 %72 }
  0x90   :  { %v1456_v53 = vmul.f32 0.03125, %v73_v51  ;;  %v1460_v55 = vmul.f32 0.03125, %v75_v50 }
  0x92   :  { %v176_v59 = vmul.f32 %v1456_v53, %v1456_v53  ;;  %v177_v5 = vmul.f32 %v1460_v55, %v1460_v55 }
  0x93   :  { %v137_v56 = vpop.xlane.xlu1 %136  ;;  %v121_v57 = vpop.xlane.xlu0 %120 }
  0x94   :  { %v160_v60 = vmul.f32 0.03125, %v137_v56  ;;  %v152_v61 = vmul.f32 0.03125, %v121_v57 }
  0x96   :  { %v192_v62 = vsub.f32 %v160_v60, %v176_v59  ;;  %v184_v63 = vsub.f32 %v152_v61, %v168_v58  ;;  %v248_v61 = vsub.f32 %v1286_v1, %v1454_v52 }
  0x97   :  { %v139_v6 = vpop.xlane.xlu1 %138  ;;  %v123_v7 = vpop.xlane.xlu0 %122 }
  0x98   :  { %v208_v12 = vmax.f32 %v192_v62, 0.0  ;;  %v200_v13 = vmax.f32 %v184_v63, 0.0  ;;  %v161_v14 = vmul.f32 0.03125, %v139_v6  ;;  %v153_v15 = vmul.f32 0.03125, %v123_v7 }
  0x99   :  { %v256_v62 = vsub.f32 %v1298_v3, %v1456_v53  ;;  %v1498_v3 = vld [vmem:[%s1921_s4] ss:$0 sm:$0xff] }
  0x9a   :  { %v224_v16 = vadd.f32 1e-05, %v208_v12  ;;  %v216_v17 = vadd.f32 1e-05, %v200_v13  ;;  %v193_v18 = vsub.f32 %v161_v14, %v177_v5  ;;  %v185_v19 = vsub.f32 %v153_v15, %v169_v4  ;;  %v1493_v12 = vld [vmem:[%s1920_s3] ss:$0 sm:$0xff] }
  0x9b   :  { %v77_v20 = vpop.xlane.xlu1 %76  ;;  %v61_v23 = vpop.xlane.xlu0 %60 }
  0x9c   :  { %1152 = vrsqrt.f32 %v224_v16  ;;  %v209_v24 = vmax.f32 %v193_v18, 0.0  ;;  %v201_v27 = vmax.f32 %v185_v19, 0.0  ;;  %v1470_v32 = vmul.f32 0.03125, %v77_v20 }
  0x9d   :  { %1154 = vrsqrt.f32 %v216_v17  ;;  %v1472_v33 = vmul.f32 0.03125, %v61_v23  ;;  %v249_v20 = vsub.f32 %v1281_v0, %v1458_v54 }
  0x9e   :  { %v225_v28 = vadd.f32 1e-05, %v209_v24  ;;  %v217_v29 = vadd.f32 1e-05, %v201_v27  ;;  %v178_v42 = vmul.f32 %v1470_v32, %v1470_v32  ;;  %v257_v27 = vsub.f32 %v1293_v2, %v1460_v55 }
  0x9f   :  { %v79_v30 = vpop.xlane.xlu1 %78  ;;  %v63_v31 = vpop.xlane.xlu0 %62  ;;  %v170_v43 = vmul.f32 %v1472_v33, %v1472_v33 }
  0xa0   :  { %1156 = vrsqrt.f32 %v225_v28  ;;  %v1474_v34 = vmul.f32 0.03125, %v79_v30  ;;  %v1476_v37 = vmul.f32 0.03125, %v63_v31 }
  0xa1   :  { %1158 = vrsqrt.f32 %v217_v29 }
  0xa2   :  { %v179_v48 = vmul.f32 %v1474_v34, %v1474_v34  ;;  %v171_v49 = vmul.f32 %v1476_v37, %v1476_v37 }
  0xa3   :  { %v141_v38 = vpop.xlane.xlu1 %140  ;;  %v125_v41 = vpop.xlane.xlu0 %124 }
  0xa4   :  { %v162_v44 = vmul.f32 0.03125, %v141_v38  ;;  %v154_v45 = vmul.f32 0.03125, %v125_v41 }
  0xa6   :  { %v194_v46 = vsub.f32 %v162_v44, %v178_v42  ;;  %v186_v47 = vsub.f32 %v154_v45, %v170_v43 }
  0xa7   :  { %v143_v50 = vpop.xlane.xlu1 %142  ;;  %v127_v51 = vpop.xlane.xlu0 %126 }
  0xa8   :  { %v210_v56 = vmax.f32 %v194_v46, 0.0  ;;  %v202_v57 = vmax.f32 %v186_v47, 0.0  ;;  %v163_v58 = vmul.f32 0.03125, %v143_v50  ;;  %v155_v59 = vmul.f32 0.03125, %v127_v51 }
  0xa9   :  { %v1153_v60 = vpop.eup %1152 }
  0xaa   :  { %v1155_v63 = vpop.eup %1154  ;;  %v226_v4 = vadd.f32 1e-05, %v210_v56  ;;  %v218_v5 = vadd.f32 1e-05, %v202_v57  ;;  %v195_v6 = vsub.f32 %v163_v58, %v179_v48  ;;  %v187_v7 = vsub.f32 %v155_v59, %v171_v49 }
  0xab   :  { %v81_v13 = vpop.xlane.xlu1 %80  ;;  %v65_v14 = vpop.xlane.xlu0 %64  ;;  %v264_v15 = vmul.f32 %v1155_v63, %v248_v61  ;;  %v272_v16 = vmul.f32 %v1153_v60, %v256_v62 }
  0xac   :  { %1160 = vrsqrt.f32 %v226_v4  ;;  %v211_v17 = vmax.f32 %v195_v6, 0.0  ;;  %v203_v1 = vmax.f32 %v187_v7, 0.0  ;;  %v1508_v38 = vmul.f32 0.03125, %v81_v13 }
  0xad   :  { %v1157_v52 = vpop.eup %1156  ;;  %1162 = vrsqrt.f32 %v218_v5  ;;  %v287_v53 = vmul.f32 %v1493_v12, %v264_v15  ;;  %v295_v18 = vmul.f32 %v1493_v12, %v272_v16  ;;  %v1510_v41 = vmul.f32 0.03125, %v65_v14 }
  0xae   :  { %v1159_v19 = vpop.eup %1158  ;;  %v227_v23 = vadd.f32 1e-05, %v211_v17  ;;  %v219_v24 = vadd.f32 1e-05, %v203_v1  ;;  %v273_v0 = vmul.f32 %v1157_v52, %v257_v27  ;;  %v180_v46 = vmul.f32 %v1508_v38, %v1508_v38 }
  0xaf   :  { %v83_v28 = vpop.xlane.xlu1 %82  ;;  %v67_v29 = vpop.xlane.xlu0 %66  ;;  %v310_v30 = vadd.f32 %v1498_v3, %v287_v53  ;;  %v318_v31 = vadd.f32 %v1498_v3, %v295_v18  ;;  %v265_v42 = vmul.f32 %v1159_v19, %v249_v20  ;;  %v172_v47 = vmul.f32 %v1510_v41, %v1510_v41 }
  0xb0   :  { %1164 = vrsqrt.f32 %v227_v23  ;;  %v1512_v54 = vmul.f32 0.03125, %v83_v28  ;;  %v1514_v43 = vmul.f32 0.03125, %v67_v29  ;;  %v296_v45 = vmul.f32 %v1493_v12, %v273_v0 }
  0xb1   :  { %1166 = vrsqrt.f32 %v219_v24  ;;  %1096 = vmatprep.mubr.f32.mxu0 %v310_v30  ;;  %1108 = vmatprep.mubr.f32.mxu1 %v318_v31  ;;  %v288_v44 = vmul.f32 %v1493_v12, %v265_v42  ;;  %v258_v7 = vsub.f32 %v1313_v8, %v1470_v32  ;;  %v250_v13 = vsub.f32 %v1318_v9, %v1472_v33 }
  0xb2   :  { %v319_v51 = vadd.f32 %v1498_v3, %v296_v45  ;;  %v181_v58 = vmul.f32 %v1512_v54, %v1512_v54  ;;  %v173_v59 = vmul.f32 %v1514_v43, %v1514_v43  ;;  %v251_v9 = vsub.f32 %v1330_v11, %v1476_v37 }
  0xb3   :  { %v145_v2 = vpop.xlane.xlu1 %144  ;;  %v129_v55 = vpop.xlane.xlu0 %128  ;;  %v311_v50 = vadd.f32 %v1498_v3, %v288_v44  ;;  %v259_v29 = vsub.f32 %v1325_v10, %v1474_v34 }
  0xb4   :  { %v164_v48 = vmul.f32 0.03125, %v145_v2  ;;  %v156_v49 = vmul.f32 0.03125, %v129_v55  ;;  %1109 = vmatmul.mubr.f32.vlgmr.msra.gmra.mxu1 %v319_v51 }
  0xb5   :  { %1097 = vmatmul.mubr.f32.vlgmr.msra.gmra.mxu0 %v311_v50 }
  0xb6   :  { %v196_v56 = vsub.f32 %v164_v48, %v180_v46  ;;  %v188_v57 = vsub.f32 %v156_v49, %v172_v47 }
  0xb7   :  { %v147_v60 = vpop.xlane.xlu1 %146  ;;  %v131_v61 = vpop.xlane.xlu0 %130 }
  0xb8   :  { %v212_v62 = vmax.f32 %v196_v56, 0.0  ;;  %v204_v63 = vmax.f32 %v188_v57, 0.0  ;;  %v165_v4 = vmul.f32 0.03125, %v147_v60  ;;  %v157_v5 = vmul.f32 0.03125, %v131_v61 }
  0xb9   :  { %v1161_v6 = vpop.eup %1160 }
  0xba   :  { %v1163_v14 = vpop.eup %1162  ;;  %v228_v15 = vadd.f32 1e-05, %v212_v62  ;;  %v220_v16 = vadd.f32 1e-05, %v204_v63  ;;  %v197_v17 = vsub.f32 %v165_v4, %v181_v58  ;;  %v189_v1 = vsub.f32 %v157_v5, %v173_v59 }
  0xbb   :  { %v85_v52 = vpop.xlane.xlu1 %84  ;;  %v69_v53 = vpop.xlane.xlu0 %68  ;;  %v266_v18 = vmul.f32 %v1163_v14, %v250_v13  ;;  %v274_v19 = vmul.f32 %v1161_v6, %v258_v7  ;;  %v260_v14 = vsub.f32 %v1360_v21, %v1508_v38  ;;  %v253_v21 = vsub.f32 %v1383_v26, %v1514_v43 }
  0xbc   :  { %1168 = vrsqrt.f32 %v228_v15  ;;  %v213_v20 = vmax.f32 %v197_v17, 0.0  ;;  %v205_v23 = vmax.f32 %v189_v1, 0.0  ;;  %v1540_v2 = vmul.f32 0.03125, %v85_v52 }
  0xbd   :  { %v1165_v24 = vpop.eup %1164  ;;  %1170 = vrsqrt.f32 %v220_v16  ;;  %v289_v27 = vmul.f32 %v1493_v12, %v266_v18  ;;  %v297_v8 = vmul.f32 %v1493_v12, %v274_v19  ;;  %v1542_v55 = vmul.f32 0.03125, %v69_v53 }
  0xbe   :  { %v1167_v32 = vpop.eup %1166  ;;  %v229_v33 = vadd.f32 1e-05, %v213_v20  ;;  %v221_v28 = vadd.f32 1e-05, %v205_v23  ;;  %v275_v11 = vmul.f32 %v1165_v24, %v259_v29  ;;  %v182_v48 = vmul.f32 %v1540_v2, %v1540_v2 }
  0xbf   :  { %v87_v30 = vpop.xlane.xlu1 %86  ;;  %v71_v31 = vpop.xlane.xlu0 %70  ;;  %v312_v42 = vadd.f32 %v1498_v3, %v289_v27  ;;  %v320_v0 = vadd.f32 %v1498_v3, %v297_v8  ;;  %v267_v44 = vmul.f32 %v1167_v32, %v251_v9  ;;  %v174_v49 = vmul.f32 %v1542_v55, %v1542_v55 }
  0xc0   :  { %1172 = vrsqrt.f32 %v229_v33  ;;  %v1544_v37 = vmul.f32 0.03125, %v87_v30  ;;  %v1546_v45 = vmul.f32 0.03125, %v71_v31  ;;  %v298_v47 = vmul.f32 %v1493_v12, %v275_v11 }
  0xc1   :  { %1174 = vrsqrt.f32 %v221_v28  ;;  %1099 = vmatprep.mubr.f32.mxu0 %v312_v42  ;;  %1111 = vmatprep.mubr.f32.mxu1 %v320_v0  ;;  %v290_v46 = vmul.f32 %v1493_v12, %v267_v44  ;;  %v252_v15 = vsub.f32 %v1365_v22, %v1510_v41  ;;  %v261_v20 = vsub.f32 %v1378_v25, %v1512_v54 }
  0xc2   :  { %v321_v57 = vadd.f32 %v1498_v3, %v298_v47  ;;  %v183_v60 = vmul.f32 %v1544_v37, %v1544_v37  ;;  %v175_v61 = vmul.f32 %v1546_v45, %v1546_v45  ;;  %v262_v30 = vsub.f32 %v1410_v35, %v1540_v2 }
  0xc3   :  { %v149_v10 = vpop.xlane.xlu1 %148  ;;  %v133_v34 = vpop.xlane.xlu0 %132  ;;  %v313_v56 = vadd.f32 %v1498_v3, %v290_v46  ;;  %v254_v42 = vsub.f32 %v1415_v36, %v1542_v55  ;;  %v255_v47 = vsub.f32 %v1433_v40, %v1546_v45  ;;  %v1595_v40 = vld [vmem:[%s1922_s2] ss:$0 sm:$0xff] }
  0xc4   :  { %v166_v50 = vmul.f32 0.03125, %v149_v10  ;;  %v158_v51 = vmul.f32 0.03125, %v133_v34  ;;  %1112 = vmatmul.mubr.f32.gmra.mxu1 %v321_v57  ;;  %v263_v10 = vsub.f32 %v1428_v39, %v1544_v37 }
  0xc5   :  { %1100 = vmatmul.mubr.f32.gmra.mxu0 %v313_v56 }
  0xc6   :  { %v198_v58 = vsub.f32 %v166_v50, %v182_v48  ;;  %v190_v59 = vsub.f32 %v158_v51, %v174_v49 }
  0xc7   :  { %v151_v62 = vpop.xlane.xlu1 %150  ;;  %v135_v63 = vpop.xlane.xlu0 %134 }
  0xc8   :  { %v214_v4 = vmax.f32 %v198_v58, 0.0  ;;  %v206_v5 = vmax.f32 %v190_v59, 0.0  ;;  %v167_v6 = vmul.f32 0.03125, %v151_v62  ;;  %v159_v7 = vmul.f32 0.03125, %v135_v63 }
  0xc9   :  { %v1169_v13 = vpop.eup %1168 }
  0xca   :  { %v1171_v16 = vpop.eup %1170  ;;  %v230_v17 = vadd.f32 1e-05, %v214_v4  ;;  %v222_v1 = vadd.f32 1e-05, %v206_v5  ;;  %v199_v52 = vsub.f32 %v167_v6, %v183_v60  ;;  %v191_v53 = vsub.f32 %v159_v7, %v175_v61 }
  0xcb   :  { %v268_v18 = vmul.f32 %v1171_v16, %v252_v15  ;;  %v276_v19 = vmul.f32 %v1169_v13, %v260_v14 }
  0xcc   :  { %1176 = vrsqrt.f32 %v230_v17  ;;  %v215_v23 = vmax.f32 %v199_v52, 0.0  ;;  %v207_v24 = vmax.f32 %v191_v53, 0.0 }
  0xcd   :  { %v1173_v27 = vpop.eup %1172  ;;  %1178 = vrsqrt.f32 %v222_v1  ;;  %v291_v22 = vmul.f32 %v1493_v12, %v268_v18  ;;  %v299_v38 = vmul.f32 %v1493_v12, %v276_v19 }
  0xce   :  { %v1175_v41 = vpop.eup %1174  ;;  %v231_v8 = vadd.f32 1e-05, %v215_v23  ;;  %v223_v32 = vadd.f32 1e-05, %v207_v24  ;;  %v277_v9 = vmul.f32 %v1173_v27, %v261_v20 }
  0xcf   :  { %v314_v33 = vadd.f32 %v1498_v3, %v291_v22  ;;  %v322_v25 = vadd.f32 %v1498_v3, %v299_v38  ;;  %v269_v54 = vmul.f32 %v1175_v41, %v253_v21 }
  0xd0   :  { %1180 = vrsqrt.f32 %v231_v8  ;;  %v300_v28 = vmul.f32 %v1493_v12, %v277_v9 }
  0xd1   :  { %1182 = vrsqrt.f32 %v223_v32  ;;  %1102 = vmatprep.mubr.f32.mxu0 %v314_v33  ;;  %1114 = vmatprep.mubr.f32.mxu1 %v322_v25  ;;  %v292_v26 = vmul.f32 %v1493_v12, %v269_v54 }
  0xd2   :  { %v323_v43 = vadd.f32 %v1498_v3, %v300_v28 }
  0xd3   :  { %v315_v29 = vadd.f32 %v1498_v3, %v292_v26 }
  0xd4   :  { %1115 = vmatmul.mubr.f32.gmra.mxu1 %v323_v43 }
  0xd5   :  { %1103 = vmatmul.mubr.f32.gmra.mxu0 %v315_v29 }
  0xd9   :  { %v1177_v31 = vpop.eup %1176 }
  0xda   :  { %v1179_v0 = vpop.eup %1178  ;;  %v278_v44 = vmul.f32 %v1177_v31, %v262_v30 }
  0xdb   :  { %v270_v11 = vmul.f32 %v1179_v0, %v254_v42 }
  0xdc   :  { %v301_v34 = vmul.f32 %v1493_v12, %v278_v44 }
  0xdd   :  { %v1181_v46 = vpop.eup %1180  ;;  %v293_v48 = vmul.f32 %v1493_v12, %v270_v11 }
  0xde   :  { %v1183_v49 = vpop.eup %1182  ;;  %v324_v35 = vadd.f32 %v1498_v3, %v301_v34  ;;  %v279_v2 = vmul.f32 %v1181_v46, %v263_v10 }
  0xdf   :  { %v316_v36 = vadd.f32 %v1498_v3, %v293_v48  ;;  %v271_v55 = vmul.f32 %v1183_v49, %v255_v47 }
  0xe0   :  { %1117 = vmatprep.mubr.f32.mxu1 %v324_v35  ;;  %v302_v50 = vmul.f32 %v1493_v12, %v279_v2 }
  0xe1   :  { %1105 = vmatprep.mubr.f32.mxu0 %v316_v36  ;;  %v294_v39 = vmul.f32 %v1493_v12, %v271_v55 }
  0xe2   :  { %v325_v37 = vadd.f32 %v1498_v3, %v302_v50 }
  0xe3   :  { %v317_v51 = vadd.f32 %v1498_v3, %v294_v39 }
  0xe4   :  { %1118 = vmatmul.mubr.f32.gmra.mxu1 %v325_v37 }
  0xe5   :  { %1106 = vmatmul.mubr.f32.gmra.mxu0 %v317_v51 }
 0x174   :  { %v1110_v56 = vpop.f32.mrf.mxu1 }
 0x175   :  { %v1098_v45 = vpop.f32.mrf.mxu0  ;;  %v570_v58 = vadd.f32 %v1110_v56, %v1595_v40 }
 0x176   :  { %v562_v57 = vadd.f32 %v1098_v45, %v1595_v40  ;;  %v464_v60 = vpop.f32.mrf.mxu1 }
 0x177   :  { %v424_v59 = vpop.f32.mrf.mxu0  ;;  %v1601_v61 = vmul.f32 0.70710677, %v570_v58  ;;  %v1607_v62 = vadd.f32 %v1595_v40, %v464_v60  ;;  %v1641_v11 = vmul.f32 0.5, %v570_v58 }
 0x178   :  { %v1599_v12 = vmul.f32 0.70710677, %v562_v57  ;;  %v1604_v3 = vadd.f32 %v1595_v40, %v424_v59  ;;  %v1639_v44 = vmul.f32 0.5, %v562_v57 }
 0x179   :  { %v602_v4 = vand.u32 2147483647, %v1601_v61  ;;  %v1615_v6 = vmul.f32 0.70710677, %v1607_v62  ;;  %vm922_vm1 = vcmp.ge.f32.partialorder %v1601_v61, 0.0 }
 0x17a   :  { %v594_v63 = vand.u32 2147483647, %v1599_v12  ;;  %v1612_v5 = vmul.f32 0.70710677, %v1604_v3  ;;  %v1658_v59 = vmul.f32 0.5, %v1604_v3  ;;  %vm914_vm0 = vcmp.ge.f32.partialorder %v1599_v12, 0.0 }
 0x17b   :  { %v618_v13 = vmul.f32 0.3275911, %v602_v4  ;;  %v601_v15 = vand.u32 2147483647, %v1615_v6  ;;  %v826_v18 = vsub.f32 0.0, %v602_v4  ;;  %vm921_vm3 = vcmp.ge.f32.partialorder %v1615_v6, 0.0 }
 0x17c   :  { %v610_v7 = vmul.f32 0.3275911, %v594_v63  ;;  %v593_v14 = vand.u32 2147483647, %v1612_v5  ;;  %v818_v53 = vsub.f32 0.0, %v594_v63  ;;  %vm913_vm2 = vcmp.ge.f32.partialorder %v1612_v5, 0.0 }
 0x17d   :  { %v634_v17 = vadd.f32 1.0, %v618_v13  ;;  %v617_v52 = vmul.f32 0.3275911, %v601_v15  ;;  %v842_v27 = vmul.f32 %v826_v18, %v602_v4  ;;  %v825_v21 = vsub.f32 0.0, %v601_v15 }
 0x17e   :  { %v626_v16 = vadd.f32 1.0, %v610_v7  ;;  %v609_v1 = vmul.f32 0.3275911, %v593_v14  ;;  %v817_v20 = vsub.f32 0.0, %v593_v14  ;;  %v834_v24 = vmul.f32 %v818_v53, %v594_v63 }
 0x17f   :  { %v633_v23 = vadd.f32 1.0, %v617_v52  ;;  %v867_v26 = vmul.f32 1.442695, %v842_v27  ;;  %v841_v43 = vmul.f32 %v825_v21, %v601_v15 }
 0x180   :  { %1184 = vrcp.f32 %v626_v16  ;;  %v625_v19 = vadd.f32 1.0, %v609_v1  ;;  %v833_v41 = vmul.f32 %v817_v20, %v593_v14  ;;  %v851_v25 = vmul.f32 1.442695, %v834_v24 }
 0x181   :  { %1186 = vrcp.f32 %v634_v17  ;;  %v865_v35 = vmul.f32 1.442695, %v841_v43  ;;  %v1665_v16 = vmul.f32 0.5, %v1607_v62 }
 0x182   :  { %1188 = vrcp.f32 %v625_v19  ;;  %v849_v31 = vmul.f32 1.442695, %v833_v41 }
 0x183   :  { %1190 = vrcp.f32 %v633_v23 }
 0x184   :  { %v1113_v38 = vpop.f32.mrf.mxu1  ;;  %1192 = vpow2.f32 %v851_v25 }
 0x185   :  { %v1101_v22 = vpop.f32.mrf.mxu0  ;;  %v1623_v32 = vadd.f32 %v1113_v38, %v1595_v40  ;;  %1194 = vpow2.f32 %v867_v26 }
 0x186   :  { %v1620_v8 = vadd.f32 %v1101_v22, %v1595_v40  ;;  %v474_v33 = vpop.f32.mrf.mxu1  ;;  %1196 = vpow2.f32 %v849_v31 }
 0x187   :  { %v434_v9 = vpop.f32.mrf.mxu0  ;;  %v1629_v28 = vmul.f32 0.70710677, %v1623_v32  ;;  %v1635_v30 = vadd.f32 %v1595_v40, %v474_v33 }
 0x188   :  { %v1626_v54 = vmul.f32 0.70710677, %v1620_v8  ;;  %v1632_v29 = vadd.f32 %v1595_v40, %v434_v9 }
 0x189   :  { %v604_v0 = vand.u32 2147483647, %v1629_v28  ;;  %v1647_v34 = vmul.f32 0.70710677, %v1635_v30  ;;  %vm924_vm5 = vcmp.ge.f32.partialorder %v1629_v28, 0.0 }
 0x18a   :  { %v596_v42 = vand.u32 2147483647, %v1626_v54  ;;  %v1644_v10 = vmul.f32 0.70710677, %v1632_v29  ;;  %vm916_vm4 = vcmp.ge.f32.partialorder %v1626_v54, 0.0 }
 0x18b   :  { %v620_v48 = vmul.f32 0.3275911, %v604_v0  ;;  %v603_v36 = vand.u32 2147483647, %v1647_v34  ;;  %v828_v56 = vsub.f32 0.0, %v604_v0  ;;  %vm923_vm7 = vcmp.ge.f32.partialorder %v1647_v34, 0.0 }
 0x18c   :  { %v612_v46 = vmul.f32 0.3275911, %v596_v42  ;;  %v820_v47 = vsub.f32 0.0, %v596_v42  ;;  %v595_v2 = vand.u32 2147483647, %v1644_v10  ;;  %vm915_vm6 = vcmp.ge.f32.partialorder %v1644_v10, 0.0 }
 0x18d   :  { %v1649_v49 = vpop.eup %1184  ;;  %v636_v37 = vadd.f32 1.0, %v620_v48  ;;  %v619_v60 = vmul.f32 0.3275911, %v603_v36  ;;  %v844_v52 = vmul.f32 %v828_v56, %v604_v0  ;;  %v827_v22 = vsub.f32 0.0, %v603_v36 }
 0x18e   :  { %v1653_v55 = vpop.eup %1186  ;;  %v674_v50 = vmul.f32 1.0614054, %v1649_v49  ;;  %v628_v39 = vadd.f32 1.0, %v612_v46  ;;  %v836_v45 = vmul.f32 %v820_v47, %v596_v42  ;;  %v611_v57 = vmul.f32 0.3275911, %v595_v2 }
 0x18f   :  { %v682_v51 = vmul.f32 1.0614054, %v1653_v55  ;;  %v1660_v63 = vpop.eup %1188  ;;  %v819_v13 = vsub.f32 0.0, %v595_v2  ;;  %v635_v53 = vadd.f32 1.0, %v619_v60  ;;  %v871_v25 = vmul.f32 1.442695, %v844_v52 }
 0x190   :  { %v690_v58 = vadd.f32 -1.4531521, %v674_v50  ;;  %1198 = vrcp.f32 %v628_v39  ;;  %v627_v7 = vadd.f32 1.0, %v611_v57  ;;  %v673_v15 = vmul.f32 1.0614054, %v1660_v63  ;;  %v1667_v17 = vpop.eup %1190 }
 0x191   :  { %v698_v4 = vadd.f32 -1.4531521, %v682_v51  ;;  %1200 = vrcp.f32 %v636_v37  ;;  %v855_v1 = vmul.f32 1.442695, %v836_v45  ;;  %v681_v23 = vmul.f32 1.0614054, %v1667_v17  ;;  %v1193_v46 = vpop.eup %1192 }
 0x192   :  { %v706_v14 = vmul.f32 %v1649_v49, %v690_v58  ;;  %1202 = vpow2.f32 %v865_v35  ;;  %v689_v20 = vadd.f32 -1.4531521, %v673_v15  ;;  %v835_v21 = vmul.f32 %v819_v13, %v595_v2  ;;  %v1195_v50 = vpop.eup %1194 }
 0x193   :  { %v714_v3 = vmul.f32 %v1653_v55, %v698_v4  ;;  %1204 = vrcp.f32 %v627_v7  ;;  %v697_v41 = vadd.f32 -1.4531521, %v681_v23  ;;  %v843_v35 = vmul.f32 %v827_v22, %v603_v36  ;;  %v1197_v56 = vpop.eup %1196 }
 0x194   :  { %v722_v19 = vadd.f32 1.4214138, %v706_v14  ;;  %v1116_v24 = vpop.f32.mrf.mxu1  ;;  %1206 = vrcp.f32 %v635_v53  ;;  %v705_v38 = vmul.f32 %v1660_v63, %v689_v20  ;;  %v853_v48 = vmul.f32 1.442695, %v835_v21 }
 0x195   :  { %v1104_v18 = vpop.f32.mrf.mxu0  ;;  %v730_v27 = vadd.f32 1.4214138, %v714_v3  ;;  %1208 = vpow2.f32 %v855_v1  ;;  %v1678_v26 = vadd.f32 %v1116_v24, %v1595_v40  ;;  %v713_v42 = vmul.f32 %v1667_v17, %v697_v41 }
 0x196   :  { %v738_v62 = vmul.f32 %v1649_v49, %v722_v19  ;;  %v1674_v9 = vadd.f32 %v1104_v18, %v1595_v40  ;;  %v721_v31 = vadd.f32 1.4214138, %v705_v38  ;;  %v1692_v58 = vmul.f32 0.5, %v1620_v8 }
 0x197   :  { %v746_v33 = vmul.f32 %v1653_v55, %v730_v27  ;;  %v1685_v2 = vmul.f32 0.70710677, %v1678_v26  ;;  %v729_v51 = vadd.f32 1.4214138, %v713_v42  ;;  %1210 = vpow2.f32 %v871_v25  ;;  %v444_v6 = vpop.f32.mrf.mxu0 }
 0x198   :  { %v754_v43 = vadd.f32 -0.28449672, %v738_v62  ;;  %v1682_v0 = vmul.f32 0.70710677, %v1674_v9  ;;  %v737_v37 = vmul.f32 %v1660_v63, %v721_v31  ;;  %v1695_v36 = vmul.f32 0.5, %v1623_v32 }
 0x199   :  { %v762_v47 = vadd.f32 -0.28449672, %v746_v33  ;;  %v745_v7 = vmul.f32 %v1667_v17, %v729_v51  ;;  %1212 = vpow2.f32 %v853_v48  ;;  %v1701_v3 = vmul.f32 1.442695, %v843_v35 }
 0x19a   :  { %v770_v39 = vmul.f32 %v1649_v49, %v754_v43  ;;  %v598_v45 = vand.u32 2147483647, %v1682_v0  ;;  %v753_v4 = vadd.f32 -0.28449672, %v737_v37  ;;  %v1704_v8 = vand.u32 2147483647, %v1685_v2 }
 0x19b   :  { %v778_v57 = vmul.f32 %v1653_v55, %v762_v47  ;;  %v761_v53 = vadd.f32 -0.28449672, %v745_v7  ;;  %vm918_vm8 = vcmp.ge.f32.partialorder %v1682_v0, 0.0  ;;  %vm926_vm9 = vcmp.ge.f32.partialorder %v1685_v2, 0.0 }
 0x19c   :  { %v786_v60 = vadd.f32 0.2548296, %v770_v39  ;;  %v614_v13 = vmul.f32 0.3275911, %v598_v45  ;;  %v769_v52 = vmul.f32 %v1660_v63, %v753_v4  ;;  %v822_v27 = vsub.f32 0.0, %v598_v45 }
 0x19d   :  { %v1698_v14 = vpop.eup %1198  ;;  %v794_v15 = vadd.f32 0.2548296, %v778_v57  ;;  %v777_v62 = vmul.f32 %v1667_v17, %v761_v53  ;;  %v622_v25 = vmul.f32 0.3275911, %v1704_v8 }
 0x19e   :  { %v1706_v1 = vpop.eup %1200  ;;  %v802_v32 = vmul.f32 %v1649_v49, %v786_v60  ;;  %v676_v18 = vmul.f32 1.0614054, %v1698_v14  ;;  %v630_v24 = vadd.f32 1.0, %v614_v13  ;;  %v785_v22 = vadd.f32 0.2548296, %v769_v52 }
 0x19f   :  { %v1203_v19 = vpop.eup %1202  ;;  %v810_v20 = vmul.f32 %v1653_v55, %v794_v15  ;;  %v684_v23 = vmul.f32 1.0614054, %v1706_v1  ;;  %v793_v42 = vadd.f32 0.2548296, %v777_v62  ;;  %v838_v13 = vmul.f32 %v822_v27, %v598_v45 }
 0x1a0   :  { %v882_v21 = vmul.f32 %v1193_v46, %v802_v32  ;;  %v692_v38 = vadd.f32 -1.4531521, %v676_v18  ;;  %v1715_v49 = vpop.eup %1204  ;;  %1214 = vrcp.f32 %v630_v24  ;;  %v801_v31 = vmul.f32 %v1660_v63, %v785_v22 }
 0x1a1   :  { %v890_v41 = vmul.f32 %v1195_v50, %v810_v20  ;;  %v700_v33 = vadd.f32 -1.4531521, %v684_v23  ;;  %v1719_v43 = vpop.eup %1206  ;;  %v675_v35 = vmul.f32 1.0614054, %v1715_v49  ;;  %v809_v57 = vmul.f32 %v1667_v17, %v793_v42 }
 0x1a2   :  { %v898_v55 = vsub.f32 1.0, %v882_v21  ;;  %v708_v46 = vmul.f32 %v1698_v14, %v692_v38  ;;  %v683_v50 = vmul.f32 1.0614054, %v1719_v43  ;;  %v1209_v39 = vpop.eup %1208  ;;  %v881_v51 = vmul.f32 %v1197_v56, %v801_v31 }
 0x1a3   :  { %v906_v47 = vsub.f32 1.0, %v890_v41  ;;  %v716_v48 = vmul.f32 %v1706_v1, %v700_v33  ;;  %v691_v7 = vadd.f32 -1.4531521, %v675_v35  ;;  %v889_v52 = vmul.f32 %v1203_v19, %v809_v57 }
 0x1a4   :  { %v930_v37 = vsub.f32 0.0, %v898_v55  ;;  %v724_v60 = vadd.f32 1.4214138, %v708_v46  ;;  %v897_v32 = vsub.f32 1.0, %v881_v51  ;;  %v1211_v23 = vpop.eup %1210  ;;  %v699_v19 = vadd.f32 -1.4531521, %v683_v50 }
 0x1a5   :  { %v938_v4 = vsub.f32 0.0, %v906_v47  ;;  %v732_v63 = vadd.f32 1.4214138, %v716_v48  ;;  %v707_v17 = vmul.f32 %v1715_v49, %v691_v7  ;;  %v905_v22 = vsub.f32 1.0, %v889_v52  ;;  %v484_v7 = vpop.f32.mrf.mxu1 }
 0x1a6   :  { %v946_v15 = vsel %vm914_vm0, %v898_v55, %v930_v37  ;;  %v740_v53 = vmul.f32 %v1698_v14, %v724_v60  ;;  %v929_v21 = vsub.f32 0.0, %v897_v32  ;;  %v1213_v38 = vpop.eup %1212  ;;  %v715_v46 = vmul.f32 %v1719_v43, %v699_v19 }
 0x1a7   :  { %v978_v18 = vadd.f32 1.0, %v946_v15  ;;  %v954_v20 = vsel %vm922_vm1, %v906_v47, %v938_v4  ;;  %v748_v56 = vmul.f32 %v1706_v1, %v732_v63  ;;  %v723_v62 = vadd.f32 1.4214138, %v707_v17 }
 0x1a8   :  { %v986_v24 = vadd.f32 1.0, %v954_v20  ;;  %v756_v45 = vadd.f32 -0.28449672, %v740_v53  ;;  %v945_v61 = vsel %vm913_vm2, %v897_v32, %v929_v21  ;;  %v937_v33 = vsub.f32 0.0, %v905_v22 }
 0x1a9   :  { %v994_v12 = vmul.f32 %v978_v18, %v1639_v44  ;;  %v764_v27 = vadd.f32 -0.28449672, %v748_v56  ;;  %v977_v31 = vadd.f32 1.0, %v945_v61  ;;  %v739_v44 = vmul.f32 %v1715_v49, %v723_v62 }
 0x1aa   :  { %v1002_v41 = vmul.f32 %v986_v24, %v1641_v11  ;;  %v772_v55 = vmul.f32 %v1698_v14, %v756_v45  ;;  %v953_v5 = vsel %vm921_vm3, %v905_v22, %v937_v33  ;;  %1216 = vpow2.f32 %v1701_v3 }
 0x1ab   :  { %1010 = vst [vmem:[%s1923_s5 + $0x8] sm:$0xff] %v994_v12  ;;  %v780_v42 = vmul.f32 %v1706_v1, %v764_v27  ;;  %v638_v47 = vadd.f32 1.0, %v622_v25  ;;  %v993_v48 = vmul.f32 %v977_v31, %v1658_v59  ;;  %v985_v35 = vadd.f32 1.0, %v953_v5 }
 0x1ac   :  { %1018 = vst [vmem:[%s1923_s5 + $0x48] sm:$0xff] %v1002_v41  ;;  %v788_v11 = vadd.f32 0.2548296, %v772_v55  ;;  %v755_v37 = vadd.f32 -0.28449672, %v739_v44  ;;  %v963_v21 = vmul.f32 0.5, %v1632_v29 }
 0x1ad   :  { %v796_v50 = vadd.f32 0.2548296, %v780_v42  ;;  %v1754_v51 = vpop.eup %1214  ;;  %v731_v60 = vadd.f32 1.4214138, %v715_v46  ;;  %v859_v4 = vmul.f32 1.442695, %v838_v13  ;;  %1218 = vrcp.f32 %v638_v47  ;;  %1009 = vst [vmem:[%s1923_s5] sm:$0xff] %v993_v48  ;;  %v1107_v46 = vpop.f32.mrf.mxu0 }
 0x1ae   :  { %v804_v57 = vmul.f32 %v1698_v14, %v788_v11  ;;  %v1001_v3 = vmul.f32 %v985_v35, %v1665_v16  ;;  %v771_v25 = vmul.f32 %v1715_v49, %v755_v37  ;;  %v678_v63 = vmul.f32 1.0614054, %v1754_v51 }
 0x1af   :  { %v812_v59 = vmul.f32 %v1706_v1, %v796_v50  ;;  %v747_v14 = vmul.f32 %v1719_v43, %v731_v60  ;;  %v830_v13 = vsub.f32 0.0, %v1704_v8  ;;  %v1771_v1 = vadd.f32 %v1595_v40, %v444_v6 }
 0x1b0   :  { %v884_v15 = vmul.f32 %v1209_v39, %v804_v57  ;;  %1017 = vst [vmem:[%s1923_s5 + $0x40] sm:$0xff] %v1001_v3  ;;  %v787_v16 = vadd.f32 0.2548296, %v771_v25  ;;  %v694_v52 = vadd.f32 -1.4531521, %v678_v63  ;;  %1220 = vpow2.f32 %v859_v4 }
 0x1b1   :  { %v892_v32 = vmul.f32 %v1211_v23, %v812_v59  ;;  %v763_v18 = vadd.f32 -0.28449672, %v747_v14  ;;  %v1774_v39 = vadd.f32 %v1595_v40, %v484_v7  ;;  %v1779_v24 = vmul.f32 0.70710677, %v1771_v1  ;;  %v1119_v7 = vpop.f32.mrf.mxu1 }
 0x1b2   :  { %v900_v53 = vsub.f32 1.0, %v884_v15  ;;  %v803_v56 = vmul.f32 %v1715_v49, %v787_v16  ;;  %v710_v17 = vmul.f32 %v1754_v51, %v694_v52  ;;  %v846_v61 = vmul.f32 %v830_v13, %v1704_v8 }
 0x1b3   :  { %v908_v20 = vsub.f32 1.0, %v892_v32  ;;  %v779_v22 = vmul.f32 %v1719_v43, %v763_v18  ;;  %v1784_v45 = vmul.f32 0.70710677, %v1774_v39  ;;  %v1787_v19 = vand.u32 2147483647, %v1779_v24  ;;  %v454_v32 = vpop.f32.mrf.mxu0 }
 0x1b4   :  { %v932_v23 = vsub.f32 0.0, %v900_v53  ;;  %v883_v27 = vmul.f32 %v1213_v38, %v803_v56  ;;  %v726_v62 = vadd.f32 1.4214138, %v710_v17  ;;  %v875_v50 = vmul.f32 1.442695, %v846_v61 }
 0x1b5   :  { %v940_v12 = vsub.f32 0.0, %v908_v20  ;;  %v795_v41 = vadd.f32 0.2548296, %v779_v22  ;;  %v1793_v33 = vand.u32 2147483647, %v1784_v45  ;;  %v971_v14 = vmul.f32 0.5, %v1635_v30 }
 0x1b6   :  { %v948_v49 = vsel %vm916_vm4, %v900_v53, %v932_v23  ;;  %v899_v31 = vsub.f32 1.0, %v883_v27  ;;  %v742_v38 = vmul.f32 %v1754_v51, %v726_v62  ;;  %v613_v54 = vmul.f32 0.3275911, %v1787_v19 }
 0x1b7   :  { %v980_v29 = vadd.f32 1.0, %v948_v49  ;;  %v956_v55 = vsel %vm924_vm5, %v908_v20, %v940_v12  ;;  %v811_v44 = vmul.f32 %v1719_v43, %v795_v41  ;;  %v1217_v5 = vpop.eup %1216  ;;  %v621_v48 = vmul.f32 0.3275911, %v1793_v33 }
 0x1b8   :  { %v988_v42 = vadd.f32 1.0, %v956_v55  ;;  %v931_v11 = vsub.f32 0.0, %v899_v31  ;;  %v758_v47 = vadd.f32 -0.28449672, %v742_v38  ;;  %v629_v37 = vadd.f32 1.0, %v613_v54 }
 0x1b9   :  { %v996_v8 = vmul.f32 %v980_v29, %v1692_v58  ;;  %v891_v35 = vmul.f32 %v1217_v5, %v811_v44  ;;  %v637_v60 = vadd.f32 1.0, %v621_v48  ;;  %v1811_v58 = vadd.f32 %v1107_v46, %v1595_v40  ;;  %v494_v48 = vpop.f32.mrf.mxu1 }
 0x1ba   :  { %v1004_v28 = vmul.f32 %v988_v42, %v1695_v36  ;;  %v1804_v57 = vpop.eup %1218  ;;  %v947_v10 = vsel %vm915_vm6, %v899_v31, %v931_v11  ;;  %v774_v43 = vmul.f32 %v1754_v51, %v758_v47  ;;  %1222 = vrcp.f32 %v629_v37 }
 0x1bb   :  { %1012 = vst [vmem:[%s1923_s5 + $0x18] sm:$0xff] %v996_v8  ;;  %v979_v36 = vadd.f32 1.0, %v947_v10  ;;  %v907_v4 = vsub.f32 1.0, %v891_v35  ;;  %v686_v6 = vmul.f32 1.0614054, %v1804_v57  ;;  %1224 = vrcp.f32 %v637_v60 }
 0x1bc   :  { %1020 = vst [vmem:[%s1923_s5 + $0x58] sm:$0xff] %v1004_v28  ;;  %v790_v3 = vadd.f32 0.2548296, %v774_v43  ;;  %1226 = vpow2.f32 %v875_v50  ;;  %v1825_v53 = vmul.f32 0.70710677, %v1811_v58  ;;  %v821_v34 = vsub.f32 0.0, %v1787_v19 }
 0x1bd   :  { %v995_v59 = vmul.f32 %v979_v36, %v963_v21  ;;  %v939_v25 = vsub.f32 0.0, %v907_v4  ;;  %v702_v63 = vadd.f32 -1.4531521, %v686_v6  ;;  %v1221_v15 = vpop.eup %1220  ;;  %v1829_v30 = vadd.f32 %v1119_v7, %v1595_v40 }
 0x1be   :  { %v806_v13 = vmul.f32 %v1754_v51, %v790_v3  ;;  %v600_v56 = vand.u32 2147483647, %v1825_v53  ;;  %v1833_v17 = vadd.f32 %v1595_v40, %v454_v32  ;;  %v829_v22 = vsub.f32 0.0, %v1793_v33 }
 0x1bf   :  { %1011 = vst [vmem:[%s1923_s5 + $0x10] sm:$0xff] %v995_v59  ;;  %v955_v16 = vsel %vm923_vm7, %v907_v4, %v939_v25  ;;  %v718_v52 = vmul.f32 %v1804_v57, %v702_v63  ;;  %v1837_v12 = vmul.f32 0.70710677, %v1829_v30  ;;  %v837_v61 = vmul.f32 %v821_v34, %v1787_v19 }
 0x1c0   :  { %v987_v18 = vadd.f32 1.0, %v955_v16  ;;  %v886_v20 = vmul.f32 %v1221_v15, %v806_v13  ;;  %v616_v62 = vmul.f32 0.3275911, %v600_v56  ;;  %v1841_v49 = vmul.f32 0.70710677, %v1833_v17 }
 0x1c1   :  { %v734_v51 = vadd.f32 1.4214138, %v718_v52  ;;  %v608_v29 = vand.u32 2147483647, %v1837_v12  ;;  %v845_v44 = vmul.f32 %v829_v22, %v1793_v33  ;;  %v966_v46 = vmul.f32 0.5, %v1674_v9 }
 0x1c2   :  { %v1003_v23 = vmul.f32 %v987_v18, %v971_v14  ;;  %v902_v21 = vsub.f32 1.0, %v886_v20  ;;  %v632_v31 = vadd.f32 1.0, %v616_v62  ;;  %v1850_v38 = vand.u32 2147483647, %v1841_v49 }
 0x1c3   :  { %v750_v27 = vmul.f32 %v1804_v57, %v734_v51  ;;  %v624_v54 = vmul.f32 0.3275911, %v608_v29  ;;  %v857_v11 = vmul.f32 1.442695, %v837_v61  ;;  %v873_v43 = vmul.f32 1.442695, %v845_v44 }
 0x1c4   :  { %1019 = vst [vmem:[%s1923_s5 + $0x50] sm:$0xff] %v1003_v23  ;;  %v934_v41 = vsub.f32 0.0, %v902_v21  ;;  %1228 = vrcp.f32 %v632_v31  ;;  %v615_v0 = vmul.f32 0.3275911, %v1850_v38  ;;  %v1861_v36 = vadd.f32 %v1595_v40, %v494_v48 }
 0x1c5   :  { %v766_v55 = vadd.f32 -0.28449672, %v750_v27  ;;  %v640_v47 = vadd.f32 1.0, %v624_v54  ;;  %v824_v25 = vsub.f32 0.0, %v600_v56  ;;  %v974_v51 = vmul.f32 0.5, %v1678_v26 }
 0x1c6   :  { %v950_v42 = vsel %vm918_vm8, %v902_v21, %v934_v41  ;;  %v631_v33 = vadd.f32 1.0, %v615_v0  ;;  %v1864_v7 = vmul.f32 0.70710677, %v1861_v36  ;;  %v823_v21 = vsub.f32 0.0, %v1850_v38 }
 0x1c7   :  { %v982_v5 = vadd.f32 1.0, %v950_v42  ;;  %v782_v8 = vmul.f32 %v1804_v57, %v766_v55  ;;  %v1223_v19 = vpop.eup %1222  ;;  %1230 = vrcp.f32 %v640_v47  ;;  %v840_v52 = vmul.f32 %v824_v25, %v600_v56 }
 0x1c8   :  { %v1225_v28 = vpop.eup %1224  ;;  %v677_v37 = vmul.f32 1.0614054, %v1223_v19  ;;  %1232 = vpow2.f32 %v857_v11  ;;  %v607_v32 = vand.u32 2147483647, %v1864_v7  ;;  %vm917_vm10 = vcmp.ge.f32.partialorder %v1779_v24, 0.0 }
 0x1c9   :  { %v998_v35 = vmul.f32 %v982_v5, %v966_v46  ;;  %v798_v50 = vadd.f32 0.2548296, %v782_v8  ;;  %v685_v10 = vmul.f32 1.0614054, %v1225_v28  ;;  %v1227_v4 = vpop.eup %1226  ;;  %1234 = vrcp.f32 %v631_v33 }
 0x1ca   :  { %v693_v60 = vadd.f32 -1.4531521, %v677_v37  ;;  %1236 = vpow2.f32 %v873_v43  ;;  %v623_v20 = vmul.f32 0.3275911, %v607_v32  ;;  %v863_v56 = vmul.f32 1.442695, %v840_v52 }
 0x1cb   :  { %1014 = vst [vmem:[%s1923_s5 + $0x28] sm:$0xff] %v998_v35  ;;  %v814_v9 = vmul.f32 %v1804_v57, %v798_v50  ;;  %v701_v6 = vadd.f32 -1.4531521, %v685_v10  ;;  %v832_v57 = vsub.f32 0.0, %v608_v29  ;;  %v839_v46 = vmul.f32 %v823_v21, %v1850_v38 }
 0x1cc   :  { %v709_v59 = vmul.f32 %v1223_v19, %v693_v60  ;;  %v639_v61 = vadd.f32 1.0, %v623_v20  ;;  %vm925_vm11 = vcmp.ge.f32.partialorder %v1784_v45, 0.0  ;;  %v973_v21 = vmul.f32 0.5, %v1774_v39 }
 0x1cd   :  { %v894_v3 = vmul.f32 %v1227_v4, %v814_v9  ;;  %v717_v63 = vmul.f32 %v1225_v28, %v701_v6  ;;  %v848_v41 = vmul.f32 %v832_v57, %v608_v29  ;;  %v861_v33 = vmul.f32 1.442695, %v839_v46 }
 0x1ce   :  { %v725_v14 = vadd.f32 1.4214138, %v709_v59  ;;  %1238 = vrcp.f32 %v639_v61  ;;  %v831_v4 = vsub.f32 0.0, %v607_v32  ;;  %vm920_vm12 = vcmp.ge.f32.partialorder %v1825_v53, 0.0 }
 0x1cf   :  { %v910_v15 = vsub.f32 1.0, %v894_v3  ;;  %v733_v13 = vadd.f32 1.4214138, %v717_v63  ;;  %v879_v8 = vmul.f32 1.442695, %v848_v41  ;;  %1240 = vpow2.f32 %v863_v56 }
 0x1d0   :  { %v741_v16 = vmul.f32 %v1223_v19, %v725_v14  ;;  %v847_v57 = vmul.f32 %v831_v4, %v607_v32  ;;  %vm928_vm13 = vcmp.ge.f32.partialorder %v1837_v12, 0.0  ;;  %vm919_vm14 = vcmp.ge.f32.partialorder %v1841_v49, 0.0 }
 0x1d1   :  { %v942_v40 = vsub.f32 0.0, %v910_v15  ;;  %v749_v18 = vmul.f32 %v1225_v28, %v733_v13  ;;  %v1870_v22 = vpop.eup %1228  ;;  %1242 = vpow2.f32 %v879_v8  ;;  %vm927_vm15 = vcmp.ge.f32.partialorder %v1864_v7, 0.0 }
 0x1d2   :  { %v757_v23 = vadd.f32 -0.28449672, %v741_v16  ;;  %v680_v31 = vmul.f32 1.0614054, %v1870_v22  ;;  %1244 = vpow2.f32 %v861_v33 }
 0x1d3   :  { %v958_v34 = vsel %vm926_vm9, %v910_v15, %v942_v40  ;;  %v765_v62 = vadd.f32 -0.28449672, %v749_v18  ;;  %v965_v18 = vmul.f32 0.5, %v1771_v1 }
 0x1d4   :  { %v990_v27 = vadd.f32 1.0, %v958_v34  ;;  %v773_v55 = vmul.f32 %v1223_v19, %v757_v23  ;;  %v1873_v44 = vpop.eup %1230  ;;  %v696_v26 = vadd.f32 -1.4531521, %v680_v31 }
 0x1d5   :  { %v781_v2 = vmul.f32 %v1225_v28, %v765_v62  ;;  %v688_v29 = vmul.f32 1.0614054, %v1873_v44  ;;  %v1233_v11 = vpop.eup %1232 }
 0x1d6   :  { %v1006_v42 = vmul.f32 %v990_v27, %v974_v51  ;;  %v789_v54 = vadd.f32 0.2548296, %v773_v55  ;;  %v712_v0 = vmul.f32 %v1870_v22, %v696_v26  ;;  %v1235_v48 = vpop.eup %1234  ;;  %v877_v55 = vmul.f32 1.442695, %v847_v57 }
 0x1d7   :  { %v797_v5 = vadd.f32 0.2548296, %v781_v2  ;;  %v704_v50 = vadd.f32 -1.4531521, %v688_v29  ;;  %v1237_v37 = vpop.eup %1236  ;;  %v679_v38 = vmul.f32 1.0614054, %v1235_v48 }
 0x1d8   :  { %1022 = vst [vmem:[%s1923_s5 + $0x68] sm:$0xff] %v1006_v42  ;;  %v805_v47 = vmul.f32 %v1223_v19, %v789_v54  ;;  %v728_v43 = vadd.f32 1.4214138, %v712_v0  ;;  %1246 = vpow2.f32 %v877_v55 }
 0x1d9   :  { %v813_v35 = vmul.f32 %v1225_v28, %v797_v5  ;;  %v720_v60 = vmul.f32 %v1873_v44, %v704_v50  ;;  %v695_v19 = vadd.f32 -1.4531521, %v679_v38  ;;  %v968_v38 = vmul.f32 0.5, %v1811_v58 }
 0x1da   :  { %v885_v10 = vmul.f32 %v1233_v11, %v805_v47  ;;  %v744_v3 = vmul.f32 %v1870_v22, %v728_v43 }
 0x1db   :  { %v893_v9 = vmul.f32 %v1237_v37, %v813_v35  ;;  %v736_v25 = vadd.f32 1.4214138, %v720_v60  ;;  %v711_v28 = vmul.f32 %v1235_v48, %v695_v19  ;;  %v1239_v23 = vpop.eup %1238 }
 0x1dc   :  { %v901_v6 = vsub.f32 1.0, %v885_v10  ;;  %v760_v15 = vadd.f32 -0.28449672, %v744_v3  ;;  %v687_v61 = vmul.f32 1.0614054, %v1239_v23  ;;  %v1241_v42 = vpop.eup %1240 }
 0x1dd   :  { %v909_v59 = vsub.f32 1.0, %v893_v9  ;;  %v752_v13 = vmul.f32 %v1873_v44, %v736_v25  ;;  %v727_v52 = vadd.f32 1.4214138, %v711_v28 }
 0x1de   :  { %v933_v63 = vsub.f32 0.0, %v901_v6  ;;  %v776_v16 = vmul.f32 %v1870_v22, %v760_v15  ;;  %v703_v2 = vadd.f32 -1.4531521, %v687_v61  ;;  %v1243_v5 = vpop.eup %1242 }
 0x1df   :  { %v941_v14 = vsub.f32 0.0, %v909_v59  ;;  %v768_v51 = vadd.f32 -0.28449672, %v752_v13  ;;  %v743_v62 = vmul.f32 %v1235_v48, %v727_v52  ;;  %v1245_v35 = vpop.eup %1244 }
 0x1e0   :  { %v949_v40 = vsel %vm917_vm10, %v901_v6, %v933_v63  ;;  %v792_v24 = vadd.f32 0.2548296, %v776_v16  ;;  %v719_v46 = vmul.f32 %v1239_v23, %v703_v2  ;;  %v967_v63 = vmul.f32 0.5, %v1833_v17 }
 0x1e1   :  { %v981_v20 = vadd.f32 1.0, %v949_v40  ;;  %v957_v34 = vsel %vm925_vm11, %v909_v59, %v941_v14  ;;  %v784_v32 = vmul.f32 %v1873_v44, %v768_v51  ;;  %v759_v56 = vadd.f32 -0.28449672, %v743_v62 }
 0x1e2   :  { %v989_v27 = vadd.f32 1.0, %v957_v34  ;;  %v808_v31 = vmul.f32 %v1870_v22, %v792_v24  ;;  %v735_v11 = vadd.f32 1.4214138, %v719_v46  ;;  %v975_v17 = vmul.f32 0.5, %v1861_v36 }
 0x1e3   :  { %v997_v41 = vmul.f32 %v981_v20, %v965_v18  ;;  %v800_v1 = vadd.f32 0.2548296, %v784_v32  ;;  %v775_v54 = vmul.f32 %v1235_v48, %v759_v56 }
 0x1e4   :  { %v1005_v45 = vmul.f32 %v989_v27, %v973_v21  ;;  %v888_v39 = vmul.f32 %v1241_v42, %v808_v31  ;;  %v751_v37 = vmul.f32 %v1239_v23, %v735_v11 }
 0x1e5   :  { %1013 = vst [vmem:[%s1923_s5 + $0x20] sm:$0xff] %v997_v41  ;;  %v816_v26 = vmul.f32 %v1873_v44, %v800_v1  ;;  %v791_v29 = vadd.f32 0.2548296, %v775_v54  ;;  %v1247_v28 = vpop.eup %1246 }
 0x1e6   :  { %1021 = vst [vmem:[%s1923_s5 + $0x60] sm:$0xff] %v1005_v45  ;;  %v904_v22 = vsub.f32 1.0, %v888_v39  ;;  %v767_v9 = vadd.f32 -0.28449672, %v751_v37 }
 0x1e7   :  { %v896_v8 = vmul.f32 %v1243_v5, %v816_v26  ;;  %v807_v0 = vmul.f32 %v1235_v48, %v791_v29  ;;  %v976_v48 = vmul.f32 0.5, %v1829_v30 }
 0x1e8   :  { %v936_v47 = vsub.f32 0.0, %v904_v22  ;;  %v783_v3 = vmul.f32 %v1239_v23, %v767_v9 }
 0x1e9   :  { %v912_v50 = vsub.f32 1.0, %v896_v8  ;;  %v887_v43 = vmul.f32 %v1245_v35, %v807_v0 }
 0x1ea   :  { %v952_v10 = vsel %vm920_vm12, %v904_v22, %v936_v47  ;;  %v799_v58 = vadd.f32 0.2548296, %v783_v3 }
 0x1eb   :  { %v984_v33 = vadd.f32 1.0, %v952_v10  ;;  %v944_v44 = vsub.f32 0.0, %v912_v50  ;;  %v903_v60 = vsub.f32 1.0, %v887_v43 }
 0x1ec   :  { %v815_v15 = vmul.f32 %v1239_v23, %v799_v58 }
 0x1ed   :  { %v1000_v4 = vmul.f32 %v984_v33, %v968_v38  ;;  %v960_v6 = vsel %vm928_vm13, %v912_v50, %v944_v44  ;;  %v935_v59 = vsub.f32 0.0, %v903_v60 }
 0x1ee   :  { %v992_v19 = vadd.f32 1.0, %v960_v6  ;;  %v895_v14 = vmul.f32 %v1247_v28, %v815_v15 }
 0x1ef   :  { %1016 = vst [vmem:[%s1923_s5 + $0x38] sm:$0xff] %v1000_v4  ;;  %v951_v25 = vsel %vm919_vm14, %v903_v60, %v935_v59 }
 0x1f0   :  { %v1008_v53 = vmul.f32 %v992_v19, %v976_v48  ;;  %v983_v12 = vadd.f32 1.0, %v951_v25  ;;  %v911_v13 = vsub.f32 1.0, %v895_v14 }
 0x1f2   :  { %1024 = vst [vmem:[%s1923_s5 + $0x78] sm:$0xff] %v1008_v53  ;;  %v999_v30 = vmul.f32 %v983_v12, %v967_v63  ;;  %v943_v49 = vsub.f32 0.0, %v911_v13 }
 0x1f4   :  { %1015 = vst [vmem:[%s1923_s5 + $0x30] sm:$0xff] %v999_v30  ;;  %v959_v57 = vsel %vm927_vm15, %v911_v13, %v943_v49 }
 0x1f5   :  { %v991_v40 = vadd.f32 1.0, %v959_v57 }
 0x1f7   :  { %v1007_v16 = vmul.f32 %v991_v40, %v975_v17 }
 0x1f9   :  { %1023 = vst [vmem:[%s1923_s5 + $0x70] sm:$0xff] %v1007_v16 }

</bundles_post_ra>
